<compile_context>
chip_gen: v6e
topology: v6e:2x2x1
jax: 0.10.0
libtpu: 0.0.40
codegen_flags: <defaults>
</compile_context>

<pallas_src>
import numpy as np
import jax
import jax.numpy as jnp
from jax import lax
from jax.experimental import pallas as pl
from jax.experimental.pallas import tpu as pltpu

EPS = 1e-5
INV_SQRT2 = float(1.0 / np.sqrt(2.0))
LANE = 128


# ----------------------------- wrapper-side helpers -----------------------------

def _round_up(n, m):
    return ((n + m - 1) // m) * m


def _fold_weight_taps(w, Cp):
    """(C_out, C_in, 3, 3) torch conv weight -> (9, Cp, Cp) per-tap (C_in->C_out) slabs."""
    w = jnp.asarray(w, jnp.float32)
    c_out, c_in = int(w.shape[0]), int(w.shape[1])
    taps = jnp.zeros((9, Cp, Cp), jnp.float32)
    k = 0
    for dy in range(3):
        for dx in range(3):
            taps = taps.at[k, :c_in, :c_out].set(jnp.transpose(w[:, :, dy, dx]))
            k += 1
    return taps


def _pad_row(v, Cp):
    v = jnp.asarray(v, jnp.float32)
    return jnp.pad(v, (0, Cp - v.shape[0])).reshape(1, Cp)


# ----------------------------------- kernel ---------------------------------------

def _make_kernel(H, W, C, Cp):
    Hd, Wd = H // 2, W // 2
    HW, HWd = H * W, Hd * Wd
    P1 = _round_up(W + 1, 8)      # front pad rows of conv1 slab (8-aligned body store)
    T1 = W + 1                    # back pad rows (covers the +W+1 tap)
    P2 = _round_up(Wd + 1, 8)     # same for the pooled (conv2) slab
    T2 = Wd + 1
    n_ext1 = P1 + HW + T1
    n_ext2 = P2 + HWd + T2
    inv_n = 1.0 / float(C * H * W)      # GroupNorm over the REAL C*H*W elements
    f32 = jnp.float32

    def conv3x3(read_tap, w_ref, b_ref, Wn, rows):
        """3x3 'same' conv as 9 accumulating per-tap MXU matmuls (no im2col)."""
        # dx=0 (left neighbor) / dx=2 (right neighbor) edge masks, built in-kernel.
        col = lax.broadcasted_iota(jnp.int32, (rows, 1), 0) % Wn
        m_l = (col >= 1).astype(f32)
        m_r = (col <= Wn - 2).astype(f32)
        acc = None
        k = 0
        for dy in range(3):
            for dx in range(3):
                piece = read_tap((dy - 1) * Wn + (dx - 1))        # (rows, Cp)
                if dx == 0:
                    piece = piece * m_l
                elif dx == 2:
                    piece = piece * m_r
                t = jnp.dot(piece, w_ref[k], preferred_element_type=f32)
                acc = t if acc is None else acc + t               # chained accumulation
                k += 1
        return acc + b_ref[...]

    def kernel(x_ref, w1_ref, b1_ref, g_ref, bt_ref, w2_ref, b2_ref,
               out_ref, xext_ref, hbuf_ref, ptmp_ref, hext_ref):

        def pool2x2(src_ref, base, Hn, Wn):
            """2x2 avg pool: height first (contiguous row-pair reads into ptmp),
            then width via two whole-slab stride-2 reads."""
            Hh, Wh = Hn // 2, Wn // 2
            for y in range(Hh):
                r0 = src_ref[pl.ds(base + (2 * y) * Wn, Wn), :]
                r1 = src_ref[pl.ds(base + (2 * y + 1) * Wn, Wn), :]
                ptmp_ref[pl.ds(y * Wn, Wn), :] = r0 + r1
            ev = ptmp_ref[pl.ds(0, Hh * Wh, stride=2), :]
            od = ptmp_ref[pl.ds(1, Hh * Wh, stride=2), :]
            return (ev + od) * 0.25

        # ---- stage x into a zero-padded (spatial + channel) VMEM slab -------------
        # Scratch is per-TensorCore and the parallel batch axis may be split across
        # cores, so the zero-fill runs every step (cheap) rather than on pid==0.
        xext_ref[...] = jnp.zeros((n_ext1, Cp), f32)
        xext_ref[pl.ds(P1, HW), pl.ds(0, C)] = x_ref[...]          # channel pad -> 0 lanes

        # ---- conv1: 9 per-tap matmuls over static slices of the padded slab -------
        h = conv3x3(lambda off: xext_ref[pl.ds(P1 + off, HW), :],
                    w1_ref, b1_ref, W, HW)                          # (HW, Cp)

        # ---- GroupNorm(1, C): two-pass stats over the real C lanes only -----------
        lane = lax.broadcasted_iota(jnp.int32, (1, Cp), 1)
        cmask = (lane < C).astype(f32)                              # (1, Cp)
        mean = jnp.sum(h * cmask, keepdims=True) * inv_n
        d = (h - mean) * cmask                                      # pad lanes -> exactly 0
        var = jnp.sum(d * d, keepdims=True) * inv_n                 # biased variance (torch)
        h = d * lax.rsqrt(var + EPS)
        h = h * g_ref[...] + bt_ref[...]                            # padded gamma/beta = 0

        # ---- SiLU ----
        h = h * jax.nn.sigmoid(h)

        # ---- 2x2 average pool of h; stage pooled h into zero-padded conv2 slab ----
        hbuf_ref[...] = h
        hd = pool2x2(hbuf_ref, 0, H, W)                             # (HWd, Cp)
        hext_ref[pl.ds(0, P2), :] = jnp.zeros((P2, Cp), f32)
        hext_ref[pl.ds(P2 + HWd, T2), :] = jnp.zeros((T2, Cp), f32)
        hext_ref[pl.ds(P2, HWd), :] = hd

        # ---- conv2 on the pooled grid ----
        h2 = conv3x3(lambda off: hext_ref[pl.ds(P2 + off, HWd), :],
                     w2_ref, b2_ref, Wd, HWd)                       # (HWd, Cp)

        # ---- residual pool of x + merge (lane-dense output block) ----
        xd = pool2x2(xext_ref, P1, H, W)                            # (HWd, Cp)
        out_ref[...] = (xd + h2) * INV_SQRT2

    return kernel, n_ext1, n_ext2


# ---------------------------------- wrapper ----------------------------------------

def resnet_block_pallas(x_nchw, w1, b1, gamma, beta, w2, b2):
    B, C, H, W = map(int, x_nchw.shape)
    assert H % 2 == 0 and W % 2 == 0
    Hd, Wd = H // 2, W // 2
    HW, HWd = H * W, Hd * Wd
    Cp = _round_up(max(C, LANE), LANE)

    # glue: NCHW -> compact (B, HW, C); padding happens inside the kernel so HBM
    # traffic stays at real-data size.
    x_flat = jnp.transpose(x_nchw, (0, 2, 3, 1)).reshape(B, HW, C).astype(jnp.float32)

    w1_t = _fold_weight_taps(w1, Cp)                                # (9, Cp, Cp)
    w2_t = _fold_weight_taps(w2, Cp)
    b1_p = _pad_row(b1, Cp)                                         # (1, Cp), pad = 0
    b2_p = _pad_row(b2, Cp)
    g_p = _pad_row(gamma, Cp)
    bt_p = _pad_row(beta, Cp)

    kernel, n_ext1, n_ext2 = _make_kernel(H, W, C, Cp)

    # VMEM budget from the actual footprint (double-buffered blocks + scratch) with
    # 2x headroom, clamped so it stays well inside every generation (v7x: 64 MiB).
    fp = 4
    est = (2 * (HW * C + 2 * 9 * Cp * Cp + 4 * Cp + HWd * Cp)
           + (n_ext1 + HW + Hd * W + n_ext2) * Cp) * fp
    vmem_limit = int(min(max(2 * est, 16 << 20), 48 << 20))

    out_pad = pl.pallas_call(
        kernel,
        out_shape=jax.ShapeDtypeStruct((B, HWd, Cp), jnp.float32),
        grid=(B,),
        in_specs=[
            pl.BlockSpec((None, HW, C), lambda b: (b, 0, 0)),       # compact activations
            pl.BlockSpec((9, Cp, Cp), lambda b: (0, 0, 0)),         # conv1 per-tap weights
            pl.BlockSpec((1, Cp), lambda b: (0, 0)),                # conv1 bias
            pl.BlockSpec((1, Cp), lambda b: (0, 0)),                # gamma
            pl.BlockSpec((1, Cp), lambda b: (0, 0)),                # beta
            pl.BlockSpec((9, Cp, Cp), lambda b: (0, 0, 0)),         # conv2 per-tap weights
            pl.BlockSpec((1, Cp), lambda b: (0, 0)),                # conv2 bias
        ],
        out_specs=pl.BlockSpec((None, HWd, Cp), lambda b: (b, 0, 0)),  # lane-dense output
        scratch_shapes=[
            pltpu.VMEM((n_ext1, Cp), jnp.float32),    # zero-padded x slab (conv1 + pooling)
            pltpu.VMEM((HW, Cp), jnp.float32),        # post-SiLU h, staged for pooling
            pltpu.VMEM((Hd * W, Cp), jnp.float32),    # pooling temp (height-pooled rows)
            pltpu.VMEM((n_ext2, Cp), jnp.float32),    # zero-padded pooled-h slab (conv2)
        ],
        compiler_params=pltpu.CompilerParams(
            dimension_semantics=("parallel",),
            vmem_limit_bytes=vmem_limit),
    )(x_flat, w1_t, b1_p, g_p, bt_p, w2_t, b2_p)

    # glue: drop channel padding, back to NCHW
    out = out_pad[:, :, :C].reshape(B, Hd, Wd, C)
    return jnp.transpose(out, (0, 3, 1, 2))


# --------------------------------- reference ---------------------------------------

def resnet_block_ref(x, w1, b1, gamma, beta, w2, b2):
    """Pure-JAX reference mirroring the PyTorch forward."""
    def conv(t, w, b):
        y = lax.conv_general_dilated(
            t, w, window_strides=(1, 1), padding=((1, 1), (1, 1)),
            dimension_numbers=('NCHW', 'OIHW', 'NCHW'))
        return y + b[None, :, None, None]

    def pool(t):
        B, C, H, W = t.shape
        return t.reshape(B, C, H // 2, 2, W // 2, 2).mean(axis=(3, 5))

    h = conv(x, w1, b1)
    mean = h.mean(axis=(1, 2, 3), keepdims=True)
    var = ((h - mean) ** 2).mean(axis=(1, 2, 3), keepdims=True)
    h = (h - mean) / jnp.sqrt(var + EPS)
    h = h * gamma[None, :, None, None] + beta[None, :, None, None]
    h = h * jax.nn.sigmoid(h)
    h = pool(h)
    xd = pool(x)
    h = conv(h, w2, b2)
    return (xd + h) * INV_SQRT2


if __name__ == "__main__":
    B, C, H, W = 2, 4, 16, 16
    # NOTE: module annotates kernel_size as a 3-tuple but uses nn.Conv2d with
    # padding=(1,1); the only consistent reading is a 3x3 spatial kernel.
    key = jax.random.PRNGKey(0)
    k = jax.random.split(key, 7)
    x = jax.random.normal(k[0], (B, C, H, W), jnp.float32)
    w1 = jax.random.normal(k[1], (C, C, 3, 3), jnp.float32) * 0.2
    b1 = jax.random.normal(k[2], (C,), jnp.float32) * 0.1
    gamma = 1.0 + 0.1 * jax.random.normal(k[3], (C,), jnp.float32)
    beta = 0.1 * jax.random.normal(k[4], (C,), jnp.float32)
    w2 = jax.random.normal(k[5], (C, C, 3, 3), jnp.float32) * 0.2
    b2 = jax.random.normal(k[6], (C,), jnp.float32) * 0.1

    out = resnet_block_pallas(x, w1, b1, gamma, beta, w2, b2)
    out = jax.block_until_ready(out)

    ref = resnet_block_ref(x, w1, b1, gamma, beta, w2, b2)
    err = float(jnp.max(jnp.abs(out - ref)))
    assert out.shape == (B, C, H // 2, W // 2), out.shape
    assert err < 1e-3, f"max abs error {err}"
    print("KERNEL_OK")
</pallas_src>

<mosaic_0001>
module attributes {stable_mosaic.version = 11 : i64} {
  func.func @kernel(%arg0: i32, %arg1: memref<1x256x4xf32, #tpu.memory_space<vmem>>, %arg2: memref<9x128x128xf32, #tpu.memory_space<vmem>>, %arg3: memref<1x128xf32, #tpu.memory_space<vmem>>, %arg4: memref<1x128xf32, #tpu.memory_space<vmem>>, %arg5: memref<1x128xf32, #tpu.memory_space<vmem>>, %arg6: memref<9x128x128xf32, #tpu.memory_space<vmem>>, %arg7: memref<1x128xf32, #tpu.memory_space<vmem>>, %arg8: memref<1x64x128xf32, #tpu.memory_space<vmem>>, %arg9: memref<297x128xf32, #tpu.memory_space<vmem>>, %arg10: memref<256x128xf32, #tpu.memory_space<vmem>>, %arg11: memref<128x128xf32, #tpu.memory_space<vmem>>, %arg12: memref<89x128xf32, #tpu.memory_space<vmem>>) attributes {dimension_semantics = [#tpu.dimension_semantics<parallel>], iteration_bounds = array<i64: 2>, scalar_prefetch = 0 : i64, scratch_operands = 4 : i64, tpu.core_type = #tpu.core_type<tc>, window_params = [{transform_indices = @transform_0, window_bounds = array<i64: 1, 256, 4>}, {pipeline_mode = #tpu.pipeline_mode<synchronous>, transform_indices = @transform_1, window_bounds = array<i64: 9, 128, 128>}, {pipeline_mode = #tpu.pipeline_mode<synchronous>, transform_indices = @transform_2, window_bounds = array<i64: 1, 128>}, {pipeline_mode = #tpu.pipeline_mode<synchronous>, transform_indices = @transform_3, window_bounds = array<i64: 1, 128>}, {pipeline_mode = #tpu.pipeline_mode<synchronous>, transform_indices = @transform_4, window_bounds = array<i64: 1, 128>}, {pipeline_mode = #tpu.pipeline_mode<synchronous>, transform_indices = @transform_5, window_bounds = array<i64: 9, 128, 128>}, {pipeline_mode = #tpu.pipeline_mode<synchronous>, transform_indices = @transform_6, window_bounds = array<i64: 1, 128>}, {transform_indices = @transform_7, window_bounds = array<i64: 1, 64, 128>}]} {
    %cst = arith.constant 0.000000e+00 : f32
    %0 = vector.broadcast %cst : f32 to vector<297x128xf32>
    %c0 = arith.constant 0 : index
    %c0_0 = arith.constant 0 : index
    %1 = vector.load %arg9[%c0, %c0_0] : memref<297x128xf32, #tpu.memory_space<vmem>>, vector<297x128xf32>
    tpu.vector_store %arg9[%c0, %c0_0], %0 {strides = array<i32>} : memref<297x128xf32, #tpu.memory_space<vmem>>, vector<297x128xf32>,
    %c0_1 = arith.constant 0 : index
    %c0_2 = arith.constant 0 : index
    %c0_3 = arith.constant 0 : index
    %2 = vector.load %arg1[%c0_1, %c0_2, %c0_3] : memref<1x256x4xf32, #tpu.memory_space<vmem>>, vector<1x256x4xf32>
    %3 = vector.shape_cast %2 : vector<1x256x4xf32> to vector<256x4xf32>
    %c24 = arith.constant 24 : index
    %c0_4 = arith.constant 0 : index
    %4 = vector.load %arg9[%c24, %c0_4] : memref<297x128xf32, #tpu.memory_space<vmem>>, vector<256x4xf32>
    tpu.vector_store %arg9[%c24, %c0_4], %3 {strides = array<i32>} : memref<297x128xf32, #tpu.memory_space<vmem>>, vector<256x4xf32>,
    %5 = tpu.iota {dimensions = array<i32: 0>} : vector<256x1xi32>
    %c16_i32 = arith.constant 16 : i32
    %c0_i32 = arith.constant 0 : i32
    %6 = arith.cmpi eq, %c16_i32, %c0_i32 : i32
    %c1_i32 = arith.constant 1 : i32
    %7 = arith.select %6, %c1_i32, %c16_i32 : i32
    %8 = vector.broadcast %7 : i32 to vector<256x1xi32>
    %9 = arith.remsi %5, %8 : vector<256x1xi32>
    %c0_i32_5 = arith.constant 0 : i32
    %10 = vector.broadcast %c0_i32_5 : i32 to vector<256x1xi32>
    %11 = arith.cmpi ne, %9, %10 : vector<256x1xi32>
    %c0_i32_6 = arith.constant 0 : i32
    %12 = vector.broadcast %c0_i32_6 : i32 to vector<256x1xi32>
    %13 = arith.cmpi slt, %9, %12 : vector<256x1xi32>
    %c0_i32_7 = arith.constant 0 : i32
    %14 = arith.cmpi slt, %7, %c0_i32_7 : i32
    %15 = vector.broadcast %14 : i1 to vector<256x1xi1>
    %16 = vector.broadcast %15 : vector<256x1xi1> to vector<256x1xi1>
    %17 = arith.xori %13, %16 : vector<256x1xi1>
    %18 = arith.andi %17, %11 : vector<256x1xi1>
    %19 = vector.broadcast %7 : i32 to vector<256x1xi32>
    %20 = arith.addi %9, %19 : vector<256x1xi32>
    %21 = arith.select %18, %20, %9 : vector<256x1xi1>, vector<256x1xi32>
    %c1_i32_8 = arith.constant 1 : i32
    %22 = vector.broadcast %c1_i32_8 : i32 to vector<256x1xi32>
    %23 = arith.cmpi sge, %21, %22 : vector<256x1xi32>
    %24 = arith.extui %23 : vector<256x1xi1> to vector<256x1xi32>
    %25 = arith.sitofp %24 : vector<256x1xi32> to vector<256x1xf32>
    %c14_i32 = arith.constant 14 : i32
    %26 = vector.broadcast %c14_i32 : i32 to vector<256x1xi32>
    %27 = arith.cmpi sle, %21, %26 : vector<256x1xi32>
    %28 = arith.extui %27 : vector<256x1xi1> to vector<256x1xi32>
    %29 = arith.sitofp %28 : vector<256x1xi32> to vector<256x1xf32>
    %c7 = arith.constant 7 : index
    %c0_9 = arith.constant 0 : index
    %30 = vector.load %arg9[%c7, %c0_9] : memref<297x128xf32, #tpu.memory_space<vmem>>, vector<256x128xf32>
    %31 = vector.broadcast %25 : vector<256x1xf32> to vector<256x128xf32>
    %32 = arith.mulf %30, %31 : vector<256x128xf32>
    %c0_10 = arith.constant 0 : index
    %c0_11 = arith.constant 0 : index
    %c0_12 = arith.constant 0 : index
    %33 = vector.load %arg2[%c0_10, %c0_11, %c0_12] : memref<9x128x128xf32, #tpu.memory_space<vmem>>, vector<1x128x128xf32>
    %34 = vector.shape_cast %33 : vector<1x128x128xf32> to vector<128x128xf32>
    %cst_13 = arith.constant dense<0.000000e+00> : vector<256x128xf32>
    %35 = tpu.matmul %32, %34, %cst_13 {dimension_numbers = #tpu.dot_dimension_numbers<[1], [0], [0], [1], [0, 0, 1, 1], [], []>} : vector<256x128xf32>, vector<128x128xf32>, vector<256x128xf32> -> vector<256x128xf32>
    %c8 = arith.constant 8 : index
    %c0_14 = arith.constant 0 : index
    %36 = vector.load %arg9[%c8, %c0_14] : memref<297x128xf32, #tpu.memory_space<vmem>>, vector<256x128xf32>
    %c1 = arith.constant 1 : index
    %c0_15 = arith.constant 0 : index
    %c0_16 = arith.constant 0 : index
    %37 = vector.load %arg2[%c1, %c0_15, %c0_16] : memref<9x128x128xf32, #tpu.memory_space<vmem>>, vector<1x128x128xf32>
    %38 = vector.shape_cast %37 : vector<1x128x128xf32> to vector<128x128xf32>
    %cst_17 = arith.constant dense<0.000000e+00> : vector<256x128xf32>
    %39 = tpu.matmul %36, %38, %cst_17 {dimension_numbers = #tpu.dot_dimension_numbers<[1], [0], [0], [1], [0, 0, 1, 1], [], []>} : vector<256x128xf32>, vector<128x128xf32>, vector<256x128xf32> -> vector<256x128xf32>
    %40 = arith.addf %35, %39 : vector<256x128xf32>
    %c9 = arith.constant 9 : index
    %c0_18 = arith.constant 0 : index
    %41 = vector.load %arg9[%c9, %c0_18] : memref<297x128xf32, #tpu.memory_space<vmem>>, vector<256x128xf32>
    %42 = vector.broadcast %29 : vector<256x1xf32> to vector<256x128xf32>
    %43 = arith.mulf %41, %42 : vector<256x128xf32>
    %c2 = arith.constant 2 : index
    %c0_19 = arith.constant 0 : index
    %c0_20 = arith.constant 0 : index
    %44 = vector.load %arg2[%c2, %c0_19, %c0_20] : memref<9x128x128xf32, #tpu.memory_space<vmem>>, vector<1x128x128xf32>
    %45 = vector.shape_cast %44 : vector<1x128x128xf32> to vector<128x128xf32>
    %cst_21 = arith.constant dense<0.000000e+00> : vector<256x128xf32>
    %46 = tpu.matmul %43, %45, %cst_21 {dimension_numbers = #tpu.dot_dimension_numbers<[1], [0], [0], [1], [0, 0, 1, 1], [], []>} : vector<256x128xf32>, vector<128x128xf32>, vector<256x128xf32> -> vector<256x128xf32>
    %47 = arith.addf %40, %46 : vector<256x128xf32>
    %c23 = arith.constant 23 : index
    %c0_22 = arith.constant 0 : index
    %48 = vector.load %arg9[%c23, %c0_22] : memref<297x128xf32, #tpu.memory_space<vmem>>, vector<256x128xf32>
    %49 = vector.broadcast %25 : vector<256x1xf32> to vector<256x128xf32>
    %50 = arith.mulf %48, %49 : vector<256x128xf32>
    %c3 = arith.constant 3 : index
    %c0_23 = arith.constant 0 : index
    %c0_24 = arith.constant 0 : index
    %51 = vector.load %arg2[%c3, %c0_23, %c0_24] : memref<9x128x128xf32, #tpu.memory_space<vmem>>, vector<1x128x128xf32>
    %52 = vector.shape_cast %51 : vector<1x128x128xf32> to vector<128x128xf32>
    %cst_25 = arith.constant dense<0.000000e+00> : vector<256x128xf32>
    %53 = tpu.matmul %50, %52, %cst_25 {dimension_numbers = #tpu.dot_dimension_numbers<[1], [0], [0], [1], [0, 0, 1, 1], [], []>} : vector<256x128xf32>, vector<128x128xf32>, vector<256x128xf32> -> vector<256x128xf32>
    %54 = arith.addf %47, %53 : vector<256x128xf32>
    %c24_26 = arith.constant 24 : index
    %c0_27 = arith.constant 0 : index
    %55 = vector.load %arg9[%c24_26, %c0_27] : memref<297x128xf32, #tpu.memory_space<vmem>>, vector<256x128xf32>
    %c4 = arith.constant 4 : index
    %c0_28 = arith.constant 0 : index
    %c0_29 = arith.constant 0 : index
    %56 = vector.load %arg2[%c4, %c0_28, %c0_29] : memref<9x128x128xf32, #tpu.memory_space<vmem>>, vector<1x128x128xf32>
    %57 = vector.shape_cast %56 : vector<1x128x128xf32> to vector<128x128xf32>
    %cst_30 = arith.constant dense<0.000000e+00> : vector<256x128xf32>
    %58 = tpu.matmul %55, %57, %cst_30 {dimension_numbers = #tpu.dot_dimension_numbers<[1], [0], [0], [1], [0, 0, 1, 1], [], []>} : vector<256x128xf32>, vector<128x128xf32>, vector<256x128xf32> -> vector<256x128xf32>
    %59 = arith.addf %54, %58 : vector<256x128xf32>
    %c25 = arith.constant 25 : index
    %c0_31 = arith.constant 0 : index
    %60 = vector.load %arg9[%c25, %c0_31] : memref<297x128xf32, #tpu.memory_space<vmem>>, vector<256x128xf32>
    %61 = vector.broadcast %29 : vector<256x1xf32> to vector<256x128xf32>
    %62 = arith.mulf %60, %61 : vector<256x128xf32>
    %c5 = arith.constant 5 : index
    %c0_32 = arith.constant 0 : index
    %c0_33 = arith.constant 0 : index
    %63 = vector.load %arg2[%c5, %c0_32, %c0_33] : memref<9x128x128xf32, #tpu.memory_space<vmem>>, vector<1x128x128xf32>
    %64 = vector.shape_cast %63 : vector<1x128x128xf32> to vector<128x128xf32>
    %cst_34 = arith.constant dense<0.000000e+00> : vector<256x128xf32>
    %65 = tpu.matmul %62, %64, %cst_34 {dimension_numbers = #tpu.dot_dimension_numbers<[1], [0], [0], [1], [0, 0, 1, 1], [], []>} : vector<256x128xf32>, vector<128x128xf32>, vector<256x128xf32> -> vector<256x128xf32>
    %66 = arith.addf %59, %65 : vector<256x128xf32>
    %c39 = arith.constant 39 : index
    %c0_35 = arith.constant 0 : index
    %67 = vector.load %arg9[%c39, %c0_35] : memref<297x128xf32, #tpu.memory_space<vmem>>, vector<256x128xf32>
    %68 = vector.broadcast %25 : vector<256x1xf32> to vector<256x128xf32>
    %69 = arith.mulf %67, %68 : vector<256x128xf32>
    %c6 = arith.constant 6 : index
    %c0_36 = arith.constant 0 : index
    %c0_37 = arith.constant 0 : index
    %70 = vector.load %arg2[%c6, %c0_36, %c0_37] : memref<9x128x128xf32, #tpu.memory_space<vmem>>, vector<1x128x128xf32>
    %71 = vector.shape_cast %70 : vector<1x128x128xf32> to vector<128x128xf32>
    %cst_38 = arith.constant dense<0.000000e+00> : vector<256x128xf32>
    %72 = tpu.matmul %69, %71, %cst_38 {dimension_numbers = #tpu.dot_dimension_numbers<[1], [0], [0], [1], [0, 0, 1, 1], [], []>} : vector<256x128xf32>, vector<128x128xf32>, vector<256x128xf32> -> vector<256x128xf32>
    %73 = arith.addf %66, %72 : vector<256x128xf32>
    %c40 = arith.constant 40 : index
    %c0_39 = arith.constant 0 : index
    %74 = vector.load %arg9[%c40, %c0_39] : memref<297x128xf32, #tpu.memory_space<vmem>>, vector<256x128xf32>
    %c7_40 = arith.constant 7 : index
    %c0_41 = arith.constant 0 : index
    %c0_42 = arith.constant 0 : index
    %75 = vector.load %arg2[%c7_40, %c0_41, %c0_42] : memref<9x128x128xf32, #tpu.memory_space<vmem>>, vector<1x128x128xf32>
    %76 = vector.shape_cast %75 : vector<1x128x128xf32> to vector<128x128xf32>
    %cst_43 = arith.constant dense<0.000000e+00> : vector<256x128xf32>
    %77 = tpu.matmul %74, %76, %cst_43 {dimension_numbers = #tpu.dot_dimension_numbers<[1], [0], [0], [1], [0, 0, 1, 1], [], []>} : vector<256x128xf32>, vector<128x128xf32>, vector<256x128xf32> -> vector<256x128xf32>
    %78 = arith.addf %73, %77 : vector<256x128xf32>
    %c41 = arith.constant 41 : index
    %c0_44 = arith.constant 0 : index
    %79 = vector.load %arg9[%c41, %c0_44] : memref<297x128xf32, #tpu.memory_space<vmem>>, vector<256x128xf32>
    %80 = vector.broadcast %29 : vector<256x1xf32> to vector<256x128xf32>
    %81 = arith.mulf %79, %80 : vector<256x128xf32>
    %c8_45 = arith.constant 8 : index
    %c0_46 = arith.constant 0 : index
    %c0_47 = arith.constant 0 : index
    %82 = vector.load %arg2[%c8_45, %c0_46, %c0_47] : memref<9x128x128xf32, #tpu.memory_space<vmem>>, vector<1x128x128xf32>
    %83 = vector.shape_cast %82 : vector<1x128x128xf32> to vector<128x128xf32>
    %cst_48 = arith.constant dense<0.000000e+00> : vector<256x128xf32>
    %84 = tpu.matmul %81, %83, %cst_48 {dimension_numbers = #tpu.dot_dimension_numbers<[1], [0], [0], [1], [0, 0, 1, 1], [], []>} : vector<256x128xf32>, vector<128x128xf32>, vector<256x128xf32> -> vector<256x128xf32>
    %85 = arith.addf %78, %84 : vector<256x128xf32>
    %c0_49 = arith.constant 0 : index
    %c0_50 = arith.constant 0 : index
    %86 = vector.load %arg3[%c0_49, %c0_50] : memref<1x128xf32, #tpu.memory_space<vmem>>, vector<1x128xf32>
    %87 = vector.broadcast %86 : vector<1x128xf32> to vector<256x128xf32>
    %88 = arith.addf %85, %87 : vector<256x128xf32>
    %89 = tpu.iota {dimensions = array<i32: 1>} : vector<1x128xi32>
    %c4_i32 = arith.constant 4 : i32
    %90 = vector.broadcast %c4_i32 : i32 to vector<1x128xi32>
    %91 = arith.cmpi slt, %89, %90 : vector<1x128xi32>
    %92 = arith.extui %91 : vector<1x128xi1> to vector<1x128xi32>
    %93 = arith.sitofp %92 : vector<1x128xi32> to vector<1x128xf32>
    %94 = vector.broadcast %93 : vector<1x128xf32> to vector<256x128xf32>
    %95 = arith.mulf %88, %94 : vector<256x128xf32>
    %96 = vector.shape_cast %95 : vector<256x128xf32> to vector<1x256x128xf32>
    %cst_51 = arith.constant dense<0.000000e+00> : vector<1xf32>
    %97 = vector.multi_reduction <add>, %96, %cst_51 [1, 2] : vector<1x256x128xf32> to vector<1xf32>
    %98 = vector.shape_cast %97 : vector<1xf32> to vector<1x1x1xf32>
    %99 = vector.extract %98[0, 0, 0] : f32 from vector<1x1x1xf32>
    %100 = vector.broadcast %99 : f32 to vector<1x1xf32>
    %cst_52 = arith.constant 9.765625E-4 : f32
    %101 = vector.broadcast %cst_52 : f32 to vector<1x1xf32>
    %102 = arith.mulf %100, %101 : vector<1x1xf32>
    %103 = vector.broadcast %102 : vector<1x1xf32> to vector<256x128xf32>
    %104 = arith.subf %88, %103 : vector<256x128xf32>
    %105 = vector.broadcast %93 : vector<1x128xf32> to vector<256x128xf32>
    %106 = arith.mulf %104, %105 : vector<256x128xf32>
    %107 = arith.mulf %106, %106 : vector<256x128xf32>
    %108 = vector.shape_cast %107 : vector<256x128xf32> to vector<1x256x128xf32>
    %cst_53 = arith.constant dense<0.000000e+00> : vector<1xf32>
    %109 = vector.multi_reduction <add>, %108, %cst_53 [1, 2] : vector<1x256x128xf32> to vector<1xf32>
    %110 = vector.shape_cast %109 : vector<1xf32> to vector<1x1x1xf32>
    %111 = vector.extract %110[0, 0, 0] : f32 from vector<1x1x1xf32>
    %112 = vector.broadcast %111 : f32 to vector<1x1xf32>
    %cst_54 = arith.constant 9.765625E-4 : f32
    %113 = vector.broadcast %cst_54 : f32 to vector<1x1xf32>
    %114 = arith.mulf %112, %113 : vector<1x1xf32>
    %cst_55 = arith.constant 9.99999974E-6 : f32
    %115 = vector.broadcast %cst_55 : f32 to vector<1x1xf32>
    %116 = arith.addf %114, %115 : vector<1x1xf32>
    %117 = math.rsqrt %116 : vector<1x1xf32>
    %118 = vector.broadcast %117 : vector<1x1xf32> to vector<256x128xf32>
    %119 = arith.mulf %106, %118 : vector<256x128xf32>
    %c0_56 = arith.constant 0 : index
    %c0_57 = arith.constant 0 : index
    %120 = vector.load %arg4[%c0_56, %c0_57] : memref<1x128xf32, #tpu.memory_space<vmem>>, vector<1x128xf32>
    %121 = vector.broadcast %120 : vector<1x128xf32> to vector<256x128xf32>
    %122 = arith.mulf %119, %121 : vector<256x128xf32>
    %c0_58 = arith.constant 0 : index
    %c0_59 = arith.constant 0 : index
    %123 = vector.load %arg5[%c0_58, %c0_59] : memref<1x128xf32, #tpu.memory_space<vmem>>, vector<1x128xf32>
    %124 = vector.broadcast %123 : vector<1x128xf32> to vector<256x128xf32>
    %125 = arith.addf %122, %124 : vector<256x128xf32>
    %126 = arith.negf %125 : vector<256x128xf32>
    %127 = math.exp %126 : vector<256x128xf32>
    %cst_60 = arith.constant 1.000000e+00 : f32
    %128 = vector.broadcast %cst_60 : f32 to vector<256x128xf32>
    %129 = arith.addf %128, %127 : vector<256x128xf32>
    %130 = arith.divf %128, %129 : vector<256x128xf32>
    %131 = arith.mulf %125, %130 : vector<256x128xf32>
    %c0_61 = arith.constant 0 : index
    %c0_62 = arith.constant 0 : index
    %132 = vector.load %arg10[%c0_61, %c0_62] : memref<256x128xf32, #tpu.memory_space<vmem>>, vector<256x128xf32>
    tpu.vector_store %arg10[%c0_61, %c0_62], %131 {strides = array<i32>} : memref<256x128xf32, #tpu.memory_space<vmem>>, vector<256x128xf32>,
    %c0_63 = arith.constant 0 : index
    %c0_64 = arith.constant 0 : index
    %133 = vector.load %arg10[%c0_63, %c0_64] : memref<256x128xf32, #tpu.memory_space<vmem>>, vector<16x128xf32>
    %c16 = arith.constant 16 : index
    %c0_65 = arith.constant 0 : index
    %134 = vector.load %arg10[%c16, %c0_65] : memref<256x128xf32, #tpu.memory_space<vmem>>, vector<16x128xf32>
    %135 = arith.addf %133, %134 : vector<16x128xf32>
    %c0_66 = arith.constant 0 : index
    %c0_67 = arith.constant 0 : index
    %136 = vector.load %arg11[%c0_66, %c0_67] : memref<128x128xf32, #tpu.memory_space<vmem>>, vector<16x128xf32>
    tpu.vector_store %arg11[%c0_66, %c0_67], %135 {strides = array<i32>} : memref<128x128xf32, #tpu.memory_space<vmem>>, vector<16x128xf32>,
    %c32 = arith.constant 32 : index
    %c0_68 = arith.constant 0 : index
    %137 = vector.load %arg10[%c32, %c0_68] : memref<256x128xf32, #tpu.memory_space<vmem>>, vector<16x128xf32>
    %c48 = arith.constant 48 : index
    %c0_69 = arith.constant 0 : index
    %138 = vector.load %arg10[%c48, %c0_69] : memref<256x128xf32, #tpu.memory_space<vmem>>, vector<16x128xf32>
    %139 = arith.addf %137, %138 : vector<16x128xf32>
    %c16_70 = arith.constant 16 : index
    %c0_71 = arith.constant 0 : index
    %140 = vector.load %arg11[%c16_70, %c0_71] : memref<128x128xf32, #tpu.memory_space<vmem>>, vector<16x128xf32>
    tpu.vector_store %arg11[%c16_70, %c0_71], %139 {strides = array<i32>} : memref<128x128xf32, #tpu.memory_space<vmem>>, vector<16x128xf32>,
    %c64 = arith.constant 64 : index
    %c0_72 = arith.constant 0 : index
    %141 = vector.load %arg10[%c64, %c0_72] : memref<256x128xf32, #tpu.memory_space<vmem>>, vector<16x128xf32>
    %c80 = arith.constant 80 : index
    %c0_73 = arith.constant 0 : index
    %142 = vector.load %arg10[%c80, %c0_73] : memref<256x128xf32, #tpu.memory_space<vmem>>, vector<16x128xf32>
    %143 = arith.addf %141, %142 : vector<16x128xf32>
    %c32_74 = arith.constant 32 : index
    %c0_75 = arith.constant 0 : index
    %144 = vector.load %arg11[%c32_74, %c0_75] : memref<128x128xf32, #tpu.memory_space<vmem>>, vector<16x128xf32>
    tpu.vector_store %arg11[%c32_74, %c0_75], %143 {strides = array<i32>} : memref<128x128xf32, #tpu.memory_space<vmem>>, vector<16x128xf32>,
    %c96 = arith.constant 96 : index
    %c0_76 = arith.constant 0 : index
    %145 = vector.load %arg10[%c96, %c0_76] : memref<256x128xf32, #tpu.memory_space<vmem>>, vector<16x128xf32>
    %c112 = arith.constant 112 : index
    %c0_77 = arith.constant 0 : index
    %146 = vector.load %arg10[%c112, %c0_77] : memref<256x128xf32, #tpu.memory_space<vmem>>, vector<16x128xf32>
    %147 = arith.addf %145, %146 : vector<16x128xf32>
    %c48_78 = arith.constant 48 : index
    %c0_79 = arith.constant 0 : index
    %148 = vector.load %arg11[%c48_78, %c0_79] : memref<128x128xf32, #tpu.memory_space<vmem>>, vector<16x128xf32>
    tpu.vector_store %arg11[%c48_78, %c0_79], %147 {strides = array<i32>} : memref<128x128xf32, #tpu.memory_space<vmem>>, vector<16x128xf32>,
    %c128 = arith.constant 128 : index
    %c0_80 = arith.constant 0 : index
    %149 = vector.load %arg10[%c128, %c0_80] : memref<256x128xf32, #tpu.memory_space<vmem>>, vector<16x128xf32>
    %c144 = arith.constant 144 : index
    %c0_81 = arith.constant 0 : index
    %150 = vector.load %arg10[%c144, %c0_81] : memref<256x128xf32, #tpu.memory_space<vmem>>, vector<16x128xf32>
    %151 = arith.addf %149, %150 : vector<16x128xf32>
    %c64_82 = arith.constant 64 : index
    %c0_83 = arith.constant 0 : index
    %152 = vector.load %arg11[%c64_82, %c0_83] : memref<128x128xf32, #tpu.memory_space<vmem>>, vector<16x128xf32>
    tpu.vector_store %arg11[%c64_82, %c0_83], %151 {strides = array<i32>} : memref<128x128xf32, #tpu.memory_space<vmem>>, vector<16x128xf32>,
    %c160 = arith.constant 160 : index
    %c0_84 = arith.constant 0 : index
    %153 = vector.load %arg10[%c160, %c0_84] : memref<256x128xf32, #tpu.memory_space<vmem>>, vector<16x128xf32>
    %c176 = arith.constant 176 : index
    %c0_85 = arith.constant 0 : index
    %154 = vector.load %arg10[%c176, %c0_85] : memref<256x128xf32, #tpu.memory_space<vmem>>, vector<16x128xf32>
    %155 = arith.addf %153, %154 : vector<16x128xf32>
    %c80_86 = arith.constant 80 : index
    %c0_87 = arith.constant 0 : index
    %156 = vector.load %arg11[%c80_86, %c0_87] : memref<128x128xf32, #tpu.memory_space<vmem>>, vector<16x128xf32>
    tpu.vector_store %arg11[%c80_86, %c0_87], %155 {strides = array<i32>} : memref<128x128xf32, #tpu.memory_space<vmem>>, vector<16x128xf32>,
    %c192 = arith.constant 192 : index
    %c0_88 = arith.constant 0 : index
    %157 = vector.load %arg10[%c192, %c0_88] : memref<256x128xf32, #tpu.memory_space<vmem>>, vector<16x128xf32>
    %c208 = arith.constant 208 : index
    %c0_89 = arith.constant 0 : index
    %158 = vector.load %arg10[%c208, %c0_89] : memref<256x128xf32, #tpu.memory_space<vmem>>, vector<16x128xf32>
    %159 = arith.addf %157, %158 : vector<16x128xf32>
    %c96_90 = arith.constant 96 : index
    %c0_91 = arith.constant 0 : index
    %160 = vector.load %arg11[%c96_90, %c0_91] : memref<128x128xf32, #tpu.memory_space<vmem>>, vector<16x128xf32>
    tpu.vector_store %arg11[%c96_90, %c0_91], %159 {strides = array<i32>} : memref<128x128xf32, #tpu.memory_space<vmem>>, vector<16x128xf32>,
    %c224 = arith.constant 224 : index
    %c0_92 = arith.constant 0 : index
    %161 = vector.load %arg10[%c224, %c0_92] : memref<256x128xf32, #tpu.memory_space<vmem>>, vector<16x128xf32>
    %c240 = arith.constant 240 : index
    %c0_93 = arith.constant 0 : index
    %162 = vector.load %arg10[%c240, %c0_93] : memref<256x128xf32, #tpu.memory_space<vmem>>, vector<16x128xf32>
    %163 = arith.addf %161, %162 : vector<16x128xf32>
    %c112_94 = arith.constant 112 : index
    %c0_95 = arith.constant 0 : index
    %164 = vector.load %arg11[%c112_94, %c0_95] : memref<128x128xf32, #tpu.memory_space<vmem>>, vector<16x128xf32>
    tpu.vector_store %arg11[%c112_94, %c0_95], %163 {strides = array<i32>} : memref<128x128xf32, #tpu.memory_space<vmem>>, vector<16x128xf32>,
    %c0_96 = arith.constant 0 : index
    %c0_97 = arith.constant 0 : index
    %165 = tpu.strided_load %arg11[%c0_96, %c0_97] {strides = array<i32: 2, 1>} : memref<128x128xf32, #tpu.memory_space<vmem>>, vector<64x128xf32>
    %c1_98 = arith.constant 1 : index
    %c0_99 = arith.constant 0 : index
    %166 = tpu.strided_load %arg11[%c1_98, %c0_99] {strides = array<i32: 2, 1>} : memref<128x128xf32, #tpu.memory_space<vmem>>, vector<64x128xf32>
    %167 = arith.addf %165, %166 : vector<64x128xf32>
    %cst_100 = arith.constant 2.500000e-01 : f32
    %168 = vector.broadcast %cst_100 : f32 to vector<64x128xf32>
    %169 = arith.mulf %167, %168 : vector<64x128xf32>
    %cst_101 = arith.constant 0.000000e+00 : f32
    %170 = vector.broadcast %cst_101 : f32 to vector<16x128xf32>
    %c0_102 = arith.constant 0 : index
    %c0_103 = arith.constant 0 : index
    %171 = vector.load %arg12[%c0_102, %c0_103] : memref<89x128xf32, #tpu.memory_space<vmem>>, vector<16x128xf32>
    tpu.vector_store %arg12[%c0_102, %c0_103], %170 {strides = array<i32>} : memref<89x128xf32, #tpu.memory_space<vmem>>, vector<16x128xf32>,
    %cst_104 = arith.constant 0.000000e+00 : f32
    %172 = vector.broadcast %cst_104 : f32 to vector<9x128xf32>
    %c80_105 = arith.constant 80 : index
    %c0_106 = arith.constant 0 : index
    %173 = vector.load %arg12[%c80_105, %c0_106] : memref<89x128xf32, #tpu.memory_space<vmem>>, vector<9x128xf32>
    tpu.vector_store %arg12[%c80_105, %c0_106], %172 {strides = array<i32>} : memref<89x128xf32, #tpu.memory_space<vmem>>, vector<9x128xf32>,
    %c16_107 = arith.constant 16 : index
    %c0_108 = arith.constant 0 : index
    %174 = vector.load %arg12[%c16_107, %c0_108] : memref<89x128xf32, #tpu.memory_space<vmem>>, vector<64x128xf32>
    tpu.vector_store %arg12[%c16_107, %c0_108], %169 {strides = array<i32>} : memref<89x128xf32, #tpu.memory_space<vmem>>, vector<64x128xf32>,
    %175 = tpu.iota {dimensions = array<i32: 0>} : vector<64x1xi32>
    %c8_i32 = arith.constant 8 : i32
    %c0_i32_109 = arith.constant 0 : i32
    %176 = arith.cmpi eq, %c8_i32, %c0_i32_109 : i32
    %c1_i32_110 = arith.constant 1 : i32
    %177 = arith.select %176, %c1_i32_110, %c8_i32 : i32
    %178 = vector.broadcast %177 : i32 to vector<64x1xi32>
    %179 = arith.remsi %175, %178 : vector<64x1xi32>
    %c0_i32_111 = arith.constant 0 : i32
    %180 = vector.broadcast %c0_i32_111 : i32 to vector<64x1xi32>
    %181 = arith.cmpi ne, %179, %180 : vector<64x1xi32>
    %c0_i32_112 = arith.constant 0 : i32
    %182 = vector.broadcast %c0_i32_112 : i32 to vector<64x1xi32>
    %183 = arith.cmpi slt, %179, %182 : vector<64x1xi32>
    %c0_i32_113 = arith.constant 0 : i32
    %184 = arith.cmpi slt, %177, %c0_i32_113 : i32
    %185 = vector.broadcast %184 : i1 to vector<64x1xi1>
    %186 = vector.broadcast %185 : vector<64x1xi1> to vector<64x1xi1>
    %187 = arith.xori %183, %186 : vector<64x1xi1>
    %188 = arith.andi %187, %181 : vector<64x1xi1>
    %189 = vector.broadcast %177 : i32 to vector<64x1xi32>
    %190 = arith.addi %179, %189 : vector<64x1xi32>
    %191 = arith.select %188, %190, %179 : vector<64x1xi1>, vector<64x1xi32>
    %c1_i32_114 = arith.constant 1 : i32
    %192 = vector.broadcast %c1_i32_114 : i32 to vector<64x1xi32>
    %193 = arith.cmpi sge, %191, %192 : vector<64x1xi32>
    %194 = arith.extui %193 : vector<64x1xi1> to vector<64x1xi32>
    %195 = arith.sitofp %194 : vector<64x1xi32> to vector<64x1xf32>
    %c6_i32 = arith.constant 6 : i32
    %196 = vector.broadcast %c6_i32 : i32 to vector<64x1xi32>
    %197 = arith.cmpi sle, %191, %196 : vector<64x1xi32>
    %198 = arith.extui %197 : vector<64x1xi1> to vector<64x1xi32>
    %199 = arith.sitofp %198 : vector<64x1xi32> to vector<64x1xf32>
    %c7_115 = arith.constant 7 : index
    %c0_116 = arith.constant 0 : index
    %200 = vector.load %arg12[%c7_115, %c0_116] : memref<89x128xf32, #tpu.memory_space<vmem>>, vector<64x128xf32>
    %201 = vector.broadcast %195 : vector<64x1xf32> to vector<64x128xf32>
    %202 = arith.mulf %200, %201 : vector<64x128xf32>
    %c0_117 = arith.constant 0 : index
    %c0_118 = arith.constant 0 : index
    %c0_119 = arith.constant 0 : index
    %203 = vector.load %arg6[%c0_117, %c0_118, %c0_119] : memref<9x128x128xf32, #tpu.memory_space<vmem>>, vector<1x128x128xf32>
    %204 = vector.shape_cast %203 : vector<1x128x128xf32> to vector<128x128xf32>
    %cst_120 = arith.constant dense<0.000000e+00> : vector<64x128xf32>
    %205 = tpu.matmul %202, %204, %cst_120 {dimension_numbers = #tpu.dot_dimension_numbers<[1], [0], [0], [1], [0, 0, 1, 1], [], []>} : vector<64x128xf32>, vector<128x128xf32>, vector<64x128xf32> -> vector<64x128xf32>
    %c8_121 = arith.constant 8 : index
    %c0_122 = arith.constant 0 : index
    %206 = vector.load %arg12[%c8_121, %c0_122] : memref<89x128xf32, #tpu.memory_space<vmem>>, vector<64x128xf32>
    %c1_123 = arith.constant 1 : index
    %c0_124 = arith.constant 0 : index
    %c0_125 = arith.constant 0 : index
    %207 = vector.load %arg6[%c1_123, %c0_124, %c0_125] : memref<9x128x128xf32, #tpu.memory_space<vmem>>, vector<1x128x128xf32>
    %208 = vector.shape_cast %207 : vector<1x128x128xf32> to vector<128x128xf32>
    %cst_126 = arith.constant dense<0.000000e+00> : vector<64x128xf32>
    %209 = tpu.matmul %206, %208, %cst_126 {dimension_numbers = #tpu.dot_dimension_numbers<[1], [0], [0], [1], [0, 0, 1, 1], [], []>} : vector<64x128xf32>, vector<128x128xf32>, vector<64x128xf32> -> vector<64x128xf32>
    %210 = arith.addf %205, %209 : vector<64x128xf32>
    %c9_127 = arith.constant 9 : index
    %c0_128 = arith.constant 0 : index
    %211 = vector.load %arg12[%c9_127, %c0_128] : memref<89x128xf32, #tpu.memory_space<vmem>>, vector<64x128xf32>
    %212 = vector.broadcast %199 : vector<64x1xf32> to vector<64x128xf32>
    %213 = arith.mulf %211, %212 : vector<64x128xf32>
    %c2_129 = arith.constant 2 : index
    %c0_130 = arith.constant 0 : index
    %c0_131 = arith.constant 0 : index
    %214 = vector.load %arg6[%c2_129, %c0_130, %c0_131] : memref<9x128x128xf32, #tpu.memory_space<vmem>>, vector<1x128x128xf32>
    %215 = vector.shape_cast %214 : vector<1x128x128xf32> to vector<128x128xf32>
    %cst_132 = arith.constant dense<0.000000e+00> : vector<64x128xf32>
    %216 = tpu.matmul %213, %215, %cst_132 {dimension_numbers = #tpu.dot_dimension_numbers<[1], [0], [0], [1], [0, 0, 1, 1], [], []>} : vector<64x128xf32>, vector<128x128xf32>, vector<64x128xf32> -> vector<64x128xf32>
    %217 = arith.addf %210, %216 : vector<64x128xf32>
    %c15 = arith.constant 15 : index
    %c0_133 = arith.constant 0 : index
    %218 = vector.load %arg12[%c15, %c0_133] : memref<89x128xf32, #tpu.memory_space<vmem>>, vector<64x128xf32>
    %219 = vector.broadcast %195 : vector<64x1xf32> to vector<64x128xf32>
    %220 = arith.mulf %218, %219 : vector<64x128xf32>
    %c3_134 = arith.constant 3 : index
    %c0_135 = arith.constant 0 : index
    %c0_136 = arith.constant 0 : index
    %221 = vector.load %arg6[%c3_134, %c0_135, %c0_136] : memref<9x128x128xf32, #tpu.memory_space<vmem>>, vector<1x128x128xf32>
    %222 = vector.shape_cast %221 : vector<1x128x128xf32> to vector<128x128xf32>
    %cst_137 = arith.constant dense<0.000000e+00> : vector<64x128xf32>
    %223 = tpu.matmul %220, %222, %cst_137 {dimension_numbers = #tpu.dot_dimension_numbers<[1], [0], [0], [1], [0, 0, 1, 1], [], []>} : vector<64x128xf32>, vector<128x128xf32>, vector<64x128xf32> -> vector<64x128xf32>
    %224 = arith.addf %217, %223 : vector<64x128xf32>
    %c16_138 = arith.constant 16 : index
    %c0_139 = arith.constant 0 : index
    %225 = vector.load %arg12[%c16_138, %c0_139] : memref<89x128xf32, #tpu.memory_space<vmem>>, vector<64x128xf32>
    %c4_140 = arith.constant 4 : index
    %c0_141 = arith.constant 0 : index
    %c0_142 = arith.constant 0 : index
    %226 = vector.load %arg6[%c4_140, %c0_141, %c0_142] : memref<9x128x128xf32, #tpu.memory_space<vmem>>, vector<1x128x128xf32>
    %227 = vector.shape_cast %226 : vector<1x128x128xf32> to vector<128x128xf32>
    %cst_143 = arith.constant dense<0.000000e+00> : vector<64x128xf32>
    %228 = tpu.matmul %225, %227, %cst_143 {dimension_numbers = #tpu.dot_dimension_numbers<[1], [0], [0], [1], [0, 0, 1, 1], [], []>} : vector<64x128xf32>, vector<128x128xf32>, vector<64x128xf32> -> vector<64x128xf32>
    %229 = arith.addf %224, %228 : vector<64x128xf32>
    %c17 = arith.constant 17 : index
    %c0_144 = arith.constant 0 : index
    %230 = vector.load %arg12[%c17, %c0_144] : memref<89x128xf32, #tpu.memory_space<vmem>>, vector<64x128xf32>
    %231 = vector.broadcast %199 : vector<64x1xf32> to vector<64x128xf32>
    %232 = arith.mulf %230, %231 : vector<64x128xf32>
    %c5_145 = arith.constant 5 : index
    %c0_146 = arith.constant 0 : index
    %c0_147 = arith.constant 0 : index
    %233 = vector.load %arg6[%c5_145, %c0_146, %c0_147] : memref<9x128x128xf32, #tpu.memory_space<vmem>>, vector<1x128x128xf32>
    %234 = vector.shape_cast %233 : vector<1x128x128xf32> to vector<128x128xf32>
    %cst_148 = arith.constant dense<0.000000e+00> : vector<64x128xf32>
    %235 = tpu.matmul %232, %234, %cst_148 {dimension_numbers = #tpu.dot_dimension_numbers<[1], [0], [0], [1], [0, 0, 1, 1], [], []>} : vector<64x128xf32>, vector<128x128xf32>, vector<64x128xf32> -> vector<64x128xf32>
    %236 = arith.addf %229, %235 : vector<64x128xf32>
    %c23_149 = arith.constant 23 : index
    %c0_150 = arith.constant 0 : index
    %237 = vector.load %arg12[%c23_149, %c0_150] : memref<89x128xf32, #tpu.memory_space<vmem>>, vector<64x128xf32>
    %238 = vector.broadcast %195 : vector<64x1xf32> to vector<64x128xf32>
    %239 = arith.mulf %237, %238 : vector<64x128xf32>
    %c6_151 = arith.constant 6 : index
    %c0_152 = arith.constant 0 : index
    %c0_153 = arith.constant 0 : index
    %240 = vector.load %arg6[%c6_151, %c0_152, %c0_153] : memref<9x128x128xf32, #tpu.memory_space<vmem>>, vector<1x128x128xf32>
    %241 = vector.shape_cast %240 : vector<1x128x128xf32> to vector<128x128xf32>
    %cst_154 = arith.constant dense<0.000000e+00> : vector<64x128xf32>
    %242 = tpu.matmul %239, %241, %cst_154 {dimension_numbers = #tpu.dot_dimension_numbers<[1], [0], [0], [1], [0, 0, 1, 1], [], []>} : vector<64x128xf32>, vector<128x128xf32>, vector<64x128xf32> -> vector<64x128xf32>
    %243 = arith.addf %236, %242 : vector<64x128xf32>
    %c24_155 = arith.constant 24 : index
    %c0_156 = arith.constant 0 : index
    %244 = vector.load %arg12[%c24_155, %c0_156] : memref<89x128xf32, #tpu.memory_space<vmem>>, vector<64x128xf32>
    %c7_157 = arith.constant 7 : index
    %c0_158 = arith.constant 0 : index
    %c0_159 = arith.constant 0 : index
    %245 = vector.load %arg6[%c7_157, %c0_158, %c0_159] : memref<9x128x128xf32, #tpu.memory_space<vmem>>, vector<1x128x128xf32>
    %246 = vector.shape_cast %245 : vector<1x128x128xf32> to vector<128x128xf32>
    %cst_160 = arith.constant dense<0.000000e+00> : vector<64x128xf32>
    %247 = tpu.matmul %244, %246, %cst_160 {dimension_numbers = #tpu.dot_dimension_numbers<[1], [0], [0], [1], [0, 0, 1, 1], [], []>} : vector<64x128xf32>, vector<128x128xf32>, vector<64x128xf32> -> vector<64x128xf32>
    %248 = arith.addf %243, %247 : vector<64x128xf32>
    %c25_161 = arith.constant 25 : index
    %c0_162 = arith.constant 0 : index
    %249 = vector.load %arg12[%c25_161, %c0_162] : memref<89x128xf32, #tpu.memory_space<vmem>>, vector<64x128xf32>
    %250 = vector.broadcast %199 : vector<64x1xf32> to vector<64x128xf32>
    %251 = arith.mulf %249, %250 : vector<64x128xf32>
    %c8_163 = arith.constant 8 : index
    %c0_164 = arith.constant 0 : index
    %c0_165 = arith.constant 0 : index
    %252 = vector.load %arg6[%c8_163, %c0_164, %c0_165] : memref<9x128x128xf32, #tpu.memory_space<vmem>>, vector<1x128x128xf32>
    %253 = vector.shape_cast %252 : vector<1x128x128xf32> to vector<128x128xf32>
    %cst_166 = arith.constant dense<0.000000e+00> : vector<64x128xf32>
    %254 = tpu.matmul %251, %253, %cst_166 {dimension_numbers = #tpu.dot_dimension_numbers<[1], [0], [0], [1], [0, 0, 1, 1], [], []>} : vector<64x128xf32>, vector<128x128xf32>, vector<64x128xf32> -> vector<64x128xf32>
    %255 = arith.addf %248, %254 : vector<64x128xf32>
    %c0_167 = arith.constant 0 : index
    %c0_168 = arith.constant 0 : index
    %256 = vector.load %arg7[%c0_167, %c0_168] : memref<1x128xf32, #tpu.memory_space<vmem>>, vector<1x128xf32>
    %257 = vector.broadcast %256 : vector<1x128xf32> to vector<64x128xf32>
    %258 = arith.addf %255, %257 : vector<64x128xf32>
    %c24_169 = arith.constant 24 : index
    %c0_170 = arith.constant 0 : index
    %259 = vector.load %arg9[%c24_169, %c0_170] : memref<297x128xf32, #tpu.memory_space<vmem>>, vector<16x128xf32>
    %c40_171 = arith.constant 40 : index
    %c0_172 = arith.constant 0 : index
    %260 = vector.load %arg9[%c40_171, %c0_172] : memref<297x128xf32, #tpu.memory_space<vmem>>, vector<16x128xf32>
    %261 = arith.addf %259, %260 : vector<16x128xf32>
    %c0_173 = arith.constant 0 : index
    %c0_174 = arith.constant 0 : index
    %262 = vector.load %arg11[%c0_173, %c0_174] : memref<128x128xf32, #tpu.memory_space<vmem>>, vector<16x128xf32>
    tpu.vector_store %arg11[%c0_173, %c0_174], %261 {strides = array<i32>} : memref<128x128xf32, #tpu.memory_space<vmem>>, vector<16x128xf32>,
    %c56 = arith.constant 56 : index
    %c0_175 = arith.constant 0 : index
    %263 = vector.load %arg9[%c56, %c0_175] : memref<297x128xf32, #tpu.memory_space<vmem>>, vector<16x128xf32>
    %c72 = arith.constant 72 : index
    %c0_176 = arith.constant 0 : index
    %264 = vector.load %arg9[%c72, %c0_176] : memref<297x128xf32, #tpu.memory_space<vmem>>, vector<16x128xf32>
    %265 = arith.addf %263, %264 : vector<16x128xf32>
    %c16_177 = arith.constant 16 : index
    %c0_178 = arith.constant 0 : index
    %266 = vector.load %arg11[%c16_177, %c0_178] : memref<128x128xf32, #tpu.memory_space<vmem>>, vector<16x128xf32>
    tpu.vector_store %arg11[%c16_177, %c0_178], %265 {strides = array<i32>} : memref<128x128xf32, #tpu.memory_space<vmem>>, vector<16x128xf32>,
    %c88 = arith.constant 88 : index
    %c0_179 = arith.constant 0 : index
    %267 = vector.load %arg9[%c88, %c0_179] : memref<297x128xf32, #tpu.memory_space<vmem>>, vector<16x128xf32>
    %c104 = arith.constant 104 : index
    %c0_180 = arith.constant 0 : index
    %268 = vector.load %arg9[%c104, %c0_180] : memref<297x128xf32, #tpu.memory_space<vmem>>, vector<16x128xf32>
    %269 = arith.addf %267, %268 : vector<16x128xf32>
    %c32_181 = arith.constant 32 : index
    %c0_182 = arith.constant 0 : index
    %270 = vector.load %arg11[%c32_181, %c0_182] : memref<128x128xf32, #tpu.memory_space<vmem>>, vector<16x128xf32>
    tpu.vector_store %arg11[%c32_181, %c0_182], %269 {strides = array<i32>} : memref<128x128xf32, #tpu.memory_space<vmem>>, vector<16x128xf32>,
    %c120 = arith.constant 120 : index
    %c0_183 = arith.constant 0 : index
    %271 = vector.load %arg9[%c120, %c0_183] : memref<297x128xf32, #tpu.memory_space<vmem>>, vector<16x128xf32>
    %c136 = arith.constant 136 : index
    %c0_184 = arith.constant 0 : index
    %272 = vector.load %arg9[%c136, %c0_184] : memref<297x128xf32, #tpu.memory_space<vmem>>, vector<16x128xf32>
    %273 = arith.addf %271, %272 : vector<16x128xf32>
    %c48_185 = arith.constant 48 : index
    %c0_186 = arith.constant 0 : index
    %274 = vector.load %arg11[%c48_185, %c0_186] : memref<128x128xf32, #tpu.memory_space<vmem>>, vector<16x128xf32>
    tpu.vector_store %arg11[%c48_185, %c0_186], %273 {strides = array<i32>} : memref<128x128xf32, #tpu.memory_space<vmem>>, vector<16x128xf32>,
    %c152 = arith.constant 152 : index
    %c0_187 = arith.constant 0 : index
    %275 = vector.load %arg9[%c152, %c0_187] : memref<297x128xf32, #tpu.memory_space<vmem>>, vector<16x128xf32>
    %c168 = arith.constant 168 : index
    %c0_188 = arith.constant 0 : index
    %276 = vector.load %arg9[%c168, %c0_188] : memref<297x128xf32, #tpu.memory_space<vmem>>, vector<16x128xf32>
    %277 = arith.addf %275, %276 : vector<16x128xf32>
    %c64_189 = arith.constant 64 : index
    %c0_190 = arith.constant 0 : index
    %278 = vector.load %arg11[%c64_189, %c0_190] : memref<128x128xf32, #tpu.memory_space<vmem>>, vector<16x128xf32>
    tpu.vector_store %arg11[%c64_189, %c0_190], %277 {strides = array<i32>} : memref<128x128xf32, #tpu.memory_space<vmem>>, vector<16x128xf32>,
    %c184 = arith.constant 184 : index
    %c0_191 = arith.constant 0 : index
    %279 = vector.load %arg9[%c184, %c0_191] : memref<297x128xf32, #tpu.memory_space<vmem>>, vector<16x128xf32>
    %c200 = arith.constant 200 : index
    %c0_192 = arith.constant 0 : index
    %280 = vector.load %arg9[%c200, %c0_192] : memref<297x128xf32, #tpu.memory_space<vmem>>, vector<16x128xf32>
    %281 = arith.addf %279, %280 : vector<16x128xf32>
    %c80_193 = arith.constant 80 : index
    %c0_194 = arith.constant 0 : index
    %282 = vector.load %arg11[%c80_193, %c0_194] : memref<128x128xf32, #tpu.memory_space<vmem>>, vector<16x128xf32>
    tpu.vector_store %arg11[%c80_193, %c0_194], %281 {strides = array<i32>} : memref<128x128xf32, #tpu.memory_space<vmem>>, vector<16x128xf32>,
    %c216 = arith.constant 216 : index
    %c0_195 = arith.constant 0 : index
    %283 = vector.load %arg9[%c216, %c0_195] : memref<297x128xf32, #tpu.memory_space<vmem>>, vector<16x128xf32>
    %c232 = arith.constant 232 : index
    %c0_196 = arith.constant 0 : index
    %284 = vector.load %arg9[%c232, %c0_196] : memref<297x128xf32, #tpu.memory_space<vmem>>, vector<16x128xf32>
    %285 = arith.addf %283, %284 : vector<16x128xf32>
    %c96_197 = arith.constant 96 : index
    %c0_198 = arith.constant 0 : index
    %286 = vector.load %arg11[%c96_197, %c0_198] : memref<128x128xf32, #tpu.memory_space<vmem>>, vector<16x128xf32>
    tpu.vector_store %arg11[%c96_197, %c0_198], %285 {strides = array<i32>} : memref<128x128xf32, #tpu.memory_space<vmem>>, vector<16x128xf32>,
    %c248 = arith.constant 248 : index
    %c0_199 = arith.constant 0 : index
    %287 = vector.load %arg9[%c248, %c0_199] : memref<297x128xf32, #tpu.memory_space<vmem>>, vector<16x128xf32>
    %c264 = arith.constant 264 : index
    %c0_200 = arith.constant 0 : index
    %288 = vector.load %arg9[%c264, %c0_200] : memref<297x128xf32, #tpu.memory_space<vmem>>, vector<16x128xf32>
    %289 = arith.addf %287, %288 : vector<16x128xf32>
    %c112_201 = arith.constant 112 : index
    %c0_202 = arith.constant 0 : index
    %290 = vector.load %arg11[%c112_201, %c0_202] : memref<128x128xf32, #tpu.memory_space<vmem>>, vector<16x128xf32>
    tpu.vector_store %arg11[%c112_201, %c0_202], %289 {strides = array<i32>} : memref<128x128xf32, #tpu.memory_space<vmem>>, vector<16x128xf32>,
    %c0_203 = arith.constant 0 : index
    %c0_204 = arith.constant 0 : index
    %291 = tpu.strided_load %arg11[%c0_203, %c0_204] {strides = array<i32: 2, 1>} : memref<128x128xf32, #tpu.memory_space<vmem>>, vector<64x128xf32>
    %c1_205 = arith.constant 1 : index
    %c0_206 = arith.constant 0 : index
    %292 = tpu.strided_load %arg11[%c1_205, %c0_206] {strides = array<i32: 2, 1>} : memref<128x128xf32, #tpu.memory_space<vmem>>, vector<64x128xf32>
    %293 = arith.addf %291, %292 : vector<64x128xf32>
    %cst_207 = arith.constant 2.500000e-01 : f32
    %294 = vector.broadcast %cst_207 : f32 to vector<64x128xf32>
    %295 = arith.mulf %293, %294 : vector<64x128xf32>
    %296 = arith.addf %295, %258 : vector<64x128xf32>
    %cst_208 = arith.constant 0.707106769 : f32
    %297 = vector.broadcast %cst_208 : f32 to vector<64x128xf32>
    %298 = arith.mulf %296, %297 : vector<64x128xf32>
    %c0_209 = arith.constant 0 : index
    %c0_210 = arith.constant 0 : index
    %c0_211 = arith.constant 0 : index
    %299 = vector.load %arg8[%c0_209, %c0_210, %c0_211] : memref<1x64x128xf32, #tpu.memory_space<vmem>>, vector<1x64x128xf32>
    %300 = vector.shape_cast %299 : vector<1x64x128xf32> to vector<64x128xf32>
    %301 = vector.shape_cast %298 : vector<64x128xf32> to vector<1x64x128xf32>
    tpu.vector_store %arg8[%c0_209, %c0_210, %c0_211], %301 {strides = array<i32>} : memref<1x64x128xf32, #tpu.memory_space<vmem>>, vector<1x64x128xf32>,
    return
  }
  func.func @transform_0(%arg0: i32) -> (i32, i32, i32) {
    %c0_i32 = arith.constant 0 : i32
    %c0_i32_0 = arith.constant 0 : i32
    %c0_i32_1 = arith.constant 0 : i32
    return %arg0, %c0_i32, %c0_i32_0 : i32, i32, i32
  }
  func.func @transform_1(%arg0: i32) -> (i32, i32, i32) {
    %c0_i32 = arith.constant 0 : i32
    %c0_i32_0 = arith.constant 0 : i32
    %c0_i32_1 = arith.constant 0 : i32
    %c0_i32_2 = arith.constant 0 : i32
    return %c0_i32, %c0_i32_0, %c0_i32_1 : i32, i32, i32
  }
  func.func @transform_2(%arg0: i32) -> (i32, i32) {
    %c0_i32 = arith.constant 0 : i32
    %c0_i32_0 = arith.constant 0 : i32
    %c0_i32_1 = arith.constant 0 : i32
    return %c0_i32, %c0_i32_0 : i32, i32
  }
  func.func @transform_3(%arg0: i32) -> (i32, i32) {
    %c0_i32 = arith.constant 0 : i32
    %c0_i32_0 = arith.constant 0 : i32
    %c0_i32_1 = arith.constant 0 : i32
    return %c0_i32, %c0_i32_0 : i32, i32
  }
  func.func @transform_4(%arg0: i32) -> (i32, i32) {
    %c0_i32 = arith.constant 0 : i32
    %c0_i32_0 = arith.constant 0 : i32
    %c0_i32_1 = arith.constant 0 : i32
    return %c0_i32, %c0_i32_0 : i32, i32
  }
  func.func @transform_5(%arg0: i32) -> (i32, i32, i32) {
    %c0_i32 = arith.constant 0 : i32
    %c0_i32_0 = arith.constant 0 : i32
    %c0_i32_1 = arith.constant 0 : i32
    %c0_i32_2 = arith.constant 0 : i32
    return %c0_i32, %c0_i32_0, %c0_i32_1 : i32, i32, i32
  }
  func.func @transform_6(%arg0: i32) -> (i32, i32) {
    %c0_i32 = arith.constant 0 : i32
    %c0_i32_0 = arith.constant 0 : i32
    %c0_i32_1 = arith.constant 0 : i32
    return %c0_i32, %c0_i32_0 : i32, i32
  }
  func.func @transform_7(%arg0: i32) -> (i32, i32, i32) {
    %c0_i32 = arith.constant 0 : i32
    %c0_i32_0 = arith.constant 0 : i32
    %c0_i32_1 = arith.constant 0 : i32
    return %arg0, %c0_i32, %c0_i32_0 : i32, i32, i32
  }
}

</mosaic_0001>

<bundles_post_ra>
// kernel: tpu_custom_call.1
= control target key start
LH: loop header
LB: loop body
LE: loop exit
PB: predicated region body
PF: predicated region fallthrough
CT: control target
= control target key end

     0   :  { %12 = vsyncpa [#allocation7], 0  ;;  %s11263_s0 = inlined_call_operand.vmem [shape: f32[2,256,4], index: 0, kind: input, shape index: {}]   ;;  %s11264_s1 = inlined_call_operand.hbm [shape: f32[9,128,128], index: 1, kind: input, shape index: {}]   ;;  %s11265_s2 = inlined_call_operand.vmem [shape: f32[1,128], index: 2, kind: input, shape index: {}]   ;;  %s11266_s3 = inlined_call_operand.vmem [shape: f32[1,128], index: 3, kind: input, shape index: {}]   ;;  %s11267_s4 = inlined_call_operand.vmem [shape: f32[1,128], index: 4, kind: input, shape index: {}]   ;;  %s11268_s5 = inlined_call_operand.hbm [shape: f32[9,128,128], index: 5, kind: input, shape index: {}]   ;;  %s11269_s6 = inlined_call_operand.vmem [shape: f32[1,128], index: 6, kind: input, shape index: {}]   ;;  %s11270_s7 = inlined_call_operand.hbm [shape: f32[2,64,128], index: 7, kind: output, shape index: {}]  }
   0x1   :  { %13 = vsyncpa [#allocation10], 0 }
   0x2   :  { %14 = vsyncpa [#allocation8], 0 }
   0x3   :  { %16 = vsyncpa [#allocation8 + $0x1], 0  ;;  %s8569_s24 = smov 0   ;;  %s8571_s25 = smov 0  }
   0x4   :  { %s8573_s26 = smov 0   ;;  %s8575_s27 = smov 0  }
   0x5 LB: > { %s8590_s28 = sadd.s32 4294967295, %s8519_s27   ;;  %s6297_s29 = sadd.s32 4294967294, %s8519_s27   ;;  %s8519_s27 = sphi %s8575_s27, %s11492_s27   ;;  %s8515_s26 = sphi %s8573_s26, %s11491_s26   ;;  %s8511_s25 = sphi %s8571_s25, %s11490_s25   ;;  %s8507_s24 = sphi %s8569_s24, %s11489_s24  }
   0x6   : > { %s8594_s30 = sadd.s32 1, %s8519_s27   ;;  %s181_s8 = sadd.s32 1, %s8515_s26 }
   0x7   : > { %s178_s9 = ssub.s32 %s8519_s27, %s8594_s30  ;;  %p191_p0 = scmp.ne.s32.totalorder %s8515_s26, %s8511_s25 }
   0x8   : > { %p179_p1 = scmp.eq.s32.totalorder %s178_s9, 0  ;;  %p192_p2 = scmp.eq.s32.totalorder %s8590_s28, 1 }
   0x9   : > { %p197_p3 = scmp.ne.s32.totalorder %s8511_s25, %s8507_s24  ;;  %p198_p4 = scmp.eq.s32.totalorder %s6297_s29, 1 }
   0xa   : > { %s8605_s10 = scalar_select %p179_p1, %s8515_s26, %s181_s8  }
   0xb   : > { %p8607_p5 = por %p192_p2, %p191_p0  ;;  %p8611_p6 = por %p198_p4, %p197_p3 }
   0xc   : > { %p6298_p7 = scmp.ge.s32.totalorder %s8519_s27, 1  ;;  %p205_p8 = scmp.lt.s32.totalorder %s8519_s27, 3 }
   0xd   : > { %s11310_s12 = scalar_select %p8611_p6, 1, 0 }
   0xe   : > { %p11271_p9 = scmp.eq.s32.totalorder %s8590_s28, 0  ;;  %p8618_p10 = pnand %p6298_p7, %p205_p8 }
   0xf   : > { %s8521_s14 = smov [#allocation6]   ;;  %s8522_s17 = smov [#allocation9]  }
  0x10   : > { %s217_s15 = sshll.u32 %s8521_s14, 4  ;;  %p8210_p11 = pneg %p8618_p10  ;;  %s218_s15 = int_to_ptr.vmem [resolvable:$true] %s217_s15 }
  0x11   : > { %s239_s18 = sshll.u32 %s8522_s17, 4  ;;  %s8410_s19 = scalar_lea.vmem %s218_s15, 18432  ;;  %s240_s18 = int_to_ptr.vmem [resolvable:$true] %s239_s18 }
  0x12   : > { %p8626_p12 = pnand %p11271_p9, %p8210_p11  ;;  %p8411_p0 = scmp.ne.s32.totalorder %s218_s15, %s8410_s19 }
  0x13   : > { %p8418_p3 = scmp.lt.s32.totalorder %s218_s15, %s218_s15  ;;  %p8419_p4 = scmp.lt.s32.totalorder %s8410_s19, %s8410_s19 }
  0x14   : > { %p8401_p13 = pneg %p8626_p12 }
  0x15   : > { %p8420_p7 = por %p8419_p4, %p8418_p3 }
  0x16   : > { %p8413_p1 = pnand %p8411_p0, %p8401_p13 }
  0x18   : > { %p8414_p2 = pneg %p8413_p1 }
  0x1a   : > { %p8421_p8 = pnand %p8420_p7, %p8414_p2 }
  0x1c   : > { %8424 = shalt.err (!%p8421_p8)
}
  0x1d   : > { %s8523_s20 = smov 128   ;;  %s8524_s21 = smov 8  }
  0x1e   : > { %8213 = dma.hbm_to_vmem [thread:$0]  (!%p8626_p12), %s11264_s1, 18432, %s218_s15, [#allocation7], %s8523_s20, %s8523_s20, %s8524_s21  }
  0x1f   : > { %s8436_s29 = scalar_lea.vmem %s240_s18, 18432  ;;  %p8444_p9 = scmp.lt.s32.totalorder %s240_s18, %s240_s18 }
  0x20   : > { %p8437_p11 = scmp.ne.s32.totalorder %s240_s18, %s8436_s29  ;;  %p8445_p6 = scmp.lt.s32.totalorder %s8436_s29, %s8436_s29 }
  0x22   : > { %p8439_p0 = pnand %p8437_p11, %p8401_p13  ;;  %p8446_p3 = por %p8445_p6, %p8444_p9 }
  0x24   : > { %p8440_p1 = pneg %p8439_p0 }
  0x26   : > { %p8447_p2 = pnand %p8446_p3, %p8440_p1 }
  0x28   : > { %8450 = shalt.err (!%p8447_p2)
}
  0x29   : > { %8216 = dma.hbm_to_vmem [thread:$0]  (!%p8626_p12), %s11268_s5, 18432, %s240_s18, [#allocation10], %s8523_s20, %s8523_s20, %s8524_s21  }
  0x2a   : > { %266 = sbr.rel (%p8618_p10) target bundleno = 1587 (0x633), region = 48 }
  0x2f   : > { %p11313_p4 = scmp.eq.s32.totalorder %s8590_s28, 0 }
  0x31   : > { %8494 = dma.done.wait (%p11313_p4), [#allocation7], 18432   ;;  %p11314_p13 = pmov %p11313_p4 }
  0x32   : > { %p11315_p7 = pmov %p11313_p4 }
  0x33   : > { %8496 = vsyncadd (%p11314_p13), [#allocation7], 4294948864 }
  0x34   : > { %8498 = dma.done.wait (%p11315_p7), [#allocation10], 18432   ;;  %p11316_p6 = pmov %p11313_p4 }
  0x35   : > { %v8525_v0 = vmov 0.0   ;;  %p302_p9 = scmp.lt.s32.totalorder %s8590_s28, 1  ;;  %v1147_v1 = vld [vmem:[#allocation6 + $0xf8] sm:$0xff]  ;;  %v1146_v3 = vld [vmem:[#allocation6 + $0xf0] sm:$0xff]  ;;  %v1145_v5 = vld [vmem:[#allocation6 + $0xe8] sm:$0xff]  ;;  %vm377_vm0 = vcmask 31744   ;;  %v11272_v16 = vlaneseq }
  0x36   : > { %8500 = vsyncadd (%p11316_p6), [#allocation10], 4294948864  ;;  %308 = vst [vmem:[#allocation2 + $0x8] sm:$0xff] %v8525_v0  ;;  %7080 = vmatprep.mubr.f32.mxu0 %v8525_v0  ;;  %v1098_v2 = vld [vmem:[#allocation6 + $0x78] sm:$0xff]  ;;  %7048 = vmatprep.subr.mxu0 %v1147_v1  ;;  %v1097_v4 = vld [vmem:[#allocation6 + $0x70] sm:$0xff]  ;;  %s299_s9 = sand.u32 1, %s8511_s25  }
  0x37   : > { %307 = vst [vmem:[#allocation2] sm:$0xff] %v8525_v0  ;;  %309 = vst [vmem:[#allocation2 + $0x10] sm:$0xff] %v8525_v0  ;;  %7128 = vmatprep.subr.mxu1 %v1098_v2  ;;  %s303_s13 = scalar_select %p302_p9, %s8590_s28, 1  ;;  %7049 = vmatpush3.msra.mxu0 %v1147_v1  ;;  %v1096_v6 = vld [vmem:[#allocation6 + $0x68] sm:$0xff]  ;;  %v1144_v7 = vld [vmem:[#allocation6 + $0xe0] sm:$0xff]  ;;  %v8721_v28 = vshrl.u32 %v11272_v16, 7 }
  0x38   : > { %310 = vst [vmem:[#allocation2 + $0x18] sm:$0xff] %v8525_v0  ;;  %311 = vst [vmem:[#allocation2 + $0x20] sm:$0xff] %v8525_v0  ;;  %7129 = vmatpush3.msra.mxu1 %v1098_v2  ;;  %7050 = vmatprep.subr.mxu0 %v1146_v3  ;;  %v1095_v8 = vld [vmem:[#allocation6 + $0x60] sm:$0xff]  ;;  %v1143_v9 = vld [vmem:[#allocation6 + $0xd8] sm:$0xff]  ;;  %s6305_s15 = sshll.u32 %s299_s9, 6  ;;  %s11223_s22 = scalar_lea.sflag [#allocation8], %s299_s9 }
  0x39   : > { %312 = vst [vmem:[#allocation2 + $0x28] sm:$0xff] %v8525_v0  ;;  %313 = vst [vmem:[#allocation2 + $0x30] sm:$0xff] %v8525_v0  ;;  %7130 = vmatprep.subr.mxu1 %v1097_v4  ;;  %7051 = vmatpush3.msra.mxu0 %v1146_v3  ;;  %s6398_s14 = sshll.u32 %s303_s13, 8  ;;  %v1094_v10 = vld [vmem:[#allocation6 + $0x58] sm:$0xff]  ;;  %v1142_v11 = vld [vmem:[#allocation6 + $0xd0] sm:$0xff]  ;;  %v8736_v38 = vadd.s32 16, %v8721_v28 }
  0x3a   : > { %314 = vst [vmem:[#allocation2 + $0x38] sm:$0xff] %v8525_v0  ;;  %315 = vst [vmem:[#allocation2 + $0x40] sm:$0xff] %v8525_v0  ;;  %7131 = vmatpush3.msra.mxu1 %v1097_v4  ;;  %7052 = vmatprep.subr.mxu0 %v1145_v5  ;;  %v1093_v12 = vld [vmem:[#allocation6 + $0x50] sm:$0xff]  ;;  %s8706_s17 = scalar_lea.vmem %s11263_s0, %s6398_s14  ;;  %v1141_v13 = vld [vmem:[#allocation6 + $0xc8] sm:$0xff]  ;;  %v447_v41 = vand.u32 15, %v8721_v28  ;;  %v8748_v45 = vadd.s32 32, %v8721_v28 }
  0x3b   : > { %316 = vst [vmem:[#allocation2 + $0x48] sm:$0xff] %v8525_v0  ;;  %317 = vst [vmem:[#allocation2 + $0x50] sm:$0xff] %v8525_v0  ;;  %7132 = vmatprep.subr.mxu1 %v1096_v6  ;;  %7053 = vmatpush3.msra.mxu0 %v1145_v5  ;;  %v1092_v14 = vld [vmem:[#allocation6 + $0x48] sm:$0xff]  ;;  %v1140_v15 = vld [vmem:[#allocation6 + $0xc0] sm:$0xff]  ;;  %v461_v48 = vand.u32 15, %v8736_v38  ;;  %v8753_v52 = vadd.s32 48, %v8721_v28 }
  0x3c   : > { %318 = vst [vmem:[#allocation2 + $0x58] sm:$0xff] %v8525_v0  ;;  %319 = vst [vmem:[#allocation2 + $0x60] sm:$0xff] %v8525_v0  ;;  %7133 = vmatpush3.msra.mxu1 %v1096_v6  ;;  %7054 = vmatprep.subr.mxu0 %v1144_v7  ;;  %v345_v17 = vld [vmem:[%s8706_s17] sm:$0xff]  ;;  %v1091_v18 = vld [vmem:[#allocation6 + $0x40] sm:$0xff]  ;;  %vm827_vm1 = vcmp.ge.s32.totalorder %v447_v41, 1  ;;  %v475_v51 = vand.u32 15, %v8748_v45 }
  0x3d   : > { %320 = vst [vmem:[#allocation2 + $0x68] sm:$0xff] %v8525_v0  ;;  %321 = vst [vmem:[#allocation2 + $0x70] sm:$0xff] %v8525_v0  ;;  %7134 = vmatprep.subr.mxu1 %v1095_v8  ;;  %7055 = vmatpush3.msra.mxu0 %v1144_v7  ;;  %v346_v19 = vld [vmem:[%s8706_s17 + $0x8] sm:$0xff]  ;;  %v347_v20 = vld [vmem:[%s8706_s17 + $0x10] sm:$0xff]  ;;  %v8756_v55 = vsel %vm827_vm1, 1.0, %v8525_v0  ;;  %vm829_vm2 = vcmp.ge.s32.totalorder %v461_v48, 1 }
  0x3e   : > { %322 = vst [vmem:[#allocation2 + $0x78] sm:$0xff] %v8525_v0  ;;  %323 = vst [vmem:[#allocation2 + $0x80] sm:$0xff] %v8525_v0  ;;  %7135 = vmatpush3.msra.mxu1 %v1095_v8  ;;  %7056 = vmatprep.subr.mxu0 %v1143_v9  ;;  %v1139_v21 = vld [vmem:[#allocation6 + $0xb8] sm:$0xff]  ;;  %v348_v22 = vld [vmem:[%s8706_s17 + $0x18] sm:$0xff]  ;;  %v419_v59 = vadd.s32 64, %v8721_v28  ;;  %v8761_v61 = vsel %vm829_vm2, 1.0, %v8525_v0 }
  0x3f   : > { %324 = vst [vmem:[#allocation2 + $0x88] sm:$0xff] %v8525_v0  ;;  %325 = vst [vmem:[#allocation2 + $0x90] sm:$0xff] %v8525_v0  ;;  %7136 = vmatprep.subr.mxu1 %v1094_v10  ;;  %7057 = vmatpush3.msra.mxu0 %v1143_v9  ;;  %v349_v23 = vld [vmem:[%s8706_s17 + $0x20] sm:$0xff]  ;;  %v1090_v24 = vld [vmem:[#allocation6 + $0x38] sm:$0xff]  ;;  %vm831_vm3 = vcmp.ge.s32.totalorder %v475_v51, 1  ;;  %v489_v63 = vand.u32 15, %v8753_v52 }
  0x40   : > { %326 = vst [vmem:[#allocation2 + $0x98] sm:$0xff] %v8525_v0  ;;  %327 = vst [vmem:[#allocation2 + $0xa0] sm:$0xff] %v8525_v0  ;;  %7137 = vmatpush3.msra.mxu1 %v1094_v10  ;;  %7058 = vmatprep.subr.mxu0 %v1142_v11  ;;  %v350_v25 = vld [vmem:[%s8706_s17 + $0x28] sm:$0xff]  ;;  %v351_v26 = vld [vmem:[%s8706_s17 + $0x30] sm:$0xff]  ;;  %v8772_v7 = vsel %vm831_vm3, 1.0, %v8525_v0  ;;  %s11169_s16 = scalar_lea.vmem [#allocation11], %s6305_s15 }
  0x41   : > { %328 = vst [vmem:[#allocation2 + $0xa8] sm:$0xff] %v8525_v0  ;;  %329 = vst [vmem:[#allocation2 + $0xb0] sm:$0xff] %v8525_v0  ;;  %7138 = vmatprep.subr.mxu1 %v1093_v12  ;;  %7059 = vmatpush3.msra.mxu0 %v1142_v11  ;;  %v1138_v27 = vld [vmem:[#allocation6 + $0xb0] sm:$0xff]  ;;  %v352_v29 = vld [vmem:[%s8706_s17 + $0x38] sm:$0xff]  ;;  %vm8780_vm4 = vcmp.ge.s32.totalorder %v489_v63, 1  ;;  %s6213_s18 = sshll.u32 %s11169_s16, 4  ;;  %s11217_s18 = int_to_ptr.vmem [resolvable:$true] %s6213_s18 }
  0x42   : > { %330 = vst [vmem:[#allocation2 + $0xb8] sm:$0xff] %v8525_v0  ;;  %331 = vst [vmem:[#allocation2 + $0xc0] sm:$0xff] %v8525_v0  ;;  %7139 = vmatpush3.msra.mxu1 %v1093_v12  ;;  %7060 = vmatprep.subr.mxu0 %v1141_v13  ;;  %v353_v30 = vld [vmem:[%s8706_s17 + $0x40] sm:$0xff]  ;;  %v354_v32 = vld [vmem:[%s8706_s17 + $0x48] sm:$0xff]  ;;  %s8526_s23 = smov [#allocation11]  }
  0x43   : > { %332 = vst [vmem:[#allocation2 + $0xc8] sm:$0xff] %v8525_v0  ;;  %333 = vst [vmem:[#allocation2 + $0xd0] sm:$0xff] %v8525_v0  ;;  %7140 = vmatprep.subr.mxu1 %v1092_v14  ;;  %7061 = vmatpush3.msra.mxu0 %v1141_v13  ;;  %v1089_v31 = vld [vmem:[#allocation6 + $0x30] sm:$0xff]  ;;  %v355_v33 = vld [vmem:[%s8706_s17 + $0x50] sm:$0xff]  ;;  %s8455_s29 = sshll.u32 %s8526_s23, 4  ;;  %s8456_s29 = int_to_ptr.vmem [resolvable:$false] %s8455_s29 }
  0x44   : > { %334 = vst [vmem:[#allocation2 + $0xd8] sm:$0xff] %v8525_v0  ;;  %335 = vst [vmem:[#allocation2 + $0xe0] sm:$0xff] %v8525_v0  ;;  %7141 = vmatpush3.msra.mxu1 %v1092_v14  ;;  %7062 = vmatprep.subr.mxu0 %v1140_v15  ;;  %v1137_v34 = vld [vmem:[#allocation6 + $0xa8] sm:$0xff]  ;;  %v357_v36 = vld [vmem:[%s8706_s17 + $0x60] sm:$0xff]  ;;  %v503_v14 = vand.u32 15, %v419_v59  ;;  %s8457_s8 = scalar_lea.vmem %s8456_s29, 2048  ;;  %p8458_p11 = scmp.lt.s32.totalorder %s11217_s18, %s8456_s29 }
  0x45   : > { %336 = vst [vmem:[#allocation2 + $0xe8] sm:$0xff] %v8525_v0  ;;  %337 = vst [vmem:[#allocation2 + $0xf0] sm:$0xff] %v8525_v0  ;;  %7142 = vmatprep.subr.mxu1 %v1091_v18  ;;  %7063 = vmatpush3.msra.mxu0 %v1140_v15  ;;  %v356_v35 = vld [vmem:[%s8706_s17 + $0x58] sm:$0xff]  ;;  %v358_v39 = vld [vmem:[%s8706_s17 + $0x68] sm:$0xff]  ;;  %v421_v15 = vadd.s32 80, %v8721_v28 }
  0x46   : > { %338 = vst [vmem:[#allocation2 + $0xf8] sm:$0xff] %v8525_v0  ;;  %339 = vst [vmem:[#allocation2 + $0x100] sm:$0xff] %v8525_v0  ;;  %7143 = vmatpush3.msra.mxu1 %v1091_v18  ;;  %7064 = vmatprep.subr.mxu0 %v1139_v21  ;;  %v1088_v37 = vld [vmem:[#allocation6 + $0x28] sm:$0xff]  ;;  %v359_v40 = vld [vmem:[%s8706_s17 + $0x70] sm:$0xff]  ;;  %vm8805_vm5 = vcmp.ge.s32.totalorder %v503_v14, 1 }
  0x47   : > { %340 = vst [vmem:[#allocation2 + $0x108] sm:$0xff] %v8525_v0  ;;  %341 = vst [vmem:[#allocation2 + $0x110] sm:$0xff] %v8525_v0  ;;  %7144 = vmatprep.subr.mxu1 %v1090_v24  ;;  %7065 = vmatpush3.msra.mxu0 %v1139_v21  ;;  %v360_v42 = vld [vmem:[%s8706_s17 + $0x78] sm:$0xff]  ;;  %v1136_v43 = vld [vmem:[#allocation6 + $0xa0] sm:$0xff]  ;;  %v8826_v41 = vsel %vm8805_vm5, 1.0, %v8525_v0 }
  0x48   : > { %342 = vst [vmem:[#allocation2 + $0x118] sm:$0xff] %v8525_v0  ;;  %343 = vst [vmem:[#allocation2 + $0x120] sm:$0xff] %v8525_v0  ;;  %7145 = vmatpush3.msra.mxu1 %v1090_v24  ;;  %7066 = vmatprep.subr.mxu0 %v1138_v27  ;;  %v1087_v44 = vld [vmem:[#allocation6 + $0x20] sm:$0xff]  ;;  %v1135_v46 = vld [vmem:[#allocation6 + $0x98] sm:$0xff]  ;;  %v8799_v24 = vsel %vm8780_vm4, 1.0, %v8525_v0 }
  0x49   : > { %344 = vst [vmem:[#allocation2 + $0x128] sm:$0x1] %v8525_v0  ;;  %4635 = vst [vmem:[#allocation5] sm:$0xff] %v8525_v0  ;;  %7146 = vmatprep.subr.mxu1 %v1089_v31  ;;  %7067 = vmatpush3.msra.mxu0 %v1138_v27  ;;  %v1086_v47 = vld [vmem:[#allocation6 + $0x18] sm:$0xff]  ;;  %v1134_v49 = vld [vmem:[#allocation6 + $0x90] sm:$0xff] }
  0x4a   : > { %4636 = vst [vmem:[#allocation5 + $0x8] sm:$0xff] %v8525_v0  ;;  %4637 = vst [vmem:[#allocation5 + $0x50] sm:$0xff] %v8525_v0  ;;  %7147 = vmatpush3.msra.mxu1 %v1089_v31  ;;  %7068 = vmatprep.subr.mxu0 %v1137_v34  ;;  %v1085_v50 = vld [vmem:[#allocation6 + $0x10] sm:$0xff]  ;;  %v1133_v53 = vld [vmem:[#allocation6 + $0x88] sm:$0xff]  ;;  %v423_v31 = vadd.s32 96, %v8721_v28 }
  0x4b   : > { %4638 = vst [vmem:[#allocation5 + $0x58] sm:$0x1] %v8525_v0  ;;  %378 = vst.msk [vmem:[#allocation2 + $0x18] sm:$0xff] %vm377_vm0, %v345_v17  ;;  %7148 = vmatprep.subr.mxu1 %v1088_v37  ;;  %7069 = vmatpush3.msra.mxu0 %v1137_v34  ;;  %v1084_v54 = vld [vmem:[#allocation6 + $0x8] sm:$0xff]  ;;  %v1019_v56 = vld [vmem:[#allocation2 + $0x7] sm:$0xff] }
  0x4c   : > { %379 = vst.msk [vmem:[#allocation2 + $0x20] sm:$0xff] %vm377_vm0, %v346_v19  ;;  %380 = vst.msk [vmem:[#allocation2 + $0x28] sm:$0xff] %vm377_vm0, %v347_v20  ;;  %7149 = vmatpush3.msra.mxu1 %v1088_v37  ;;  %7070 = vmatprep.subr.mxu0 %v1136_v43  ;;  %v1132_v57 = vld [vmem:[#allocation6 + $0x80] sm:$0xff]  ;;  %v1051_v60 = vmul.f32 %v8756_v55, %v1019_v56  ;;  %v361_v2 = vld [vmem:[%s8706_s17 + $0x80] sm:$0xff] }
  0x4d   : > { %381 = vst.msk [vmem:[#allocation2 + $0x30] sm:$0xff] %vm377_vm0, %v348_v22  ;;  %382 = vst.msk [vmem:[#allocation2 + $0x38] sm:$0xff] %vm377_vm0, %v349_v23  ;;  %7150 = vmatprep.subr.mxu1 %v1087_v44  ;;  %7071 = vmatpush3.msra.mxu0 %v1136_v43  ;;  %v1083_v58 = vld [vmem:[#allocation6] sm:$0xff]  ;;  %v1678_v3 = vld [vmem:[#allocation6 + $0x178] sm:$0xff] }
  0x4e   : > { %11317 = vst [vmem:[#allocation15_spill] sm:$0xff] %v8721_v28  ;;  %383 = vst.msk [vmem:[#allocation2 + $0x40] sm:$0xff] %vm377_vm0, %v350_v25  ;;  %7151 = vmatpush3.msra.mxu1 %v1087_v44  ;;  %7072 = vmatprep.subr.mxu0 %v1135_v46  ;;  %v1020_v1 = vld [vmem:[#allocation2 + $0xf] sm:$0xff]  ;;  %v364_v10 = vld [vmem:[%s8706_s17 + $0x98] sm:$0xff] }
  0x4f   : > { %384 = vst.msk [vmem:[#allocation2 + $0x48] sm:$0xff] %vm377_vm0, %v351_v26  ;;  %385 = vst.msk [vmem:[#allocation2 + $0x50] sm:$0xff] %vm377_vm0, %v352_v29  ;;  %7152 = vmatprep.subr.mxu1 %v1086_v47  ;;  %7073 = vmatpush3.msra.mxu0 %v1135_v46  ;;  %v362_v5 = vld [vmem:[%s8706_s17 + $0x88] sm:$0xff]  ;;  %v363_v9 = vld [vmem:[%s8706_s17 + $0x90] sm:$0xff]  ;;  %v531_v46 = vand.u32 15, %v423_v31 }
  0x50   : > { %386 = vst.msk [vmem:[#allocation2 + $0x58] sm:$0xff] %vm377_vm0, %v353_v30  ;;  %387 = vst.msk [vmem:[#allocation2 + $0x60] sm:$0xff] %vm377_vm0, %v354_v32  ;;  %7153 = vmatpush3.msra.mxu1 %v1086_v47  ;;  %7074 = vmatprep.subr.mxu0 %v1134_v49  ;;  %v1677_v12 = vld [vmem:[#allocation6 + $0x170] sm:$0xff]  ;;  %v2016_v17 = vld [vmem:[#allocation6 + $0x1f8] sm:$0xff]  ;;  %v517_v30 = vand.u32 15, %v421_v15  ;;  %v425_v47 = vadd.s32 112, %v8721_v28 }
  0x51   : > { %388 = vst.msk [vmem:[#allocation2 + $0x68] sm:$0xff] %vm377_vm0, %v355_v33  ;;  %11318 = vst [vmem:[#allocation16_spill] sm:$0xff] %v8736_v38  ;;  %7154 = vmatprep.subr.mxu1 %v1085_v50  ;;  %7075 = vmatpush3.msra.mxu0 %v1134_v49  ;;  %v365_v18 = vld [vmem:[%s8706_s17 + $0xa0] sm:$0xff]  ;;  %v366_v19 = vld [vmem:[%s8706_s17 + $0xa8] sm:$0xff]  ;;  %vm8851_vm7 = vcmp.ge.s32.totalorder %v531_v46, 1 }
  0x52   : > { %389 = vst.msk [vmem:[#allocation2 + $0x70] sm:$0xff] %vm377_vm0, %v356_v35  ;;  %390 = vst.msk [vmem:[#allocation2 + $0x78] sm:$0xff] %vm377_vm0, %v357_v36  ;;  %7155 = vmatpush3.msra.mxu1 %v1085_v50  ;;  %7076 = vmatprep.subr.mxu0 %v1133_v53  ;;  %v8763_v62 = vld [vmem:[#allocation2 + $0x17] sm:$0xff]  ;;  %v369_v32 = vld [vmem:[%s8706_s17 + $0xc0] sm:$0xff]  ;;  %vm8830_vm6 = vcmp.ge.s32.totalorder %v517_v30, 1  ;;  %v8871_v13 = vsel %vm8851_vm7, 1.0, %v8525_v0 }
  0x53   : > { %391 = vst.msk [vmem:[#allocation2 + $0x80] sm:$0xff] %vm377_vm0, %v358_v39  ;;  %392 = vst.msk [vmem:[#allocation2 + $0x88] sm:$0xff] %vm377_vm0, %v359_v40  ;;  %7156 = vmatprep.subr.mxu1 %v1084_v54  ;;  %7077 = vmatpush3.msra.mxu0 %v1133_v53  ;;  %v1101_v4 = vld [vmem:[#allocation2 + $0x18] sm:$0xff]  ;;  %v1053_v6 = vmul.f32 %v8761_v61, %v8763_v62  ;;  %v8774_v8 = vld [vmem:[#allocation2 + $0x27] sm:$0xff]  ;;  %v8821_v39 = vadd.s32 8, %v8721_v28 }
  0x54   : > { %393 = vst.msk [vmem:[#allocation2 + $0x90] sm:$0xff] %vm377_vm0, %v360_v42  ;;  %11319 = vst [vmem:[#allocation17_spill] sm:$0xff] %v8748_v45  ;;  %7157 = vmatpush3.msra.mxu1 %v1084_v54  ;;  %7078 = vmatprep.subr.mxu0 %v1132_v57  ;;  %v1102_v11 = vld [vmem:[#allocation2 + $0x20] sm:$0xff]  ;;  %v1055_v21 = vmul.f32 %v8772_v7, %v8774_v8  ;;  %v367_v22 = vld [vmem:[%s8706_s17 + $0xb0] sm:$0xff] }
  0x55   : > { %11320 = vst [vmem:[#allocation18_spill] sm:$0xff] %v8753_v52  ;;  %11321 = vst [vmem:[#allocation19_spill] sm:$0xff] %v8756_v55  ;;  %7158 = vmatprep.subr.mxu1 %v1083_v58  ;;  %7079 = vmatpush3.msra.mxu0 %v1132_v57  ;;  %v8789_v20 = vld [vmem:[#allocation2 + $0x1f] sm:$0xff]  ;;  %v1103_v23 = vld [vmem:[#allocation2 + $0x28] sm:$0xff]  ;;  %v454_v54 = vand.u32 15, %v8821_v39  ;;  %v8846_v57 = vsel %vm8830_vm6, 1.0, %v8525_v0 }
  0x56   : > { %394 = vst.msk [vmem:[#allocation2 + $0x98] sm:$0xff] %vm377_vm0, %v361_v2  ;;  %7159 = vmatpush3.msra.mxu1 %v1083_v58  ;;  %11322 = vst [vmem:[#allocation20_spill] sm:$0xff] %v8772_v7  ;;  %7160 = vmatprep.mubr.f32.mxu1 %v1051_v60  ;;  %v8801_v25 = vld [vmem:[#allocation2 + $0x37] sm:$0xff]  ;;  %v370_v33 = vld [vmem:[%s8706_s17 + $0xc8] sm:$0xff]  ;;  %v427_v2 = vadd.s32 128, %v8721_v28  ;;  %v9005_v52 = vadd.s32 40, %v8721_v28 }
  0x57   : > { %395 = vst.msk [vmem:[#allocation2 + $0xa0] sm:$0xff] %vm377_vm0, %v362_v5  ;;  %7081 = vmatmul.mubr.f32.vlgmr.msra.gmra.mxu0 %v8525_v0  ;;  %396 = vst.msk [vmem:[#allocation2 + $0xa8] sm:$0xff] %vm377_vm0, %v363_v9  ;;  %7161 = vmatmul.mubr.f32.vlgmr.msra.gmra.mxu1 %v1020_v1  ;;  %v368_v26 = vld [vmem:[%s8706_s17 + $0xb8] sm:$0xff]  ;;  %v1104_v34 = vld [vmem:[#allocation2 + $0x30] sm:$0xff]  ;;  %v1057_v37 = vmul.f32 %v8799_v24, %v8801_v25  ;;  %v545_v1 = vand.u32 15, %v425_v47  ;;  %vm8864_vm8 = vcmp.le.s32.totalorder %v454_v54, 14 }
  0x58   : > { %397 = vst.msk [vmem:[#allocation2 + $0xb0] sm:$0xff] %vm377_vm0, %v364_v10  ;;  %7208 = vmatprep.subr.mxu0 %v1678_v3  ;;  %7083 = vmatprep.mubr.f32.mxu0 %v1101_v4  ;;  %398 = vst.msk [vmem:[#allocation2 + $0xb8] sm:$0xff] %vm377_vm0, %v365_v18  ;;  %v1676_v27 = vld [vmem:[#allocation6 + $0x168] sm:$0xff]  ;;  %v2015_v35 = vld [vmem:[#allocation6 + $0x1f0] sm:$0xff]  ;;  %v559_v18 = vand.u32 15, %v427_v2  ;;  %v433_v54 = vadd.s32 176, %v8721_v28 }
  0x59   : > { %7209 = vmatpush3.msra.mxu0 %v1678_v3  ;;  %399 = vst.msk [vmem:[#allocation2 + $0xc0] sm:$0xff] %vm377_vm0, %v366_v19  ;;  %7163 = vmatprep.mubr.f32.mxu1 %v1053_v6  ;;  %11325 = vst [vmem:[#allocation21_spill] sm:$0xff] %v8799_v24  ;;  %v8816_v36 = vld [vmem:[#allocation2 + $0x2f] sm:$0xff]  ;;  %v1105_v40 = vld [vmem:[#allocation2 + $0x38] sm:$0xff]  ;;  %vm8877_vm9 = vcmp.ge.s32.totalorder %v545_v1, 1  ;;  %v429_v19 = vadd.s32 144, %v8721_v28 }
  0x5a   : > { %7210 = vmatprep.subr.mxu0 %v1677_v12  ;;  %400 = vst.msk [vmem:[#allocation2 + $0xc8] sm:$0xff] %vm377_vm0, %v367_v22  ;;  %7288 = vmatprep.subr.mxu1 %v2016_v17  ;;  %401 = vst.msk [vmem:[#allocation2 + $0xd0] sm:$0xff] %vm377_vm0, %v368_v26  ;;  %v8828_v42 = vld [vmem:[#allocation2 + $0x47] sm:$0xff]  ;;  %v1675_v43 = vld [vmem:[#allocation6 + $0x160] sm:$0xff]  ;;  %vm843_vm10 = vcmp.ge.s32.totalorder %v559_v18, 1 }
  0x5b   : > { %7084 = vmatmul.mubr.f32.gmra.mxu0 %v1102_v11  ;;  %7164 = vmatmul.mubr.f32.gmra.mxu1 %v8789_v20  ;;  %402 = vst.msk [vmem:[#allocation2 + $0xd8] sm:$0xff] %vm377_vm0, %v369_v32  ;;  %403 = vst.msk [vmem:[#allocation2 + $0xe0] sm:$0xff] %vm377_vm0, %v370_v33  ;;  %v371_v48 = vld [vmem:[%s8706_s17 + $0xd0] sm:$0xff]  ;;  %v1106_v49 = vld [vmem:[#allocation2 + $0x40] sm:$0xff]  ;;  %v1059_v53 = vmul.f32 %v8826_v41, %v8828_v42  ;;  %v8901_v32 = vsel %vm8877_vm9, 1.0, %v8525_v0 }
  0x5c   : > { %7211 = vmatpush3.msra.mxu0 %v1677_v12  ;;  %7086 = vmatprep.mubr.f32.mxu0 %v1103_v23  ;;  %11328 = vst [vmem:[#allocation22_spill] sm:$0xff] %v8821_v39  ;;  %11329 = vst [vmem:[#allocation23_spill] sm:$0xff] %v8826_v41  ;;  %v2014_v50 = vld [vmem:[#allocation6 + $0x1e8] sm:$0xff]  ;;  %v1107_v56 = vld [vmem:[#allocation2 + $0x48] sm:$0xff]  ;;  %v8886_v23 = vsel %vm8864_vm8, 1.0, %v8525_v0  ;;  %v9012_v39 = vadd.s32 56, %v8721_v28 }
  0x5d   : > { %7166 = vmatprep.mubr.f32.mxu1 %v1055_v21  ;;  %7212 = vmatprep.subr.mxu0 %v1676_v27  ;;  %404 = vst.msk [vmem:[#allocation2 + $0xe8] sm:$0xff] %vm377_vm0, %v371_v48  ;;  %v8838_v51 = vld [vmem:[#allocation2 + $0x3f] sm:$0xff]  ;;  %11332 = vst [vmem:[#allocation24_spill] sm:$0xff] %v8846_v57  ;;  %v8848_v58 = vld [vmem:[#allocation2 + $0x57] sm:$0xff]  ;;  %v8912_v48 = vsel %vm843_vm10, 1.0, %v8525_v0 }
  0x5e   : > { %7289 = vmatpush3.msra.mxu1 %v2016_v17  ;;  %7213 = vmatpush3.msra.mxu0 %v1676_v27  ;;  %v372_v59 = vld [vmem:[%s8706_s17 + $0xd8] sm:$0xff]  ;;  %v1674_v60 = vld [vmem:[#allocation6 + $0x158] sm:$0xff]  ;;  %v1108_v3 = vld [vmem:[#allocation2 + $0x50] sm:$0xff]  ;;  %v1061_v6 = vmul.f32 %v8846_v57, %v8848_v58  ;;  %11337 = vst [vmem:[#allocation25_spill] sm:$0xff] %v8871_v13 }
  0x5f   : > { %7087 = vmatmul.mubr.f32.gmra.mxu0 %v1104_v34  ;;  %7290 = vmatprep.subr.mxu1 %v2015_v35  ;;  %405 = vst.msk [vmem:[#allocation2 + $0xf0] sm:$0xff] %vm377_vm0, %v372_v59  ;;  %v2013_v4 = vld [vmem:[#allocation6 + $0x1e0] sm:$0xff]  ;;  %v373_v9 = vld [vmem:[%s8706_s17 + $0xe0] sm:$0xff]  ;;  %v374_v10 = vld [vmem:[%s8706_s17 + $0xe8] sm:$0xff] }
  0x60   : > { %7167 = vmatmul.mubr.f32.gmra.mxu1 %v8816_v36  ;;  %7089 = vmatprep.mubr.f32.mxu0 %v1105_v40  ;;  %v8858_v5 = vld [vmem:[#allocation2 + $0x4f] sm:$0xff]  ;;  %v1109_v12 = vld [vmem:[#allocation2 + $0x58] sm:$0xff]  ;;  %v8873_v14 = vld [vmem:[#allocation2 + $0x67] sm:$0xff]  ;;  %406 = vst.msk [vmem:[#allocation2 + $0xf8] sm:$0xff] %vm377_vm0, %v373_v9  ;;  %v435_v9 = vadd.s32 192, %v8721_v28 }
  0x61   : > { %7169 = vmatprep.mubr.f32.mxu1 %v1057_v37  ;;  %7214 = vmatprep.subr.mxu0 %v1675_v43  ;;  %407 = vst.msk [vmem:[#allocation2 + $0x100] sm:$0xff] %vm377_vm0, %v374_v10  ;;  %v1673_v15 = vld [vmem:[#allocation6 + $0x150] sm:$0xff]  ;;  %v2012_v22 = vld [vmem:[#allocation6 + $0x1d8] sm:$0xff]  ;;  %v8888_v26 = vld [vmem:[#allocation2 + $0x31] sm:$0xff]  ;;  %v1063_v29 = vmul.f32 %v8871_v13, %v8873_v14  ;;  %v431_v37 = vadd.s32 160, %v8721_v28 }
  0x62   : > { %7291 = vmatpush3.msra.mxu1 %v2015_v35  ;;  %7215 = vmatpush3.msra.mxu0 %v1675_v43  ;;  %v1110_v21 = vld [vmem:[#allocation2 + $0x60] sm:$0xff]  ;;  %v8896_v30 = vmul.f32 %v8886_v23, %v8888_v26  ;;  %v1111_v31 = vld [vmem:[#allocation2 + $0x68] sm:$0xff]  ;;  %11341 = vst [vmem:[#allocation27_spill] sm:$0xff] %v8901_v32  ;;  %v8903_v33 = vld [vmem:[#allocation2 + $0x77] sm:$0xff]  ;;  %v573_v35 = vand.u32 15, %v429_v19 }
  0x63   : > { %7090 = vmatmul.mubr.f32.gmra.mxu0 %v1106_v49  ;;  %7292 = vmatprep.subr.mxu1 %v2014_v50  ;;  %v8890_v27 = vld [vmem:[#allocation2 + $0x5f] sm:$0xff]  ;;  %v1112_v40 = vld [vmem:[#allocation2 + $0x70] sm:$0xff]  ;;  %v1065_v46 = vmul.f32 %v8901_v32, %v8903_v33  ;;  %11342 = vst [vmem:[#allocation28_spill] sm:$0xff] %v8912_v48  ;;  %v8914_v49 = vld [vmem:[#allocation2 + $0x87] sm:$0xff] }
  0x64   : > { %7170 = vmatmul.mubr.f32.gmra.mxu1 %v8838_v51  ;;  %7092 = vmatprep.mubr.f32.mxu0 %v1107_v56  ;;  %11340 = vst [vmem:[#allocation26_spill] sm:$0xff] %v8896_v30  ;;  %v1672_v34 = vld [vmem:[#allocation6 + $0x148] sm:$0xff]  ;;  %v2011_v43 = vld [vmem:[#allocation6 + $0x1d0] sm:$0xff]  ;;  %v8907_v44 = vld [vmem:[#allocation2 + $0x6f] sm:$0xff]  ;;  %vm845_vm11 = vcmp.ge.s32.totalorder %v573_v35, 1  ;;  %v1067_v63 = vmul.f32 %v8912_v48, %v8914_v49 }
  0x65   : > { %7172 = vmatprep.mubr.f32.mxu1 %v1059_v53  ;;  %7216 = vmatprep.subr.mxu0 %v1674_v60  ;;  %v1113_v47 = vld [vmem:[#allocation2 + $0x78] sm:$0xff]  ;;  %v587_v53 = vand.u32 15, %v431_v37  ;;  %v1114_v56 = vld [vmem:[#allocation2 + $0x80] sm:$0xff]  ;;  %v1115_v1 = vld [vmem:[#allocation2 + $0x88] sm:$0xff]  ;;  %v8923_v2 = vsel %vm845_vm11, 1.0, %v8525_v0  ;;  %11347 = vst [vmem:[#allocation33_spill] sm:$0xff] %v9005_v52 }
  0x66   : > { %7293 = vmatpush3.msra.mxu1 %v2014_v50  ;;  %7217 = vmatpush3.msra.mxu0 %v1674_v60  ;;  %v1671_v50 = vld [vmem:[#allocation6 + $0x140] sm:$0xff]  ;;  %v2010_v59 = vld [vmem:[#allocation6 + $0x1c8] sm:$0xff]  ;;  %11343 = vst [vmem:[#allocation29_spill] sm:$0xff] %v8923_v2  ;;  %v8936_v19 = vld [vmem:[#allocation2 + $0xa7] sm:$0xff] }
  0x67   : > { %7093 = vmatmul.mubr.f32.gmra.mxu0 %v1108_v3  ;;  %7294 = vmatprep.subr.mxu1 %v2013_v4  ;;  %v8918_v60 = vld [vmem:[#allocation2 + $0x7f] sm:$0xff]  ;;  %v8925_v3 = vld [vmem:[#allocation2 + $0x97] sm:$0xff]  ;;  %vm847_vm12 = vcmp.ge.s32.totalorder %v587_v53, 1  ;;  %v439_v53 = vadd.s32 224, %v8721_v28  ;;  %v8999_v16 = vld [vmem:[#allocation2 + $0xef] sm:$0xff]  ;;  %11348 = vst [vmem:[#allocation34_spill] sm:$0xff] %v9012_v39 }
  0x68   : > { %7173 = vmatmul.mubr.f32.gmra.mxu1 %v8858_v5  ;;  %7095 = vmatprep.mubr.f32.mxu0 %v1109_v12  ;;  %v1116_v10 = vld [vmem:[#allocation2 + $0x90] sm:$0xff]  ;;  %v1117_v17 = vld [vmem:[#allocation2 + $0x98] sm:$0xff]  ;;  %v8934_v18 = vsel %vm847_vm12, 1.0, %v8525_v0  ;;  %v2322_v30 = vld [vmem:[#allocation6 + $0x278] sm:$0xff] }
  0x69   : > { %7175 = vmatprep.mubr.f32.mxu1 %v1061_v6  ;;  %7218 = vmatprep.subr.mxu0 %v1673_v15  ;;  %v601_v6 = vand.u32 15, %v433_v54  ;;  %v2009_v11 = vld [vmem:[#allocation6 + $0x1c0] sm:$0xff]  ;;  %11344 = vst [vmem:[#allocation30_spill] sm:$0xff] %v8934_v18  ;;  %v8940_v35 = vld [vmem:[#allocation2 + $0x9f] sm:$0xff]  ;;  %v1071_v37 = vmul.f32 %v8934_v18, %v8936_v19 }
  0x6a   : > { %7295 = vmatpush3.msra.mxu1 %v2013_v4  ;;  %7219 = vmatpush3.msra.mxu0 %v1673_v15  ;;  %v1670_v4 = vld [vmem:[#allocation6 + $0x138] sm:$0xff]  ;;  %v1069_v15 = vmul.f32 %v8923_v2, %v8925_v3  ;;  %v1120_v54 = vld [vmem:[#allocation2 + $0xb0] sm:$0xff]  ;;  %v9008_v38 = vld [vmem:[#allocation2 + $0xff] sm:$0xff] }
  0x6b   : > { %7096 = vmatmul.mubr.f32.gmra.mxu0 %v1110_v21  ;;  %7296 = vmatprep.subr.mxu1 %v2012_v22  ;;  %v8929_v12 = vld [vmem:[#allocation2 + $0x8f] sm:$0xff]  ;;  %v1669_v21 = vld [vmem:[#allocation6 + $0x130] sm:$0xff]  ;;  %vm849_vm13 = vcmp.ge.s32.totalorder %v601_v6, 1 }
  0x6c   : > { %7176 = vmatmul.mubr.f32.gmra.mxu1 %v8890_v27  ;;  %7098 = vmatprep.mubr.f32.mxu0 %v1111_v31  ;;  %v1118_v31 = vld [vmem:[#allocation2 + $0xa0] sm:$0xff]  ;;  %v1663_v45 = vld [vmem:[#allocation6 + $0x100] sm:$0xff] }
  0x6d   : > { %7178 = vmatprep.mubr.f32.mxu1 %v1063_v29  ;;  %7220 = vmatprep.subr.mxu0 %v1672_v34  ;;  %v437_v29 = vadd.s32 208, %v8721_v28 }
  0x6e   : > { %7297 = vmatpush3.msra.mxu1 %v2012_v22  ;;  %7221 = vmatpush3.msra.mxu0 %v1672_v34  ;;  %v615_v22 = vand.u32 15, %v435_v9  ;;  %v2008_v34 = vld [vmem:[#allocation6 + $0x1b8] sm:$0xff] }
  0x6f   : > { %7099 = vmatmul.mubr.f32.gmra.mxu0 %v1112_v40  ;;  %7298 = vmatprep.subr.mxu1 %v2011_v43  ;;  %v1119_v40 = vld [vmem:[#allocation2 + $0xa8] sm:$0xff] }
  0x70   : > { %7179 = vmatmul.mubr.f32.gmra.mxu1 %v8907_v44  ;;  %7101 = vmatprep.mubr.f32.mxu0 %v1113_v47  ;;  %v1668_v47 = vld [vmem:[#allocation6 + $0x128] sm:$0xff]  ;;  %vm851_vm14 = vcmp.ge.s32.totalorder %v615_v22, 1  ;;  %v8959_v9 = vld [vmem:[#allocation2 + $0xc7] sm:$0xff] }
  0x71   : > { %7181 = vmatprep.mubr.f32.mxu1 %v1065_v46  ;;  %7222 = vmatprep.subr.mxu0 %v1671_v50  ;;  %v8947_v46 = vld [vmem:[#allocation2 + $0xb7] sm:$0xff]  ;;  %v8957_v6 = vsel %vm851_vm14, 1.0, %v8525_v0 }
  0x72   : > { %7299 = vmatpush3.msra.mxu1 %v2011_v43  ;;  %7223 = vmatpush3.msra.mxu0 %v1671_v50  ;;  %v8945_v43 = vsel %vm849_vm13, 1.0, %v8525_v0  ;;  %v629_v50 = vand.u32 15, %v437_v29  ;;  %v2006_v22 = vld [vmem:[#allocation6 + $0x1a8] sm:$0xff] }
  0x73   : > { %7102 = vmatmul.mubr.f32.gmra.mxu0 %v1114_v56  ;;  %7300 = vmatprep.subr.mxu1 %v2010_v59  ;;  %11345 = vst [vmem:[#allocation31_spill] sm:$0xff] %v8945_v43  ;;  %v2007_v56 = vld [vmem:[#allocation6 + $0x1b0] sm:$0xff] }
  0x74   : > { %7182 = vmatmul.mubr.f32.gmra.mxu1 %v8918_v60  ;;  %7104 = vmatprep.mubr.f32.mxu0 %v1115_v1  ;;  %v375_v1 = vld [vmem:[%s8706_s17 + $0xf0] sm:$0xff]  ;;  %vm853_vm15 = vcmp.ge.s32.totalorder %v629_v50, 1  ;;  %v8966_v29 = vld [vmem:[#allocation2 + $0xbf] sm:$0xff]  ;;  %v1666_v50 = vld [vmem:[#allocation6 + $0x118] sm:$0xff] }
  0x75   : > { %7184 = vmatprep.mubr.f32.mxu1 %v1067_v63  ;;  %7224 = vmatprep.subr.mxu0 %v1670_v4  ;;  %v1073_v63 = vmul.f32 %v8945_v43, %v8947_v46  ;;  %408 = vst.msk [vmem:[#allocation2 + $0x108] sm:$0xff] %vm377_vm0, %v375_v1 }
  0x76   : > { %7301 = vmatpush3.msra.mxu1 %v2010_v59  ;;  %7225 = vmatpush3.msra.mxu0 %v1670_v4  ;;  %v8951_v59 = vld [vmem:[#allocation2 + $0xaf] sm:$0xff]  ;;  %v1121_v4 = vld [vmem:[#allocation2 + $0xb8] sm:$0xff] }
  0x77   : > { %7105 = vmatmul.mubr.f32.gmra.mxu0 %v1116_v10  ;;  %7302 = vmatprep.subr.mxu1 %v2009_v11  ;;  %v376_v10 = vld [vmem:[%s8706_s17 + $0xf8] sm:$0xff]  ;;  %s6399_s17 = sshll.u32 %s8590_s28, 10  ;;  %s8451_s28 = scalar_lea.vmem %s11217_s18, 1024 }
  0x78   : > { %7185 = vmatmul.mubr.f32.gmra.mxu1 %v8929_v12  ;;  %7107 = vmatprep.mubr.f32.mxu0 %v1117_v17  ;;  %v441_v17 = vadd.s32 240, %v8721_v28  ;;  %409 = vst.msk [vmem:[#allocation2 + $0x110] sm:$0xff] %vm377_vm0, %v376_v10  ;;  %v8983_v10 = vld [vmem:[#allocation2 + $0xe7] sm:$0xff]  ;;  %p8452_p10 = scmp.ne.s32.totalorder %s11217_s18, %s8451_s28  ;;  %p8459_p0 = scmp.lt.s32.totalorder %s8457_s8, %s8451_s28 }
  0x79   : > { %7187 = vmatprep.mubr.f32.mxu1 %v1069_v15  ;;  %7226 = vmatprep.subr.mxu0 %v1669_v21  ;;  %v643_v15 = vand.u32 15, %v439_v53  ;;  %v1124_v53 = vld [vmem:[#allocation2 + $0xd0] sm:$0xff] }
  0x7a   : > { %7303 = vmatpush3.msra.mxu1 %v2009_v11  ;;  %7227 = vmatpush3.msra.mxu0 %v1669_v21  ;;  %v1667_v11 = vld [vmem:[#allocation6 + $0x120] sm:$0xff]  ;;  %v1122_v21 = vld [vmem:[#allocation2 + $0xc0] sm:$0xff]  ;;  %p8453_p12 = pnand %p8452_p10, %p8607_p5  ;;  %p8460_p1 = por %p8459_p0, %p8458_p11 }
  0x7b   : > { %7108 = vmatmul.mubr.f32.gmra.mxu0 %v1118_v31  ;;  %7304 = vmatprep.subr.mxu1 %v2008_v34  ;;  %v1075_v31 = vmul.f32 %v8957_v6, %v8959_v9  ;;  %vm855_vm0 = vcmp.ge.s32.totalorder %v643_v15, 1  ;;  %v1665_v15 = vld [vmem:[#allocation6 + $0x110] sm:$0xff] }
  0x7c   : > { %7188 = vmatmul.mubr.f32.gmra.mxu1 %v8940_v35  ;;  %7110 = vmatprep.mubr.f32.mxu0 %v1119_v40  ;;  %v8973_v40 = vld [vmem:[#allocation2 + $0xd7] sm:$0xff]  ;;  %p8454_p8 = pneg %p8453_p12 }
  0x7d   : > { %7190 = vmatprep.mubr.f32.mxu1 %v1071_v37  ;;  %7228 = vmatprep.subr.mxu0 %v1668_v47  ;;  %v8971_v37 = vsel %vm853_vm15, 1.0, %v8525_v0 }
  0x7e   : > { %7305 = vmatpush3.msra.mxu1 %v2008_v34  ;;  %7229 = vmatpush3.msra.mxu0 %v1668_v47  ;;  %v1123_v34 = vld [vmem:[#allocation2 + $0xc8] sm:$0xff]  ;;  %v657_v47 = vand.u32 15, %v441_v17  ;;  %v1077_v1 = vmul.f32 %v8971_v37, %v8973_v40  ;;  %p8461_p3 = pnand %p8460_p1, %p8454_p8 }
  0x7f   : > { %7111 = vmatmul.mubr.f32.gmra.mxu0 %v1120_v54  ;;  %7306 = vmatprep.subr.mxu1 %v2007_v56  ;;  %v2005_v54 = vld [vmem:[#allocation6 + $0x1a0] sm:$0xff]  ;;  %v2004_v17 = vld [vmem:[#allocation6 + $0x198] sm:$0xff] }
  0x80   : > { %7191 = vmatmul.mubr.f32.gmra.mxu1 %v8951_v59  ;;  %7113 = vmatprep.mubr.f32.mxu0 %v1121_v4  ;;  %v1125_v4 = vld [vmem:[#allocation2 + $0xd8] sm:$0xff]  ;;  %vm857_vm1 = vcmp.ge.s32.totalorder %v657_v47, 1 }
  0x81   : > { %7193 = vmatprep.mubr.f32.mxu1 %v1073_v63  ;;  %7230 = vmatprep.subr.mxu0 %v1667_v11  ;;  %v8976_v63 = vld [vmem:[#allocation2 + $0xcf] sm:$0xff]  ;;  %v8994_v47 = vsel %vm857_vm1, 1.0, %v8525_v0 }
  0x82   : > { %7307 = vmatpush3.msra.mxu1 %v2007_v56  ;;  %7231 = vmatpush3.msra.mxu0 %v1667_v11  ;;  %v8981_v56 = vsel %vm855_vm0, 1.0, %v8525_v0  ;;  %v1126_v11 = vld [vmem:[#allocation2 + $0xe0] sm:$0xff] }
  0x83   : > { %7114 = vmatmul.mubr.f32.gmra.mxu0 %v1122_v21  ;;  %7308 = vmatprep.subr.mxu1 %v2006_v22  ;;  %v8986_v21 = vld [vmem:[#allocation2 + $0xdf] sm:$0xff] }
  0x84   : > { %7194 = vmatmul.mubr.f32.gmra.mxu1 %v8966_v29  ;;  %7116 = vmatprep.mubr.f32.mxu0 %v1123_v34  ;;  %v8991_v34 = vadd.s32 24, %v8721_v28 }
  0x85   : > { %7196 = vmatprep.mubr.f32.mxu1 %v1075_v31  ;;  %7232 = vmatprep.subr.mxu0 %v1666_v50  ;;  %v1079_v31 = vmul.f32 %v8981_v56, %v8983_v10 }
  0x86   : > { %7309 = vmatpush3.msra.mxu1 %v2006_v22  ;;  %7233 = vmatpush3.msra.mxu0 %v1666_v50  ;;  %11346 = vst [vmem:[#allocation32_spill] sm:$0xff] %v8991_v34  ;;  %v1127_v22 = vld [vmem:[#allocation2 + $0xe8] sm:$0xff]  ;;  %v1664_v50 = vld [vmem:[#allocation6 + $0x108] sm:$0xff]  ;;  %v468_v0 = vand.u32 15, %v8991_v34  ;;  %v482_v34 = vand.u32 15, %v9005_v52 }
  0x87   : > { %7117 = vmatmul.mubr.f32.gmra.mxu0 %v1124_v53  ;;  %7310 = vmatprep.subr.mxu1 %v2005_v54  ;;  %v8996_v53 = vld [vmem:[#allocation2 + $0xf7] sm:$0xff]  ;;  %v9023_v52 = vld [vmem:[#allocation2 + $0x21] sm:$0xff] }
  0x88   : > { %7197 = vmatmul.mubr.f32.gmra.mxu1 %v8976_v63  ;;  %7119 = vmatprep.mubr.f32.mxu0 %v1125_v4  ;;  %v2003_v4 = vld [vmem:[#allocation6 + $0x190] sm:$0xff]  ;;  %vm926_vm2 = vcmp.le.s32.totalorder %v468_v0, 14  ;;  %v9018_v0 = vld [vmem:[#allocation2 + $0x8] sm:$0xff]  ;;  %vm928_vm3 = vcmp.le.s32.totalorder %v482_v34, 14 }
  0x89   : > { %7199 = vmatprep.mubr.f32.mxu1 %v1077_v1  ;;  %7234 = vmatprep.subr.mxu0 %v1665_v15  ;;  %v1128_v1 = vld [vmem:[#allocation2 + $0xf0] sm:$0xff]  ;;  %v9034_v34 = vsel %vm928_vm3, 1.0, %v9018_v0 }
  0x8a   : > { %7311 = vmatpush3.msra.mxu1 %v2005_v54  ;;  %7235 = vmatpush3.msra.mxu0 %v1665_v15  ;;  %v1081_v54 = vmul.f32 %v8994_v47, %v8996_v53  ;;  %v1130_v15 = vld [vmem:[#allocation2 + $0x100] sm:$0xff] }
  0x8b   : > { %7120 = vmatmul.mubr.f32.gmra.mxu0 %v1126_v11  ;;  %7312 = vmatprep.subr.mxu1 %v2004_v17  ;;  %v1129_v11 = vld [vmem:[#allocation2 + $0xf8] sm:$0xff] }
  0x8c   : > { %7200 = vmatmul.mubr.f32.gmra.mxu1 %v8986_v21  ;;  %7122 = vmatprep.mubr.f32.mxu0 %v1127_v22  ;;  %v1599_v22 = vld [vmem:[#allocation2 + $0x11] sm:$0xff] }
  0x8d   : > { %7202 = vmatprep.mubr.f32.mxu1 %v1079_v31  ;;  %7236 = vmatprep.subr.mxu0 %v1664_v50  ;;  %v2002_v31 = vld [vmem:[#allocation6 + $0x188] sm:$0xff] }
  0x8e   : > { %7313 = vmatpush3.msra.mxu1 %v2004_v17  ;;  %7237 = vmatpush3.msra.mxu0 %v1664_v50  ;;  %v1598_v17 = vld [vmem:[#allocation2 + $0x9] sm:$0xff]  ;;  %v1631_v50 = vmul.f32 %v8886_v23, %v1599_v22 }
  0x8f   : > { %7123 = vmatmul.mubr.f32.gmra.mxu0 %v1128_v1  ;;  %7314 = vmatprep.subr.mxu1 %v2003_v4  ;;  %v2001_v1 = vld [vmem:[#allocation6 + $0x180] sm:$0xff] }
  0x90   : > { %7203 = vmatmul.mubr.f32.gmra.mxu1 %v8999_v16  ;;  %7125 = vmatprep.mubr.f32.mxu0 %v1129_v11  ;;  %v9021_v11 = vsel %vm926_vm2, 1.0, %v9018_v0 }
  0x91   : > { %7205 = vmatprep.mubr.f32.mxu1 %v1081_v54  ;;  %7238 = vmatprep.subr.mxu0 %v1663_v45  ;;  %v1968_v54 = vmul.f32 %v8756_v55, %v8763_v62  ;;  %v1970_v62 = vmul.f32 %v8761_v61, %v8774_v8  ;;  %v1633_v22 = vmul.f32 %v9021_v11, %v9023_v52  ;;  %v2321_v55 = vld [vmem:[#allocation6 + $0x270] sm:$0xff] }
  0x92   : > { %7315 = vmatpush3.msra.mxu1 %v2003_v4  ;;  %7239 = vmatpush3.msra.mxu0 %v1663_v45  ;;  %v496_v4 = vand.u32 15, %v9012_v39  ;;  %v9027_v45 = vld [vmem:[#allocation2 + $0x19] sm:$0xff]  ;;  %v2318_v39 = vld [vmem:[#allocation6 + $0x258] sm:$0xff] }
  0x93   : > { %7126 = vmatmul.mubr.f32.gmra.mxu0 %v1130_v15  ;;  %7316 = vmatprep.subr.mxu1 %v2002_v31  ;;  %v420_v15 = vadd.s32 72, %v8721_v28 }
  0x94   : > { %7206 = vmatmul.mubr.f32.gmra.mxu1 %v9008_v38  ;;  %7240 = vmatprep.mubr.f32.mxu0 %v1598_v17  ;;  %v9040_v17 = vld [vmem:[#allocation2 + $0x29] sm:$0xff]  ;;  %vm930_vm4 = vcmp.le.s32.totalorder %v496_v4, 14  ;;  %v9052_v4 = vld [vmem:[#allocation2 + $0x41] sm:$0xff] }
  0x95   : > { %7317 = vmatpush3.msra.mxu1 %v2002_v31  ;;  %7368 = vmatprep.subr.mxu0 %v2322_v30  ;;  %v9036_v31 = vld [vmem:[#allocation6 + $0x2f8] sm:$0xff]  ;;  %v510_v8 = vand.u32 15, %v420_v15  ;;  %v2319_v15 = vld [vmem:[#allocation6 + $0x260] sm:$0xff] }
  0x96   : > { %7318 = vmatprep.subr.mxu1 %v2001_v1  ;;  %7320 = vmatprep.mubr.f32.mxu1 %v1968_v54  ;;  %v1635_v54 = vmul.f32 %v9034_v34, %v8888_v26 }
  0x97   : > { %7241 = vmatmul.mubr.f32.vlgmr.msra.gmra.mxu0 %v1631_v50  ;;  %7319 = vmatpush3.msra.mxu1 %v2001_v1  ;;  %v422_v50 = vadd.s32 88, %v8721_v28  ;;  %v2320_v1 = vld [vmem:[#allocation6 + $0x268] sm:$0xff]  ;;  %vm932_vm5 = vcmp.le.s32.totalorder %v510_v8, 14 }
  0x98   : > { %7369 = vmatpush3.msra.mxu0 %v2322_v30  ;;  %7321 = vmatmul.mubr.f32.vlgmr.msra.gmra.mxu1 %v8789_v20  ;;  %v1972_v30 = vmul.f32 %v8772_v7, %v8801_v25  ;;  %v9050_v20 = vsel %vm930_vm4, 1.0, %v9018_v0  ;;  %v9066_v8 = vld [vmem:[#allocation2 + $0x51] sm:$0xff] }
  0x99   : > { %7243 = vmatprep.mubr.f32.mxu0 %v9027_v45  ;;  %7370 = vmatprep.subr.mxu0 %v2321_v55  ;;  %v524_v25 = vand.u32 15, %v422_v50  ;;  %v1637_v7 = vmul.f32 %v9050_v20, %v9052_v4  ;;  %v2317_v50 = vld [vmem:[#allocation6 + $0x250] sm:$0xff] }
  0x9a   : > { %7323 = vmatprep.mubr.f32.mxu1 %v1970_v62  ;;  %7448 = vmatprep.subr.mxu1 %v9036_v31  ;;  %v9055_v62 = vld [vmem:[#allocation2 + $0x39] sm:$0xff] }
  0x9b   : > { %7244 = vmatmul.mubr.f32.gmra.mxu0 %v1633_v22  ;;  %v424_v22 = vadd.s32 104, %v8721_v28  ;;  %vm934_vm6 = vcmp.le.s32.totalorder %v524_v25, 14  ;;  %v9080_v25 = vld [vmem:[#allocation2 + $0x61] sm:$0xff]  ;;  %7449 = vmatpush3.msra.mxu1 %v9036_v31  ;;  %v1982_v31 = vmul.f32 %v8901_v32, %v8914_v49 }
  0x9c   : > { %7371 = vmatpush3.msra.mxu0 %v2321_v55  ;;  %7246 = vmatprep.mubr.f32.mxu0 %v9040_v17  ;;  %v1974_v55 = vmul.f32 %v8799_v24, %v8828_v42 }
  0x9d   : > { %7324 = vmatmul.mubr.f32.gmra.mxu1 %v8816_v36  ;;  %7372 = vmatprep.subr.mxu0 %v2320_v1  ;;  %v9064_v36 = vsel %vm932_vm5, 1.0, %v9018_v0  ;;  %v538_v42 = vand.u32 15, %v424_v22  ;;  %v2315_v22 = vld [vmem:[#allocation6 + $0x240] sm:$0xff] }
  0x9e   : > { %7326 = vmatprep.mubr.f32.mxu1 %v1972_v30  ;;  %7373 = vmatpush3.msra.mxu0 %v2320_v1  ;;  %v9069_v1 = vld [vmem:[#allocation2 + $0x49] sm:$0xff]  ;;  %v426_v30 = vadd.s32 120, %v8721_v28  ;;  %v1639_v24 = vmul.f32 %v9064_v36, %v9066_v8 }
  0x9f   : > { %7247 = vmatmul.mubr.f32.gmra.mxu0 %v1635_v54  ;;  %7374 = vmatprep.subr.mxu0 %v2319_v15  ;;  %v1976_v54 = vmul.f32 %v8826_v41, %v8848_v58  ;;  %vm936_vm7 = vcmp.le.s32.totalorder %v538_v42, 14  ;;  %v1978_v58 = vmul.f32 %v8846_v57, %v8873_v14  ;;  %v2314_v41 = vld [vmem:[#allocation6 + $0x238] sm:$0xff]  ;;  %v9094_v42 = vld [vmem:[#allocation2 + $0x71] sm:$0xff]  ;;  %v2659_v57 = vld [vmem:[#allocation6 + $0x2f0] sm:$0xff] }
  0xa0   : > { %7249 = vmatprep.mubr.f32.mxu0 %v9055_v62  ;;  %7375 = vmatpush3.msra.mxu0 %v2319_v15  ;;  %v2316_v15 = vld [vmem:[#allocation6 + $0x248] sm:$0xff] }
  0xa1   : > { %7327 = vmatmul.mubr.f32.gmra.mxu1 %v8838_v51  ;;  %7376 = vmatprep.subr.mxu0 %v2318_v39  ;;  %v9078_v51 = vsel %vm934_vm6, 1.0, %v9018_v0 }
  0xa2   : > { %7329 = vmatprep.mubr.f32.mxu1 %v1974_v55  ;;  %7377 = vmatpush3.msra.mxu0 %v2318_v39  ;;  %v9083_v55 = vld [vmem:[#allocation2 + $0x59] sm:$0xff]  ;;  %v428_v39 = vadd.s32 136, %v8721_v28 }
  0xa3   : > { %7250 = vmatmul.mubr.f32.gmra.mxu0 %v1637_v7  ;;  %7378 = vmatprep.subr.mxu0 %v2317_v50  ;;  %v552_v7 = vand.u32 15, %v426_v30  ;;  %v9097_v30 = vld [vmem:[#allocation2 + $0x69] sm:$0xff] }
  0xa4   : > { %7252 = vmatprep.mubr.f32.mxu0 %v9069_v1  ;;  %7379 = vmatpush3.msra.mxu0 %v2317_v50  ;;  %v1641_v50 = vmul.f32 %v9078_v51, %v9080_v25  ;;  %v566_v14 = vand.u32 15, %v428_v39  ;;  %v9112_v39 = vld [vmem:[#allocation2 + $0x79] sm:$0xff] }
  0xa5   : > { %7330 = vmatmul.mubr.f32.gmra.mxu1 %v8858_v5  ;;  %7380 = vmatprep.subr.mxu0 %v2316_v15  ;;  %v9092_v5 = vsel %vm936_vm7, 1.0, %v9018_v0  ;;  %vm938_vm8 = vcmp.le.s32.totalorder %v552_v7, 14  ;;  %v9109_v7 = vld [vmem:[#allocation2 + $0x81] sm:$0xff] }
  0xa6   : > { %7332 = vmatprep.mubr.f32.mxu1 %v1976_v54  ;;  %7381 = vmatpush3.msra.mxu0 %v2316_v15  ;;  %v2313_v54 = vld [vmem:[#allocation6 + $0x230] sm:$0xff]  ;;  %v1980_v15 = vmul.f32 %v8871_v13, %v8903_v33  ;;  %vm940_vm9 = vcmp.le.s32.totalorder %v566_v14, 14  ;;  %v2658_v33 = vld [vmem:[#allocation6 + $0x2e8] sm:$0xff] }
  0xa7   : > { %7253 = vmatmul.mubr.f32.gmra.mxu0 %v1639_v24  ;;  %7382 = vmatprep.subr.mxu0 %v2315_v22  ;;  %v430_v24 = vadd.s32 152, %v8721_v28  ;;  %v9123_v14 = vld [vmem:[#allocation2 + $0x91] sm:$0xff] }
  0xa8   : > { %7255 = vmatprep.mubr.f32.mxu0 %v9083_v55  ;;  %7383 = vmatpush3.msra.mxu0 %v2315_v22  ;;  %v1643_v22 = vmul.f32 %v9092_v5, %v9094_v42 }
  0xa9   : > { %7333 = vmatmul.mubr.f32.gmra.mxu1 %v8890_v27  ;;  %7384 = vmatprep.subr.mxu0 %v2314_v41  ;;  %v9107_v27 = vsel %vm938_vm8, 1.0, %v9018_v0 }
  0xaa   : > { %7335 = vmatprep.mubr.f32.mxu1 %v1978_v58  ;;  %7385 = vmatpush3.msra.mxu0 %v2314_v41  ;;  %v580_v41 = vand.u32 15, %v430_v24  ;;  %v432_v58 = vadd.s32 168, %v8721_v28  ;;  %v1645_v13 = vmul.f32 %v9107_v27, %v9109_v7  ;;  %v2657_v24 = vld [vmem:[#allocation6 + $0x2e0] sm:$0xff] }
  0xab   : > { %7256 = vmatmul.mubr.f32.gmra.mxu0 %v1641_v50  ;;  %7386 = vmatprep.subr.mxu0 %v2313_v54  ;;  %v2312_v50 = vld [vmem:[#allocation6 + $0x228] sm:$0xff] }
  0xac   : > { %7258 = vmatprep.mubr.f32.mxu0 %v9097_v30  ;;  %7450 = vmatprep.subr.mxu1 %v2659_v57  ;;  %vm942_vm10 = vcmp.le.s32.totalorder %v580_v41, 14  ;;  %v594_v49 = vand.u32 15, %v432_v58  ;;  %v9137_v41 = vld [vmem:[#allocation2 + $0xa1] sm:$0xff] }
  0xad   : > { %7336 = vmatmul.mubr.f32.gmra.mxu1 %v8907_v44  ;;  %7387 = vmatpush3.msra.mxu0 %v2313_v54  ;;  %v9121_v44 = vsel %vm940_vm9, 1.0, %v9018_v0  ;;  %v434_v54 = vadd.s32 184, %v8721_v28  ;;  %v2656_v58 = vld [vmem:[#allocation6 + $0x2d8] sm:$0xff] }
  0xae   : > { %7338 = vmatprep.mubr.f32.mxu1 %v1980_v15  ;;  %7451 = vmatpush3.msra.mxu1 %v2659_v57  ;;  %v9126_v15 = vld [vmem:[#allocation2 + $0x89] sm:$0xff]  ;;  %v1984_v57 = vmul.f32 %v8912_v48, %v8925_v3  ;;  %v1647_v32 = vmul.f32 %v9121_v44, %v9123_v14  ;;  %vm944_vm11 = vcmp.le.s32.totalorder %v594_v49, 14  ;;  %v2655_v48 = vld [vmem:[#allocation6 + $0x2d0] sm:$0xff]  ;;  %v9151_v49 = vld [vmem:[#allocation2 + $0xb1] sm:$0xff] }
  0xaf   : > { %7259 = vmatmul.mubr.f32.gmra.mxu0 %v1643_v22  ;;  %7452 = vmatprep.subr.mxu1 %v2658_v33  ;;  %v2311_v22 = vld [vmem:[#allocation6 + $0x220] sm:$0xff]  ;;  %v608_v3 = vand.u32 15, %v434_v54 }
  0xb0   : > { %7261 = vmatprep.mubr.f32.mxu0 %v9112_v39  ;;  %7388 = vmatprep.subr.mxu0 %v2312_v50  ;;  %v9154_v54 = vld [vmem:[#allocation2 + $0xa9] sm:$0xff] }
  0xb1   : > { %7339 = vmatmul.mubr.f32.gmra.mxu1 %v8918_v60  ;;  %v9135_v60 = vsel %vm942_vm10, 1.0, %v9018_v0  ;;  %7389 = vmatpush3.msra.mxu0 %v2312_v50  ;;  %vm946_vm12 = vcmp.le.s32.totalorder %v608_v3, 14  ;;  %v9165_v3 = vld [vmem:[#allocation2 + $0xc1] sm:$0xff] }
  0xb2   : > { %7341 = vmatprep.mubr.f32.mxu1 %v1982_v31  ;;  %7453 = vmatpush3.msra.mxu1 %v2658_v33  ;;  %v9140_v31 = vld [vmem:[#allocation2 + $0x99] sm:$0xff]  ;;  %v1986_v33 = vmul.f32 %v8923_v2, %v8936_v19  ;;  %v1649_v50 = vmul.f32 %v9135_v60, %v9137_v41  ;;  %v2310_v2 = vld [vmem:[#allocation6 + $0x218] sm:$0xff] }
  0xb3   : > { %7262 = vmatmul.mubr.f32.gmra.mxu0 %v1645_v13  ;;  %7454 = vmatprep.subr.mxu1 %v2657_v24  ;;  %v436_v13 = vadd.s32 200, %v8721_v28  ;;  %v2654_v19 = vld [vmem:[#allocation6 + $0x2c8] sm:$0xff] }
  0xb4   : > { %7264 = vmatprep.mubr.f32.mxu0 %v9126_v15  ;;  %7390 = vmatprep.subr.mxu0 %v2311_v22 }
  0xb5   : > { %7342 = vmatmul.mubr.f32.gmra.mxu1 %v8929_v12  ;;  %v9149_v12 = vsel %vm944_vm11, 1.0, %v9018_v0  ;;  %7391 = vmatpush3.msra.mxu0 %v2311_v22  ;;  %v440_v22 = vadd.s32 232, %v8721_v28 }
  0xb6   : > { %7344 = vmatprep.mubr.f32.mxu1 %v1984_v57  ;;  %7455 = vmatpush3.msra.mxu1 %v2657_v24  ;;  %v438_v24 = vadd.s32 216, %v8721_v28  ;;  %v1988_v57 = vmul.f32 %v8934_v18, %v8947_v46 }
  0xb7   : > { %7265 = vmatmul.mubr.f32.gmra.mxu0 %v1647_v32  ;;  %7456 = vmatprep.subr.mxu1 %v2656_v58  ;;  %v622_v32 = vand.u32 15, %v436_v13  ;;  %v2653_v13 = vld [vmem:[#allocation6 + $0x2c0] sm:$0xff] }
  0xb8   : > { %7267 = vmatprep.mubr.f32.mxu0 %v9140_v31  ;;  %7457 = vmatpush3.msra.mxu1 %v2656_v58  ;;  %v1651_v58 = vmul.f32 %v9149_v12, %v9151_v49  ;;  %v636_v46 = vand.u32 15, %v438_v24  ;;  %v2652_v24 = vld [vmem:[#allocation6 + $0x2b8] sm:$0xff] }
  0xb9   : > { %7345 = vmatmul.mubr.f32.gmra.mxu1 %v8940_v35  ;;  %7458 = vmatprep.subr.mxu1 %v2655_v48  ;;  %v9163_v35 = vsel %vm946_vm12, 1.0, %v9018_v0  ;;  %vm948_vm13 = vcmp.le.s32.totalorder %v622_v32, 14  ;;  %v9179_v32 = vld [vmem:[#allocation2 + $0xd1] sm:$0xff] }
  0xba   : > { %7347 = vmatprep.mubr.f32.mxu1 %v1986_v33  ;;  %7459 = vmatpush3.msra.mxu1 %v2655_v48  ;;  %v9168_v33 = vld [vmem:[#allocation2 + $0xb9] sm:$0xff]  ;;  %v1990_v48 = vmul.f32 %v8945_v43, %v8959_v9  ;;  %v1653_v18 = vmul.f32 %v9163_v35, %v9165_v3  ;;  %vm950_vm14 = vcmp.le.s32.totalorder %v636_v46, 14  ;;  %v650_v9 = vand.u32 15, %v440_v22  ;;  %v9193_v46 = vld [vmem:[#allocation2 + $0xe1] sm:$0xff] }
  0xbb   : > { %7268 = vmatmul.mubr.f32.gmra.mxu0 %v1649_v50  ;;  %7460 = vmatprep.subr.mxu1 %v2654_v19  ;;  %v2309_v50 = vld [vmem:[#allocation6 + $0x210] sm:$0xff] }
  0xbc   : > { %7270 = vmatprep.mubr.f32.mxu0 %v9154_v54  ;;  %7392 = vmatprep.subr.mxu0 %v2310_v2  ;;  %v2651_v43 = vld [vmem:[#allocation6 + $0x2b0] sm:$0xff]  ;;  %vm952_vm15 = vcmp.le.s32.totalorder %v650_v9, 14  ;;  %v2649_v9 = vld [vmem:[#allocation6 + $0x2a0] sm:$0xff] }
  0xbd   : > { %7348 = vmatmul.mubr.f32.gmra.mxu1 %v8951_v59  ;;  %v9177_v59 = vsel %vm948_vm13, 1.0, %v9018_v0  ;;  %7393 = vmatpush3.msra.mxu0 %v2310_v2  ;;  %v9196_v22 = vld [vmem:[#allocation2 + $0xd9] sm:$0xff] }
  0xbe   : > { %7350 = vmatprep.mubr.f32.mxu1 %v1988_v57  ;;  %7461 = vmatpush3.msra.mxu1 %v2654_v19  ;;  %v9182_v57 = vld [vmem:[#allocation2 + $0xc9] sm:$0xff]  ;;  %v442_v19 = vadd.s32 248, %v8721_v28  ;;  %v1655_v2 = vmul.f32 %v9177_v59, %v9179_v32  ;;  %v9206_v28 = vld [vmem:[#allocation2 + $0xf1] sm:$0xff] }
  0xbf   : > { %7271 = vmatmul.mubr.f32.gmra.mxu0 %v1651_v58  ;;  %7462 = vmatprep.subr.mxu1 %v2653_v13  ;;  %v1992_v58 = vmul.f32 %v8957_v6, %v8973_v40  ;;  %v2650_v40 = vld [vmem:[#allocation6 + $0x2a8] sm:$0xff] }
  0xc0   : > { %7273 = vmatprep.mubr.f32.mxu0 %v9168_v33  ;;  %7394 = vmatprep.subr.mxu0 %v2309_v50 }
  0xc1   : > { %7351 = vmatmul.mubr.f32.gmra.mxu1 %v8966_v29  ;;  %v9191_v29 = vsel %vm950_vm14, 1.0, %v9018_v0  ;;  %7395 = vmatpush3.msra.mxu0 %v2309_v50 }
  0xc2   : > { %7353 = vmatprep.mubr.f32.mxu1 %v1990_v48  ;;  %7463 = vmatpush3.msra.mxu1 %v2653_v13  ;;  %11349 = vst [vmem:[#allocation35_spill] sm:$0xff] %v9191_v29  ;;  %v1994_v13 = vmul.f32 %v8971_v37, %v8983_v10  ;;  %v2308_v48 = vld [vmem:[#allocation6 + $0x208] sm:$0xff]  ;;  %v2307_v10 = vld [vmem:[#allocation6 + $0x200] sm:$0xff] }
  0xc3   : > { %7274 = vmatmul.mubr.f32.gmra.mxu0 %v1653_v18  ;;  %7464 = vmatprep.subr.mxu1 %v2652_v24  ;;  %v664_v18 = vand.u32 15, %v442_v19  ;;  %v9209_v19 = vld [vmem:[#allocation2 + $0xe9] sm:$0xff] }
  0xc4   : > { %7276 = vmatprep.mubr.f32.mxu0 %v9182_v57  ;;  %7465 = vmatpush3.msra.mxu1 %v2652_v24  ;;  %v1657_v24 = vmul.f32 %v9191_v29, %v9193_v46 }
  0xc5   : > { %7354 = vmatmul.mubr.f32.gmra.mxu1 %v8976_v63  ;;  %7466 = vmatprep.subr.mxu1 %v2651_v43  ;;  %v9204_v63 = vsel %vm952_vm15, 1.0, %v9018_v0  ;;  %vm954_vm0 = vcmp.le.s32.totalorder %v664_v18, 14  ;;  %v9221_v18 = vld [vmem:[#allocation2 + $0x101] sm:$0xff] }
  0xc6   : > { %7356 = vmatprep.mubr.f32.mxu1 %v1992_v58  ;;  %7467 = vmatpush3.msra.mxu1 %v2651_v43  ;;  %11350 = vst [vmem:[#allocation36_spill] sm:$0xff] %v9204_v63  ;;  %v1996_v43 = vmul.f32 %v8981_v56, %v8996_v53  ;;  %v1659_v50 = vmul.f32 %v9204_v63, %v9206_v28  ;;  %v9215_v58 = vld [vmem:[#allocation2 + $0x107] sm:$0xff]  ;;  %v9224_v53 = vld [vmem:[#allocation2 + $0xf9] sm:$0xff] }
  0xc7   : > { %7277 = vmatmul.mubr.f32.gmra.mxu0 %v1655_v2  ;;  %7468 = vmatprep.subr.mxu1 %v2650_v40  ;;  %v9219_v2 = vsel %vm954_vm0, 1.0, %v9018_v0  ;;  %v2274_v0 = vld [vmem:[#allocation2 + $0x18] sm:$0xff] }
  0xc8   : > { %7279 = vmatprep.mubr.f32.mxu0 %v9196_v22  ;;  %7396 = vmatprep.subr.mxu0 %v2308_v48  ;;  %11351 = vst [vmem:[#allocation37_spill] sm:$0xff] %v9219_v2 }
  0xc9   : > { %7357 = vmatmul.mubr.f32.gmra.mxu1 %v8986_v21  ;;  %7397 = vmatpush3.msra.mxu0 %v2308_v48  ;;  %v2648_v21 = vld [vmem:[#allocation6 + $0x298] sm:$0xff]  ;;  %v1661_v48 = vmul.f32 %v9219_v2, %v9221_v18 }
  0xca   : > { %7359 = vmatprep.mubr.f32.mxu1 %v1994_v13  ;;  %7469 = vmatpush3.msra.mxu1 %v2650_v40  ;;  %v2647_v40 = vld [vmem:[#allocation6 + $0x290] sm:$0xff]  ;;  %v1998_v13 = vmul.f32 %v8994_v47, %v9215_v58 }
  0xcb   : > { %7280 = vmatmul.mubr.f32.gmra.mxu0 %v1657_v24  ;;  %7470 = vmatprep.subr.mxu1 %v2649_v9  ;;  %v9232_v24 = vld [vmem:[#allocation2 + $0x10f] sm:$0xff] }
  0xcc   : > { %7282 = vmatprep.mubr.f32.mxu0 %v9209_v19  ;;  %7398 = vmatprep.subr.mxu0 %v2307_v10 }
  0xcd   : > { %7360 = vmatmul.mubr.f32.gmra.mxu1 %v8999_v16  ;;  %v2646_v16 = vld [vmem:[#allocation6 + $0x288] sm:$0xff]  ;;  %7399 = vmatpush3.msra.mxu0 %v2307_v10  ;;  %v2997_v10 = vld [vmem:[#allocation6 + $0x370] sm:$0xff] }
  0xce   : > { %7362 = vmatprep.mubr.f32.mxu1 %v1996_v43  ;;  %7471 = vmatpush3.msra.mxu1 %v2649_v9  ;;  %v2998_v9 = vld [vmem:[#allocation6 + $0x378] sm:$0xff]  ;;  %v2275_v43 = vld [vmem:[#allocation2 + $0x20] sm:$0xff] }
  0xcf   : > { %7283 = vmatmul.mubr.f32.gmra.mxu0 %v1659_v50  ;;  %7472 = vmatprep.subr.mxu1 %v2648_v21  ;;  %v2645_v50 = vld [vmem:[#allocation6 + $0x280] sm:$0xff] }
  0xd0   : > { %7285 = vmatprep.mubr.f32.mxu0 %v9224_v53  ;;  %7473 = vmatpush3.msra.mxu1 %v2648_v21  ;;  %v9238_v21 = vld [vmem:[#allocation2 + $0x28] sm:$0xff] }
  0xd1   : > { %7363 = vmatmul.mubr.f32.gmra.mxu1 %v9008_v38  ;;  %7474 = vmatprep.subr.mxu1 %v2647_v40  ;;  %v2613_v38 = vmul.f32 %v8886_v23, %v9023_v52  ;;  %v9245_v52 = vld [vmem:[#allocation2 + $0x38] sm:$0xff] }
  0xd2   : > { %7365 = vmatprep.mubr.f32.mxu1 %v1998_v13  ;;  %7475 = vmatpush3.msra.mxu1 %v2647_v40  ;;  %v9240_v40 = vld [vmem:[#allocation2 + $0x30] sm:$0xff]  ;;  %v3304_v13 = vld [vmem:[#allocation6 + $0x3f8] sm:$0xff]  ;;  %v2996_v23 = vld [vmem:[#allocation6 + $0x368] sm:$0xff] }
  0xd3   : > { %7286 = vmatmul.mubr.f32.gmra.mxu0 %v1661_v48  ;;  %7476 = vmatprep.subr.mxu1 %v2646_v16  ;;  %v2615_v48 = vmul.f32 %v9021_v11, %v8888_v26  ;;  %v2617_v26 = vmul.f32 %v9034_v34, %v9052_v4  ;;  %v9263_v4 = vld [vmem:[#allocation2 + $0x58] sm:$0xff] }
  0xd4   : > { %7400 = vmatprep.mubr.f32.mxu0 %v2274_v0  ;;  %7528 = vmatprep.subr.mxu0 %v2998_v9  ;;  %v9254_v0 = vld [vmem:[#allocation2 + $0x48] sm:$0xff] }
  0xd5   : > { %7366 = vmatmul.mubr.f32.gmra.mxu1 %v9232_v24 }
  0xd6   : > { %7477 = vmatpush3.msra.mxu1 %v2646_v16  ;;  %7480 = vmatprep.mubr.f32.mxu1 %v9027_v45  ;;  %v9250_v45 = vld [vmem:[#allocation2 + $0x40] sm:$0xff]  ;;  %v2995_v16 = vld [vmem:[#allocation6 + $0x360] sm:$0xff] }
  0xd7   : > { %7401 = vmatmul.mubr.f32.vlgmr.msra.gmra.mxu0 %v2275_v43  ;;  %7478 = vmatprep.subr.mxu1 %v2645_v50  ;;  %v2993_v43 = vld [vmem:[#allocation6 + $0x350] sm:$0xff] }
  0xd8   : > { %7479 = vmatpush3.msra.mxu1 %v2645_v50  ;;  %7529 = vmatpush3.msra.mxu0 %v2998_v9  ;;  %v9259_v9 = vld [vmem:[#allocation2 + $0x50] sm:$0xff]  ;;  %v2619_v50 = vmul.f32 %v9050_v20, %v9066_v8  ;;  %v2621_v8 = vmul.f32 %v9064_v36, %v9080_v25  ;;  %v9281_v25 = vld [vmem:[#allocation2 + $0x78] sm:$0xff] }
  0xd9   : > { %7481 = vmatmul.mubr.f32.vlgmr.msra.gmra.mxu1 %v2613_v38  ;;  %7403 = vmatprep.mubr.f32.mxu0 %v9238_v21  ;;  %v9268_v38 = vld [vmem:[#allocation2 + $0x60] sm:$0xff] }
  0xda   : > { %7530 = vmatprep.subr.mxu0 %v2997_v10  ;;  %7483 = vmatprep.mubr.f32.mxu1 %v9040_v17  ;;  %v2994_v17 = vld [vmem:[#allocation6 + $0x358] sm:$0xff] }
  0xdb   : > { %7404 = vmatmul.mubr.f32.gmra.mxu0 %v9240_v40  ;;  %7608 = vmatprep.subr.mxu1 %v3304_v13 }
  0xdc   : > { %7531 = vmatpush3.msra.mxu0 %v2997_v10  ;;  %7406 = vmatprep.mubr.f32.mxu0 %v9245_v52  ;;  %v2991_v10 = vld [vmem:[#allocation6 + $0x340] sm:$0xff] }
  0xdd   : > { %7484 = vmatmul.mubr.f32.gmra.mxu1 %v2615_v48  ;;  %7532 = vmatprep.subr.mxu0 %v2996_v23  ;;  %v9272_v48 = vld [vmem:[#allocation2 + $0x68] sm:$0xff] }
  0xde   : > { %7486 = vmatprep.mubr.f32.mxu1 %v9055_v62  ;;  %7533 = vmatpush3.msra.mxu0 %v2996_v23  ;;  %v2992_v62 = vld [vmem:[#allocation6 + $0x348] sm:$0xff]  ;;  %v9277_v23 = vld [vmem:[#allocation2 + $0x70] sm:$0xff] }
  0xdf   : > { %7407 = vmatmul.mubr.f32.gmra.mxu0 %v9250_v45  ;;  %7534 = vmatprep.subr.mxu0 %v2995_v16 }
  0xe0   : > { %7409 = vmatprep.mubr.f32.mxu0 %v9254_v0  ;;  %7535 = vmatpush3.msra.mxu0 %v2995_v16  ;;  %v2623_v16 = vmul.f32 %v9078_v51, %v9094_v42  ;;  %v2625_v42 = vmul.f32 %v9092_v5, %v9109_v7  ;;  %v2627_v7 = vmul.f32 %v9107_v27, %v9123_v14 }
  0xe1   : > { %7487 = vmatmul.mubr.f32.gmra.mxu1 %v2617_v26  ;;  %7536 = vmatprep.subr.mxu0 %v2994_v17  ;;  %v2989_v26 = vld [vmem:[#allocation6 + $0x330] sm:$0xff]  ;;  %v2629_v14 = vmul.f32 %v9121_v44, %v9137_v41  ;;  %v9317_v41 = vld [vmem:[#allocation2 + $0xb8] sm:$0xff] }
  0xe2   : > { %7489 = vmatprep.mubr.f32.mxu1 %v9069_v1  ;;  %7537 = vmatpush3.msra.mxu0 %v2994_v17  ;;  %v2990_v1 = vld [vmem:[#allocation6 + $0x338] sm:$0xff]  ;;  %v9286_v17 = vld [vmem:[#allocation2 + $0x80] sm:$0xff] }
  0xe3   : > { %7410 = vmatmul.mubr.f32.gmra.mxu0 %v9259_v9  ;;  %7538 = vmatprep.subr.mxu0 %v2993_v43 }
  0xe4   : > { %7412 = vmatprep.mubr.f32.mxu0 %v9263_v4  ;;  %7539 = vmatpush3.msra.mxu0 %v2993_v43  ;;  %v9290_v43 = vld [vmem:[#allocation2 + $0x88] sm:$0xff] }
  0xe5   : > { %7490 = vmatmul.mubr.f32.gmra.mxu1 %v2619_v50  ;;  %7540 = vmatprep.subr.mxu0 %v2992_v62  ;;  %v3302_v50 = vld [vmem:[#allocation6 + $0x3e8] sm:$0xff] }
  0xe6   : > { %7492 = vmatprep.mubr.f32.mxu1 %v9083_v55  ;;  %7541 = vmatpush3.msra.mxu0 %v2992_v62  ;;  %v3303_v55 = vld [vmem:[#allocation6 + $0x3f0] sm:$0xff]  ;;  %v3301_v62 = vld [vmem:[#allocation6 + $0x3e0] sm:$0xff] }
  0xe7   : > { %7413 = vmatmul.mubr.f32.gmra.mxu0 %v9268_v38  ;;  %7542 = vmatprep.subr.mxu0 %v2991_v10 }
  0xe8   : > { %7415 = vmatprep.mubr.f32.mxu0 %v9272_v48  ;;  %7543 = vmatpush3.msra.mxu0 %v2991_v10  ;;  %v9299_v10 = vld [vmem:[#allocation2 + $0x98] sm:$0xff] }
  0xe9   : > { %7493 = vmatmul.mubr.f32.gmra.mxu1 %v2621_v8  ;;  %7544 = vmatprep.subr.mxu0 %v2990_v1  ;;  %v9304_v8 = vld [vmem:[#allocation2 + $0xa0] sm:$0xff] }
  0xea   : > { %7495 = vmatprep.mubr.f32.mxu1 %v9097_v30  ;;  %7545 = vmatpush3.msra.mxu0 %v2990_v1  ;;  %v2988_v30 = vld [vmem:[#allocation6 + $0x328] sm:$0xff]  ;;  %v3300_v1 = vld [vmem:[#allocation6 + $0x3d8] sm:$0xff] }
  0xeb   : > { %7416 = vmatmul.mubr.f32.gmra.mxu0 %v9277_v23  ;;  %7609 = vmatpush3.msra.mxu1 %v3304_v13  ;;  %v9295_v13 = vld [vmem:[#allocation2 + $0x90] sm:$0xff] }
  0xec   : > { %7418 = vmatprep.mubr.f32.mxu0 %v9281_v25  ;;  %7546 = vmatprep.subr.mxu0 %v2989_v26 }
  0xed   : > { %7496 = vmatmul.mubr.f32.gmra.mxu1 %v2623_v16  ;;  %7610 = vmatprep.subr.mxu1 %v3303_v55  ;;  %v9308_v16 = vld [vmem:[#allocation2 + $0xa8] sm:$0xff] }
  0xee   : > { %7498 = vmatprep.mubr.f32.mxu1 %v9112_v39  ;;  %7547 = vmatpush3.msra.mxu0 %v2989_v26  ;;  %v2987_v39 = vld [vmem:[#allocation6 + $0x320] sm:$0xff] }
  0xef   : > { %7419 = vmatmul.mubr.f32.gmra.mxu0 %v9286_v17  ;;  %7611 = vmatpush3.msra.mxu1 %v3303_v55  ;;  %v9313_v26 = vld [vmem:[#allocation2 + $0xb0] sm:$0xff]  ;;  %v2631_v55 = vmul.f32 %v9135_v60, %v9151_v49  ;;  %v2633_v49 = vmul.f32 %v9149_v12, %v9165_v3  ;;  %v2635_v3 = vmul.f32 %v9163_v35, %v9179_v32  ;;  %v9344_v32 = vld [vmem:[#allocation2 + $0xe8] sm:$0xff] }
  0xf0   : > { %7421 = vmatprep.mubr.f32.mxu0 %v9290_v43  ;;  %7612 = vmatprep.subr.mxu1 %v3302_v50 }
  0xf1   : > { %7499 = vmatmul.mubr.f32.gmra.mxu1 %v2625_v42  ;;  %7548 = vmatprep.subr.mxu0 %v2988_v30  ;;  %v3298_v42 = vld [vmem:[#allocation6 + $0x3c8] sm:$0xff] }
  0xf2   : > { %7501 = vmatprep.mubr.f32.mxu1 %v9126_v15  ;;  %7613 = vmatpush3.msra.mxu1 %v3302_v50  ;;  %v3299_v15 = vld [vmem:[#allocation6 + $0x3d0] sm:$0xff] }
  0xf3   : > { %7422 = vmatmul.mubr.f32.gmra.mxu0 %v9295_v13  ;;  %7614 = vmatprep.subr.mxu1 %v3301_v62  ;;  %v9322_v50 = vld [vmem:[#allocation2 + $0xc0] sm:$0xff] }
  0xf4   : > { %7424 = vmatprep.mubr.f32.mxu0 %v9299_v10  ;;  %7549 = vmatpush3.msra.mxu0 %v2988_v30  ;;  %v3297_v30 = vld [vmem:[#allocation6 + $0x3c0] sm:$0xff] }
  0xf5   : > { %7502 = vmatmul.mubr.f32.gmra.mxu1 %v2627_v7  ;;  %7550 = vmatprep.subr.mxu0 %v2987_v39  ;;  %v9331_v7 = vld [vmem:[#allocation2 + $0xd0] sm:$0xff] }
  0xf6   : > { %7504 = vmatprep.mubr.f32.mxu1 %v9140_v31  ;;  %7615 = vmatpush3.msra.mxu1 %v3301_v62  ;;  %v2986_v31 = vld [vmem:[#allocation6 + $0x318] sm:$0xff] }
  0xf7   : > { %7425 = vmatmul.mubr.f32.gmra.mxu0 %v9304_v8  ;;  %7616 = vmatprep.subr.mxu1 %v3300_v1  ;;  %v9326_v62 = vld [vmem:[#allocation2 + $0xc8] sm:$0xff] }
  0xf8   : > { %7427 = vmatprep.mubr.f32.mxu0 %v9308_v16  ;;  %7617 = vmatpush3.msra.mxu1 %v3300_v1  ;;  %v9335_v1 = vld [vmem:[#allocation2 + $0xd8] sm:$0xff] }
  0xf9   : > { %7505 = vmatmul.mubr.f32.gmra.mxu1 %v2629_v14  ;;  %7618 = vmatprep.subr.mxu1 %v3299_v15  ;;  %v9340_v14 = vld [vmem:[#allocation2 + $0xe0] sm:$0xff] }
  0xfa   : > { %7507 = vmatprep.mubr.f32.mxu1 %v9154_v54  ;;  %7551 = vmatpush3.msra.mxu0 %v2987_v39  ;;  %v2985_v54 = vld [vmem:[#allocation6 + $0x310] sm:$0xff]  ;;  %v3296_v39 = vld [vmem:[#allocation6 + $0x3b8] sm:$0xff] }
  0xfb   : > { %7428 = vmatmul.mubr.f32.gmra.mxu0 %v9313_v26  ;;  %7619 = vmatpush3.msra.mxu1 %v3299_v15  ;;  %v2637_v15 = vmul.f32 %v9177_v59, %v9193_v46  ;;  %v2639_v46 = vmul.f32 %v9191_v29, %v9206_v28  ;;  %v2641_v28 = vmul.f32 %v9204_v63, %v9221_v18  ;;  %v11354_v18 = vld [vmem:[#allocation19_spill] sm:$0xff] }
  0xfc   : > { %7430 = vmatprep.mubr.f32.mxu0 %v9317_v41  ;;  %7620 = vmatprep.subr.mxu1 %v3298_v42  ;;  %v2920_v63 = vld [vmem:[#allocation2 + $0x37] sm:$0xff] }
  0xfd   : > { %7508 = vmatmul.mubr.f32.gmra.mxu1 %v2631_v55  ;;  %7552 = vmatprep.subr.mxu0 %v2986_v31  ;;  %v3294_v55 = vld [vmem:[#allocation6 + $0x3a8] sm:$0xff]  ;;  %v3289_v29 = vld [vmem:[#allocation6 + $0x380] sm:$0xff] }
  0xfe   : > { %7510 = vmatprep.mubr.f32.mxu1 %v9168_v33  ;;  %7621 = vmatpush3.msra.mxu1 %v3298_v42  ;;  %v3295_v33 = vld [vmem:[#allocation6 + $0x3b0] sm:$0xff]  ;;  %v9349_v42 = vld [vmem:[#allocation2 + $0xf0] sm:$0xff] }
  0xff   : > { %7431 = vmatmul.mubr.f32.gmra.mxu0 %v9322_v50  ;;  %7622 = vmatprep.subr.mxu1 %v3297_v30 }
 0x100   : > { %7433 = vmatprep.mubr.f32.mxu0 %v9326_v62  ;;  %7553 = vmatpush3.msra.mxu0 %v2986_v31  ;;  %v3293_v31 = vld [vmem:[#allocation6 + $0x3a0] sm:$0xff] }
 0x101   : > { %7511 = vmatmul.mubr.f32.gmra.mxu1 %v2633_v49  ;;  %7554 = vmatprep.subr.mxu0 %v2985_v54  ;;  %v9358_v49 = vld [vmem:[#allocation2 + $0x100] sm:$0xff] }
 0x102   : > { %7513 = vmatprep.mubr.f32.mxu1 %v9182_v57  ;;  %7623 = vmatpush3.msra.mxu1 %v3297_v30  ;;  %v2984_v57 = vld [vmem:[#allocation6 + $0x308] sm:$0xff] }
 0x103   : > { %7434 = vmatmul.mubr.f32.gmra.mxu0 %v9331_v7  ;;  %7624 = vmatprep.subr.mxu1 %v3296_v39  ;;  %v9353_v30 = vld [vmem:[#allocation2 + $0xf8] sm:$0xff] }
 0x104   : > { %7436 = vmatprep.mubr.f32.mxu0 %v9335_v1  ;;  %7625 = vmatpush3.msra.mxu1 %v3296_v39  ;;  %v9362_v39 = vld [vmem:[#allocation2 + $0x108] sm:$0xff] }
 0x105   : > { %7514 = vmatmul.mubr.f32.gmra.mxu1 %v2635_v3  ;;  %7626 = vmatprep.subr.mxu1 %v3295_v33  ;;  %v2918_v3 = vld [vmem:[#allocation2 + $0x27] sm:$0xff] }
 0x106   : > { %7516 = vmatprep.mubr.f32.mxu1 %v9196_v22  ;;  %7555 = vmatpush3.msra.mxu0 %v2985_v54  ;;  %v2983_v22 = vld [vmem:[#allocation6 + $0x300] sm:$0xff]  ;;  %v3292_v54 = vld [vmem:[#allocation6 + $0x398] sm:$0xff] }
 0x107   : > { %7437 = vmatmul.mubr.f32.gmra.mxu0 %v9340_v14  ;;  %7627 = vmatpush3.msra.mxu1 %v3295_v33  ;;  %v9365_v33 = vld [vmem:[#allocation2 + $0x111] sm:$0xff] }
 0x108   : > { %7439 = vmatprep.mubr.f32.mxu0 %v9344_v32  ;;  %7628 = vmatprep.subr.mxu1 %v3294_v55  ;;  %11352 = vst [vmem:[#allocation38_spill] sm:$0xff] %v9365_v33 }
 0x109   : > { %7517 = vmatmul.mubr.f32.gmra.mxu1 %v2637_v15  ;;  %7556 = vmatprep.subr.mxu0 %v2984_v57  ;;  %v9368_v15 = vld [vmem:[#allocation2 + $0x109] sm:$0xff] }
 0x10a   : > { %7519 = vmatprep.mubr.f32.mxu1 %v9209_v19  ;;  %7629 = vmatpush3.msra.mxu1 %v3294_v55  ;;  %v3291_v19 = vld [vmem:[#allocation6 + $0x390] sm:$0xff]  ;;  %11353 = vst [vmem:[#allocation39_spill] sm:$0xff] %v9368_v15  ;;  %v9371_v55 = vld [vmem:[#allocation2 + $0x110] sm:$0xff] }
 0x10b   : > { %7440 = vmatmul.mubr.f32.gmra.mxu0 %v9349_v42  ;;  %7630 = vmatprep.subr.mxu1 %v3293_v31 }
 0x10c   : > { %7442 = vmatprep.mubr.f32.mxu0 %v9353_v30  ;;  %7557 = vmatpush3.msra.mxu0 %v2984_v57  ;;  %v2950_v57 = vmul.f32 %v11354_v18, %v2918_v3  ;;  %v2922_v3 = vld [vmem:[#allocation2 + $0x47] sm:$0xff] }
 0x10d   : > { %7520 = vmatmul.mubr.f32.gmra.mxu1 %v2639_v46  ;;  %7558 = vmatprep.subr.mxu0 %v2983_v22  ;;  %v3642_v46 = vld [vmem:[#allocation6 + $0x478] sm:$0xff] }
 0x10e   : > { %7522 = vmatprep.mubr.f32.mxu1 %v9224_v53  ;;  %7631 = vmatpush3.msra.mxu1 %v3293_v31  ;;  %v2643_v53 = vmul.f32 %v9219_v2, %v9365_v33  ;;  %v3290_v31 = vld [vmem:[#allocation6 + $0x388] sm:$0xff] }
 0x10f   : > { %7443 = vmatmul.mubr.f32.gmra.mxu0 %v9358_v49  ;;  %7632 = vmatprep.subr.mxu1 %v3292_v54 }
 0x110   : > { %7445 = vmatprep.mubr.f32.mxu0 %v9362_v39  ;;  %7633 = vmatpush3.msra.mxu1 %v3292_v54  ;;  %v2919_v54 = vld [vmem:[#allocation2 + $0x2f] sm:$0xff] }
 0x111   : > { %7523 = vmatmul.mubr.f32.gmra.mxu1 %v2641_v28  ;;  %7634 = vmatprep.subr.mxu1 %v3291_v19  ;;  %v2952_v28 = vmul.f32 %v8761_v61, %v2920_v63  ;;  %v2924_v61 = vld [vmem:[#allocation2 + $0x57] sm:$0xff] }
 0x112   : > { %7525 = vmatprep.mubr.f32.mxu1 %v9368_v15  ;;  %7559 = vmatpush3.msra.mxu0 %v2983_v22  ;;  %v3641_v22 = vld [vmem:[#allocation6 + $0x470] sm:$0xff]  ;;  %v11355_v15 = vld [vmem:[#allocation20_spill] sm:$0xff] }
 0x113   : > { %7446 = vmatmul.mubr.f32.gmra.mxu0 %v9371_v55  ;;  %7635 = vmatpush3.msra.mxu1 %v3291_v19  ;;  %v2921_v19 = vld [vmem:[#allocation2 + $0x3f] sm:$0xff] }
 0x114   : > { %7636 = vmatprep.subr.mxu1 %v3290_v31  ;;  %7560 = vmatprep.mubr.f32.mxu0 %v2950_v57  ;;  %v2954_v57 = vmul.f32 %v11355_v15, %v2922_v3  ;;  %v2923_v15 = vld [vmem:[#allocation2 + $0x4f] sm:$0xff] }
 0x115   : > { %7526 = vmatmul.mubr.f32.gmra.mxu1 %v2643_v53  ;;  %7688 = vmatprep.subr.mxu0 %v3642_v46  ;;  %v3639_v3 = vld [vmem:[#allocation6 + $0x460] sm:$0xff] }
 0x116   : > { %7637 = vmatpush3.msra.mxu1 %v3290_v31  ;;  %7640 = vmatprep.mubr.f32.mxu1 %v9238_v21  ;;  %v3640_v21 = vld [vmem:[#allocation6 + $0x468] sm:$0xff] }
 0x117   : > { %v7082_v18 = vpop.f32.mrf.mxu0  ;;  %7561 = vmatmul.mubr.f32.vlgmr.msra.gmra.mxu0 %v2919_v54  ;;  %7638 = vmatprep.subr.mxu1 %v3289_v29  ;;  %v7162_v2 = vpop.f32.mrf.mxu1 }
 0x118   : > { %7639 = vmatpush3.msra.mxu1 %v3289_v29  ;;  %7689 = vmatpush3.msra.mxu0 %v3642_v46  ;;  %v9381_v33 = vadd.f32 %v7162_v2, %v7082_v18  ;;  %v11356_v2 = vld [vmem:[#allocation21_spill] sm:$0xff] }
 0x119   : > { %v1214_v53 = vpop.f32.mrf.mxu0  ;;  %7641 = vmatmul.mubr.f32.vlgmr.msra.gmra.mxu1 %v9240_v40  ;;  %7563 = vmatprep.mubr.f32.mxu0 %v2952_v28  ;;  %v1439_v63 = vpop.f32.mrf.mxu1  ;;  %v2956_v46 = vmul.f32 %v11356_v2, %v2924_v61  ;;  %v2926_v28 = vld [vmem:[#allocation2 + $0x67] sm:$0xff]  ;;  %v2925_v61 = vld [vmem:[#allocation2 + $0x5f] sm:$0xff] }
 0x11a   : > { %7690 = vmatprep.subr.mxu0 %v3641_v22  ;;  %7643 = vmatprep.mubr.f32.mxu1 %v9245_v52  ;;  %v9385_v31 = vadd.f32 %v1439_v63, %v1214_v53  ;;  %v3638_v53 = vld [vmem:[#allocation6 + $0x458] sm:$0xff]  ;;  %v11357_v63 = vld [vmem:[#allocation23_spill] sm:$0xff] }
 0x11b   : > { %v7085_v54 = vpop.f32.mrf.mxu0  ;;  %7564 = vmatmul.mubr.f32.gmra.mxu0 %v2921_v19  ;;  %v7165_v29 = vpop.f32.mrf.mxu1 }
 0x11c   : > { %7691 = vmatpush3.msra.mxu0 %v3641_v22  ;;  %7566 = vmatprep.mubr.f32.mxu0 %v2954_v57  ;;  %v9388_v18 = vadd.f32 %v7165_v29, %v7085_v54  ;;  %v2958_v54 = vmul.f32 %v11357_v63, %v2926_v28  ;;  %v3637_v29 = vld [vmem:[#allocation6 + $0x450] sm:$0xff]  ;;  %v2927_v28 = vld [vmem:[#allocation2 + $0x6f] sm:$0xff] }
 0x11d   : > { %v1224_v40 = vpop.f32.mrf.mxu0  ;;  %7644 = vmatmul.mubr.f32.gmra.mxu1 %v9250_v45  ;;  %7692 = vmatprep.subr.mxu0 %v3640_v21  ;;  %v1449_v52 = vpop.f32.mrf.mxu1 }
 0x11e   : > { %7646 = vmatprep.mubr.f32.mxu1 %v9254_v0  ;;  %7693 = vmatpush3.msra.mxu0 %v3640_v21  ;;  %v9392_v19 = vadd.f32 %v1449_v52, %v1224_v40  ;;  %v2928_v0 = vld [vmem:[#allocation2 + $0x77] sm:$0xff] }
 0x11f   : > { %v7088_v22 = vpop.f32.mrf.mxu0  ;;  %7567 = vmatmul.mubr.f32.gmra.mxu0 %v2923_v15  ;;  %7694 = vmatprep.subr.mxu0 %v3639_v3  ;;  %v3636_v15 = vld [vmem:[#allocation6 + $0x448] sm:$0xff] }
 0x120   : > { %v7168_v57 = vpop.f32.mrf.mxu1  ;;  %7569 = vmatprep.mubr.f32.mxu0 %v2956_v46  ;;  %7695 = vmatpush3.msra.mxu0 %v3639_v3  ;;  %v11358_v52 = vld [vmem:[#allocation24_spill] sm:$0xff] }
 0x121   : > { %v9395_v45 = vadd.f32 %v7168_v57, %v7088_v22  ;;  %v1234_v2 = vpop.f32.mrf.mxu0  ;;  %7647 = vmatmul.mubr.f32.gmra.mxu1 %v9259_v9  ;;  %7696 = vmatprep.subr.mxu0 %v3638_v53  ;;  %v2960_v22 = vmul.f32 %v11358_v52, %v2928_v0  ;;  %v3635_v57 = vld [vmem:[#allocation6 + $0x440] sm:$0xff] }
 0x122   : > { %v1459_v21 = vpop.f32.mrf.mxu1  ;;  %7649 = vmatprep.mubr.f32.mxu1 %v9263_v4  ;;  %7697 = vmatpush3.msra.mxu0 %v3638_v53  ;;  %v2930_v4 = vld [vmem:[#allocation2 + $0x87] sm:$0xff] }
 0x123   : > { %v9399_v40 = vadd.f32 %v1459_v21, %v1234_v2  ;;  %v7091_v46 = vpop.f32.mrf.mxu0  ;;  %7570 = vmatmul.mubr.f32.gmra.mxu0 %v2925_v61  ;;  %7698 = vmatprep.subr.mxu0 %v3637_v29  ;;  %v3634_v61 = vld [vmem:[#allocation6 + $0x438] sm:$0xff]  ;;  %v11359_v21 = vld [vmem:[#allocation25_spill] sm:$0xff] }
 0x124   : > { %v7171_v3 = vpop.f32.mrf.mxu1  ;;  %7572 = vmatprep.mubr.f32.mxu0 %v2958_v54  ;;  %7699 = vmatpush3.msra.mxu0 %v3637_v29  ;;  %v2929_v29 = vld [vmem:[#allocation2 + $0x7f] sm:$0xff] }
 0x125   : > { %v9402_v9 = vadd.f32 %v7171_v3, %v7091_v46  ;;  %v1244_v63 = vpop.f32.mrf.mxu0  ;;  %7650 = vmatmul.mubr.f32.gmra.mxu1 %v9268_v38  ;;  %7700 = vmatprep.subr.mxu0 %v3636_v15  ;;  %v2962_v46 = vmul.f32 %v11359_v21, %v2930_v4  ;;  %v3633_v3 = vld [vmem:[#allocation6 + $0x430] sm:$0xff] }
 0x126   : > { %v1469_v53 = vpop.f32.mrf.mxu1  ;;  %7652 = vmatprep.mubr.f32.mxu1 %v9272_v48  ;;  %7701 = vmatpush3.msra.mxu0 %v3636_v15  ;;  %v2932_v48 = vld [vmem:[#allocation2 + $0x97] sm:$0xff] }
 0x127   : > { %v9406_v2 = vadd.f32 %v1469_v53, %v1244_v63  ;;  %v7094_v54 = vpop.f32.mrf.mxu0  ;;  %7573 = vmatmul.mubr.f32.gmra.mxu0 %v2927_v28  ;;  %7702 = vmatprep.subr.mxu0 %v3635_v57  ;;  %v3632_v28 = vld [vmem:[#allocation6 + $0x428] sm:$0xff]  ;;  %v11360_v53 = vld [vmem:[#allocation27_spill] sm:$0xff] }
 0x128   : > { %v7174_v0 = vpop.f32.mrf.mxu1  ;;  %7575 = vmatprep.mubr.f32.mxu0 %v2960_v22  ;;  %7703 = vmatpush3.msra.mxu0 %v3635_v57  ;;  %v2931_v57 = vld [vmem:[#allocation2 + $0x8f] sm:$0xff] }
 0x129   : > { %v9409_v38 = vadd.f32 %v7174_v0, %v7094_v54  ;;  %v1254_v52 = vpop.f32.mrf.mxu0  ;;  %7653 = vmatmul.mubr.f32.gmra.mxu1 %v9277_v23  ;;  %7704 = vmatprep.subr.mxu0 %v3634_v61  ;;  %v2964_v54 = vmul.f32 %v11360_v53, %v2932_v48  ;;  %v3631_v0 = vld [vmem:[#allocation6 + $0x420] sm:$0xff] }
 0x12a   : > { %v1479_v15 = vpop.f32.mrf.mxu1  ;;  %7655 = vmatprep.mubr.f32.mxu1 %v9281_v25  ;;  %7705 = vmatpush3.msra.mxu0 %v3634_v61  ;;  %v2934_v25 = vld [vmem:[#allocation2 + $0xa7] sm:$0xff] }
 0x12b   : > { %v9413_v63 = vadd.f32 %v1479_v15, %v1254_v52  ;;  %v7097_v22 = vpop.f32.mrf.mxu0  ;;  %7576 = vmatmul.mubr.f32.gmra.mxu0 %v2929_v29  ;;  %7706 = vmatprep.subr.mxu0 %v3633_v3  ;;  %v3630_v29 = vld [vmem:[#allocation6 + $0x418] sm:$0xff]  ;;  %v11361_v15 = vld [vmem:[#allocation28_spill] sm:$0xff] }
 0x12c   : > { %v7177_v4 = vpop.f32.mrf.mxu1  ;;  %7578 = vmatprep.mubr.f32.mxu0 %v2962_v46  ;;  %7707 = vmatpush3.msra.mxu0 %v3633_v3  ;;  %v2933_v3 = vld [vmem:[#allocation2 + $0x9f] sm:$0xff] }
 0x12d   : > { %v9416_v23 = vadd.f32 %v7177_v4, %v7097_v22  ;;  %v1264_v21 = vpop.f32.mrf.mxu0  ;;  %7656 = vmatmul.mubr.f32.gmra.mxu1 %v9286_v17  ;;  %7708 = vmatprep.subr.mxu0 %v3632_v28  ;;  %v2966_v22 = vmul.f32 %v11361_v15, %v2934_v25  ;;  %v3629_v4 = vld [vmem:[#allocation6 + $0x410] sm:$0xff] }
 0x12e   : > { %v1489_v61 = vpop.f32.mrf.mxu1  ;;  %7658 = vmatprep.mubr.f32.mxu1 %v9290_v43  ;;  %7709 = vmatpush3.msra.mxu0 %v3632_v28  ;;  %v2936_v43 = vld [vmem:[#allocation2 + $0xb7] sm:$0xff] }
 0x12f   : > { %v9420_v52 = vadd.f32 %v1489_v61, %v1264_v21  ;;  %v7100_v46 = vpop.f32.mrf.mxu0  ;;  %7579 = vmatmul.mubr.f32.gmra.mxu0 %v2931_v57  ;;  %7710 = vmatprep.subr.mxu0 %v3631_v0  ;;  %v3628_v57 = vld [vmem:[#allocation6 + $0x408] sm:$0xff]  ;;  %v11362_v61 = vld [vmem:[#allocation29_spill] sm:$0xff] }
 0x130   : > { %v7180_v48 = vpop.f32.mrf.mxu1  ;;  %7581 = vmatprep.mubr.f32.mxu0 %v2964_v54  ;;  %7711 = vmatpush3.msra.mxu0 %v3631_v0  ;;  %v2935_v0 = vld [vmem:[#allocation2 + $0xaf] sm:$0xff] }
 0x131   : > { %v9423_v17 = vadd.f32 %v7180_v48, %v7100_v46  ;;  %v1274_v53 = vpop.f32.mrf.mxu0  ;;  %7659 = vmatmul.mubr.f32.gmra.mxu1 %v9295_v13  ;;  %7712 = vmatprep.subr.mxu0 %v3630_v29  ;;  %v2968_v46 = vmul.f32 %v11362_v61, %v2936_v43  ;;  %v3627_v48 = vld [vmem:[#allocation6 + $0x400] sm:$0xff]  ;;  %v11363_v43 = vld [vmem:[#allocation30_spill] sm:$0xff] }
 0x132   : > { %v1499_v28 = vpop.f32.mrf.mxu1  ;;  %7661 = vmatprep.mubr.f32.mxu1 %v9299_v10  ;;  %7713 = vmatpush3.msra.mxu0 %v3630_v29  ;;  %v2938_v10 = vld [vmem:[#allocation2 + $0xc7] sm:$0xff]  ;;  %v2939_v61 = vld [vmem:[#allocation2 + $0xcf] sm:$0xff] }
 0x133   : > { %v9427_v21 = vadd.f32 %v1499_v28, %v1274_v53  ;;  %v7103_v54 = vpop.f32.mrf.mxu0  ;;  %7582 = vmatmul.mubr.f32.gmra.mxu0 %v2933_v3  ;;  %7714 = vmatprep.subr.mxu0 %v3629_v4  ;;  %v2970_v28 = vmul.f32 %v11363_v43, %v2938_v10 }
 0x134   : > { %v7183_v25 = vpop.f32.mrf.mxu1  ;;  %7584 = vmatprep.mubr.f32.mxu0 %v2966_v22  ;;  %7715 = vmatpush3.msra.mxu0 %v3629_v4  ;;  %v2937_v4 = vld [vmem:[#allocation2 + $0xbf] sm:$0xff] }
 0x135   : > { %v9430_v13 = vadd.f32 %v7183_v25, %v7103_v54  ;;  %v1284_v15 = vpop.f32.mrf.mxu0  ;;  %7662 = vmatmul.mubr.f32.gmra.mxu1 %v9304_v8  ;;  %7716 = vmatprep.subr.mxu0 %v3628_v57  ;;  %v2940_v25 = vld [vmem:[#allocation2 + $0xd7] sm:$0xff] }
 0x136   : > { %v1509_v29 = vpop.f32.mrf.mxu1  ;;  %7664 = vmatprep.mubr.f32.mxu1 %v9308_v16  ;;  %7717 = vmatpush3.msra.mxu0 %v3628_v57 }
 0x137   : > { %v9434_v3 = vadd.f32 %v1509_v29, %v1284_v15  ;;  %v7106_v53 = vpop.f32.mrf.mxu0  ;;  %7585 = vmatmul.mubr.f32.gmra.mxu0 %v2935_v0  ;;  %7718 = vmatprep.subr.mxu0 %v3627_v48  ;;  %v2942_v29 = vld [vmem:[#allocation2 + $0xe7] sm:$0xff] }
 0x138   : > { %v7186_v22 = vpop.f32.mrf.mxu1  ;;  %7587 = vmatprep.mubr.f32.mxu0 %v2968_v46  ;;  %7719 = vmatpush3.msra.mxu0 %v3627_v48  ;;  %v11364_v46 = vld [vmem:[#allocation31_spill] sm:$0xff] }
 0x139   : > { %v9437_v54 = vadd.f32 %v7186_v22, %v7106_v53  ;;  %v9439_v8 = vpop.f32.mrf.mxu0  ;;  %7665 = vmatmul.mubr.f32.gmra.mxu1 %v9313_v26  ;;  %v2972_v15 = vmul.f32 %v11364_v46, %v2940_v25  ;;  %v2941_v22 = vld [vmem:[#allocation2 + $0xdf] sm:$0xff]  ;;  %v2944_v25 = vld [vmem:[#allocation2 + $0xf7] sm:$0xff] }
 0x13a   : > { %v9442_v16 = vpop.f32.mrf.mxu1  ;;  %7667 = vmatprep.mubr.f32.mxu1 %v9317_v41 }
 0x13b   : > { %v7109_v57 = vpop.f32.mrf.mxu0  ;;  %7588 = vmatmul.mubr.f32.gmra.mxu0 %v2937_v4  ;;  %v2974_v4 = vmul.f32 %v8957_v6, %v2942_v29  ;;  %v2945_v29 = vld [vmem:[#allocation2 + $0xff] sm:$0xff] }
 0x13c   : > { %v7189_v0 = vpop.f32.mrf.mxu1  ;;  %7590 = vmatprep.mubr.f32.mxu0 %v2970_v28 }
 0x13d   : > { %v9446_v10 = vadd.f32 %v7189_v0, %v7109_v57  ;;  %v9448_v48 = vpop.f32.mrf.mxu0  ;;  %7668 = vmatmul.mubr.f32.gmra.mxu1 %v9322_v50  ;;  %v2943_v0 = vld [vmem:[#allocation2 + $0xef] sm:$0xff] }
 0x13e   : > { %v9451_v26 = vpop.f32.mrf.mxu1  ;;  %7670 = vmatprep.mubr.f32.mxu1 %v9326_v62 }
 0x13f   : > { %v7112_v53 = vpop.f32.mrf.mxu0  ;;  %7591 = vmatmul.mubr.f32.gmra.mxu0 %v2939_v61  ;;  %v2976_v61 = vmul.f32 %v8971_v37, %v2944_v25 }
 0x140   : > { %v7192_v41 = vpop.f32.mrf.mxu1  ;;  %7593 = vmatprep.mubr.f32.mxu0 %v2972_v15 }
 0x141   : > { %v9455_v43 = vadd.f32 %v7192_v41, %v7112_v53  ;;  %v9457_v28 = vpop.f32.mrf.mxu0  ;;  %7671 = vmatmul.mubr.f32.gmra.mxu1 %v9331_v7  ;;  %v2978_v53 = vmul.f32 %v8981_v56, %v9215_v58 }
 0x142   : > { %v9460_v50 = vpop.f32.mrf.mxu1  ;;  %7673 = vmatprep.mubr.f32.mxu1 %v9335_v1 }
 0x143   : > { %v7115_v57 = vpop.f32.mrf.mxu0  ;;  %7594 = vmatmul.mubr.f32.gmra.mxu0 %v2941_v22  ;;  %v2948_v22 = vld [vmem:[#allocation2 + $0x117] sm:$0xff] }
 0x144   : > { %v7195_v62 = vpop.f32.mrf.mxu1  ;;  %7596 = vmatprep.mubr.f32.mxu0 %v2974_v4  ;;  %v2980_v25 = vmul.f32 %v8994_v47, %v2948_v22  ;;  %v3562_v47 = vld [vmem:[#allocation2 + $0x29] sm:$0xff]  ;;  %v3564_v22 = vld [vmem:[#allocation2 + $0x39] sm:$0xff] }
 0x145   : > { %v9464_v46 = vadd.f32 %v7195_v62, %v7115_v57  ;;  %v9466_v6 = vpop.f32.mrf.mxu0  ;;  %7674 = vmatmul.mubr.f32.gmra.mxu1 %v9340_v14  ;;  %v2949_v62 = vld [vmem:[#allocation2 + $0x11f] sm:$0xff] }
 0x146   : > { %v9469_v15 = vpop.f32.mrf.mxu1  ;;  %7676 = vmatprep.mubr.f32.mxu1 %v9344_v32 }
 0x147   : > { %v7118_v7 = vpop.f32.mrf.mxu0  ;;  %7597 = vmatmul.mubr.f32.gmra.mxu0 %v2943_v0 }
 0x148   : > { %v7198_v1 = vpop.f32.mrf.mxu1  ;;  %7599 = vmatprep.mubr.f32.mxu0 %v2976_v61 }
 0x149   : > { %v9474_v41 = vadd.f32 %v7198_v1, %v7118_v7  ;;  %v9476_v37 = vpop.f32.mrf.mxu0  ;;  %7677 = vmatmul.mubr.f32.gmra.mxu1 %v9349_v42 }
 0x14a   : > { %v9479_v14 = vpop.f32.mrf.mxu1  ;;  %7679 = vmatprep.mubr.f32.mxu1 %v9353_v30 }
 0x14b   : > { %11365 = vst [vmem:[#allocation19_spill] sm:$0xff] %v9479_v14  ;;  %v7121_v32 = vpop.f32.mrf.mxu0  ;;  %7600 = vmatmul.mubr.f32.gmra.mxu0 %v2945_v29 }
 0x14c   : > { %v7201_v4 = vpop.f32.mrf.mxu1  ;;  %7602 = vmatprep.mubr.f32.mxu0 %v2978_v53 }
 0x14d   : > { %v9483_v57 = vadd.f32 %v7201_v4, %v7121_v32  ;;  %v9485_v56 = vpop.f32.mrf.mxu0  ;;  %7680 = vmatmul.mubr.f32.gmra.mxu1 %v9358_v49  ;;  %v9499_v49 = vld [vmem:[#allocation2 + $0x8] sm:$0xff] }
 0x14e   : > { %11366 = vst [vmem:[#allocation20_spill] sm:$0xff] %v9485_v56  ;;  %v9488_v58 = vpop.f32.mrf.mxu1  ;;  %7682 = vmatprep.mubr.f32.mxu1 %v9362_v39  ;;  %11368 = vst [vmem:[#allocation23_spill] sm:$0xff] %v9499_v49  ;;  %v11369_v4 = vld [vmem:[#allocation26_spill] sm:$0xff] }
 0x14f   : > { %11367 = vst [vmem:[#allocation21_spill] sm:$0xff] %v9488_v58  ;;  %v7124_v42 = vpop.f32.mrf.mxu0  ;;  %7603 = vmatmul.mubr.f32.gmra.mxu0 %v9232_v24  ;;  %v3565_v24 = vld [vmem:[#allocation2 + $0x41] sm:$0xff] }
 0x150   : > { %v7204_v30 = vpop.f32.mrf.mxu1  ;;  %7605 = vmatprep.mubr.f32.mxu0 %v2980_v25  ;;  %v3597_v25 = vmul.f32 %v9021_v11, %v3565_v24 }
 0x151   : > { %v9492_v0 = vadd.f32 %v7204_v30, %v7124_v42  ;;  %v9494_v61 = vpop.f32.mrf.mxu0  ;;  %7683 = vmatmul.mubr.f32.gmra.mxu1 %v9371_v55  ;;  %v3567_v30 = vld [vmem:[#allocation2 + $0x51] sm:$0xff] }
 0x152   : > { %v9497_v7 = vpop.f32.mrf.mxu1  ;;  %7685 = vmatprep.mubr.f32.mxu1 %v9499_v49 }
 0x153   : > { %v7127_v39 = vpop.f32.mrf.mxu0  ;;  %7606 = vmatmul.mubr.f32.gmra.mxu0 %v2949_v62 }
 0x154   : > { %v7207_v1 = vpop.f32.mrf.mxu1  ;;  %7720 = vmatprep.mubr.f32.mxu0 %v3562_v47 }
 0x155   : > { %v9502_v29 = vadd.f32 %v7207_v1, %v7127_v39  ;;  %v9504_v53 = vpop.f32.mrf.mxu0  ;;  %7686 = vmatmul.mubr.f32.gmra.mxu1 %v9499_v49  ;;  %v3566_v39 = vld [vmem:[#allocation2 + $0x49] sm:$0xff] }
 0x156   : > { %7800 = vmatprep.mubr.f32.mxu1 %v9499_v49  ;;  %v9508_v55 = vpop.f32.mrf.mxu1 }
 0x157   : > { %v7242_v32 = vpop.f32.mrf.mxu0  ;;  %7721 = vmatmul.mubr.f32.vlgmr.msra.gmra.mxu0 %v11369_v4  ;;  %v3599_v4 = vmul.f32 %v9034_v34, %v3567_v30 }
 0x158   : > { %v1905_v42 = vadd.f32 %v7242_v32, %v9381_v33  ;;  %7723 = vmatprep.mubr.f32.mxu0 %v3564_v22  ;;  %v7322_v47 = vpop.f32.mrf.mxu1  ;;  %v3569_v33 = vld [vmem:[#allocation2 + $0x61] sm:$0xff]  ;;  %v3568_v32 = vld [vmem:[#allocation2 + $0x59] sm:$0xff] }
 0x159   : > { %v1745_v62 = vpop.f32.mrf.mxu0 }
 0x15a   : > { %v9514_v1 = vadd.f32 %v1745_v62, %v9385_v31  ;;  %v9516_v58 = vadd.f32 %v7322_v47, %v1905_v42  ;;  %v9518_v56 = vpop.f32.mrf.mxu1  ;;  %v3570_v47 = vld [vmem:[#allocation2 + $0x69] sm:$0xff] }
 0x15b   : > { %v7245_v49 = vpop.f32.mrf.mxu0  ;;  %7724 = vmatmul.mubr.f32.gmra.mxu0 %v3597_v25  ;;  %v3601_v25 = vmul.f32 %v9050_v20, %v3569_v33 }
 0x15c   : > { %v1907_v11 = vadd.f32 %v7245_v49, %v9388_v18  ;;  %7726 = vmatprep.mubr.f32.mxu0 %v3566_v39  ;;  %v3571_v18 = vld [vmem:[#allocation2 + $0x71] sm:$0xff] }
 0x15d   : > { %v1755_v24 = vpop.f32.mrf.mxu0  ;;  %v7325_v22 = vpop.f32.mrf.mxu1 }
 0x15e   : > { %v9523_v14 = vadd.f32 %v1755_v24, %v9392_v19  ;;  %v9525_v31 = vadd.f32 %v7325_v22, %v1907_v11 }
 0x15f   : > { %v7248_v42 = vpop.f32.mrf.mxu0  ;;  %v9527_v62 = vpop.f32.mrf.mxu1  ;;  %7727 = vmatmul.mubr.f32.gmra.mxu0 %v3599_v4  ;;  %v3603_v4 = vmul.f32 %v9064_v36, %v3571_v18 }
 0x160   : > { %v1909_v34 = vadd.f32 %v7248_v42, %v9395_v45  ;;  %7729 = vmatprep.mubr.f32.mxu0 %v3568_v32  ;;  %v3573_v45 = vld [vmem:[#allocation2 + $0x81] sm:$0xff]  ;;  %v3572_v32 = vld [vmem:[#allocation2 + $0x79] sm:$0xff] }
 0x161   : > { %v1765_v49 = vpop.f32.mrf.mxu0  ;;  %v7328_v30 = vpop.f32.mrf.mxu1 }
 0x162   : > { %v9532_v39 = vadd.f32 %v1765_v49, %v9399_v40  ;;  %v9534_v19 = vadd.f32 %v7328_v30, %v1909_v34 }
 0x163   : > { %v7251_v11 = vpop.f32.mrf.mxu0  ;;  %v9536_v24 = vpop.f32.mrf.mxu1  ;;  %7730 = vmatmul.mubr.f32.gmra.mxu0 %v3601_v25  ;;  %v3605_v25 = vmul.f32 %v9078_v51, %v3573_v45 }
 0x164   : > { %11370 = vst [vmem:[#allocation24_spill] sm:$0xff] %v9532_v39  ;;  %11371 = vst [vmem:[#allocation25_spill] sm:$0xff] %v9536_v24  ;;  %v1911_v20 = vadd.f32 %v7251_v11, %v9402_v9  ;;  %7732 = vmatprep.mubr.f32.mxu0 %v3570_v47  ;;  %v3575_v9 = vld [vmem:[#allocation2 + $0x91] sm:$0xff]  ;;  %v3574_v47 = vld [vmem:[#allocation2 + $0x89] sm:$0xff] }
 0x165   : > { %v1775_v33 = vpop.f32.mrf.mxu0  ;;  %v7331_v22 = vpop.f32.mrf.mxu1 }
 0x166   : > { %v9541_v42 = vadd.f32 %v1775_v33, %v9406_v2  ;;  %v9543_v40 = vadd.f32 %v7331_v22, %v1911_v20 }
 0x167   : > { %v7254_v34 = vpop.f32.mrf.mxu0  ;;  %v9545_v49 = vpop.f32.mrf.mxu1  ;;  %7733 = vmatmul.mubr.f32.gmra.mxu0 %v3603_v4  ;;  %v3607_v4 = vmul.f32 %v9092_v5, %v3575_v9 }
 0x168   : > { %11372 = vst [vmem:[#allocation27_spill] sm:$0xff] %v9541_v42  ;;  %11373 = vst [vmem:[#allocation28_spill] sm:$0xff] %v9545_v49  ;;  %v1913_v36 = vadd.f32 %v7254_v34, %v9409_v38  ;;  %7735 = vmatprep.mubr.f32.mxu0 %v3572_v32  ;;  %v3577_v38 = vld [vmem:[#allocation2 + $0xa1] sm:$0xff]  ;;  %v3576_v32 = vld [vmem:[#allocation2 + $0x99] sm:$0xff] }
 0x169   : > { %v1785_v18 = vpop.f32.mrf.mxu0  ;;  %v7334_v30 = vpop.f32.mrf.mxu1  ;;  %v11382_v42 = vld [vmem:[#allocation37_spill] sm:$0xff] }
 0x16a   : > { %v9550_v11 = vadd.f32 %v1785_v18, %v9413_v63  ;;  %v9552_v2 = vadd.f32 %v7334_v30, %v1913_v36 }
 0x16b   : > { %v7257_v20 = vpop.f32.mrf.mxu0  ;;  %v9554_v33 = vpop.f32.mrf.mxu1  ;;  %7736 = vmatmul.mubr.f32.gmra.mxu0 %v3605_v25  ;;  %v3609_v25 = vmul.f32 %v9107_v27, %v3577_v38 }
 0x16c   : > { %11374 = vst [vmem:[#allocation29_spill] sm:$0xff] %v9550_v11  ;;  %11375 = vst [vmem:[#allocation30_spill] sm:$0xff] %v9554_v33  ;;  %v1915_v51 = vadd.f32 %v7257_v20, %v9416_v23  ;;  %7738 = vmatprep.mubr.f32.mxu0 %v3574_v47  ;;  %v3579_v23 = vld [vmem:[#allocation2 + $0xb1] sm:$0xff]  ;;  %v3578_v47 = vld [vmem:[#allocation2 + $0xa9] sm:$0xff] }
 0x16d   : > { %v1795_v45 = vpop.f32.mrf.mxu0  ;;  %v7337_v22 = vpop.f32.mrf.mxu1 }
 0x16e   : > { %v9559_v34 = vadd.f32 %v1795_v45, %v9420_v52  ;;  %v9561_v63 = vadd.f32 %v7337_v22, %v1915_v51 }
 0x16f   : > { %v7260_v36 = vpop.f32.mrf.mxu0  ;;  %v9563_v18 = vpop.f32.mrf.mxu1  ;;  %7739 = vmatmul.mubr.f32.gmra.mxu0 %v3607_v4  ;;  %v3611_v4 = vmul.f32 %v9121_v44, %v3579_v23 }
 0x170   : > { %11376 = vst [vmem:[#allocation31_spill] sm:$0xff] %v9559_v34  ;;  %11377 = vst [vmem:[#allocation26_spill] sm:$0xff] %v9563_v18  ;;  %v1917_v5 = vadd.f32 %v7260_v36, %v9423_v17  ;;  %7741 = vmatprep.mubr.f32.mxu0 %v3576_v32  ;;  %v3581_v17 = vld [vmem:[#allocation2 + $0xc1] sm:$0xff]  ;;  %v3580_v32 = vld [vmem:[#allocation2 + $0xb9] sm:$0xff] }
 0x171   : > { %v1805_v9 = vpop.f32.mrf.mxu0  ;;  %v7340_v30 = vpop.f32.mrf.mxu1 }
 0x172   : > { %v9568_v20 = vadd.f32 %v1805_v9, %v9427_v21  ;;  %v9570_v52 = vadd.f32 %v7340_v30, %v1917_v5 }
 0x173   : > { %v7263_v51 = vpop.f32.mrf.mxu0  ;;  %v9572_v45 = vpop.f32.mrf.mxu1  ;;  %7742 = vmatmul.mubr.f32.gmra.mxu0 %v3609_v25  ;;  %v3613_v25 = vmul.f32 %v9135_v60, %v3581_v17  ;;  %v3585_v60 = vld [vmem:[#allocation2 + $0xe1] sm:$0xff] }
 0x174   : > { %v1919_v27 = vadd.f32 %v7263_v51, %v9430_v13  ;;  %7744 = vmatprep.mubr.f32.mxu0 %v3578_v47  ;;  %v3583_v13 = vld [vmem:[#allocation2 + $0xd1] sm:$0xff]  ;;  %v3582_v47 = vld [vmem:[#allocation2 + $0xc9] sm:$0xff] }
 0x175   : > { %v1815_v38 = vpop.f32.mrf.mxu0  ;;  %v7343_v22 = vpop.f32.mrf.mxu1 }
 0x176   : > { %v9577_v36 = vadd.f32 %v1815_v38, %v9434_v3  ;;  %v9579_v21 = vadd.f32 %v7343_v22, %v1919_v27  ;;  %v3615_v27 = vmul.f32 %v9149_v12, %v3583_v13  ;;  %v3584_v22 = vld [vmem:[#allocation2 + $0xd9] sm:$0xff]  ;;  %v3587_v12 = vld [vmem:[#allocation2 + $0xf1] sm:$0xff] }
 0x177   : > { %v7266_v5 = vpop.f32.mrf.mxu0  ;;  %v9581_v9 = vpop.f32.mrf.mxu1  ;;  %7745 = vmatmul.mubr.f32.gmra.mxu0 %v3611_v4 }
 0x178   : > { %v1921_v44 = vadd.f32 %v7266_v5, %v9437_v54  ;;  %7747 = vmatprep.mubr.f32.mxu0 %v3580_v32 }
 0x179   : > { %v9585_v23 = vpop.f32.mrf.mxu0  ;;  %v7346_v30 = vpop.f32.mrf.mxu1 }
 0x17a   : > { %v9587_v51 = vadd.f32 %v7346_v30, %v1921_v44  ;;  %v3617_v44 = vmul.f32 %v9163_v35, %v3585_v60  ;;  %v3586_v30 = vld [vmem:[#allocation2 + $0xe9] sm:$0xff]  ;;  %v3589_v35 = vld [vmem:[#allocation2 + $0x101] sm:$0xff] }
 0x17b   : > { %v7269_v3 = vpop.f32.mrf.mxu0  ;;  %v9589_v38 = vpop.f32.mrf.mxu1  ;;  %7748 = vmatmul.mubr.f32.gmra.mxu0 %v3613_v25 }
 0x17c   : > { %v1923_v4 = vadd.f32 %v7269_v3, %v9446_v10  ;;  %7750 = vmatprep.mubr.f32.mxu0 %v3582_v47 }
 0x17d   : > { %v9593_v17 = vpop.f32.mrf.mxu0  ;;  %v7349_v54 = vpop.f32.mrf.mxu1 }
 0x17e   : > { %v9595_v32 = vadd.f32 %v7349_v54, %v1923_v4  ;;  %v3619_v4 = vmul.f32 %v9177_v59, %v3587_v12  ;;  %v3588_v54 = vld [vmem:[#allocation2 + $0xf9] sm:$0xff] }
 0x17f   : > { %v7272_v5 = vpop.f32.mrf.mxu0  ;;  %v9597_v18 = vpop.f32.mrf.mxu1  ;;  %7751 = vmatmul.mubr.f32.gmra.mxu0 %v3615_v27 }
 0x180   : > { %v1925_v25 = vadd.f32 %v7272_v5, %v9455_v43  ;;  %7753 = vmatprep.mubr.f32.mxu0 %v3584_v22 }
 0x181   : > { %v9601_v13 = vpop.f32.mrf.mxu0  ;;  %v7352_v10 = vpop.f32.mrf.mxu1 }
 0x182   : > { %v9603_v47 = vadd.f32 %v7352_v10, %v1925_v25  ;;  %v11378_v25 = vld [vmem:[#allocation35_spill] sm:$0xff] }
 0x183   : > { %v7275_v3 = vpop.f32.mrf.mxu0  ;;  %v9605_v34 = vpop.f32.mrf.mxu1  ;;  %7754 = vmatmul.mubr.f32.gmra.mxu0 %v3617_v44  ;;  %v3621_v10 = vmul.f32 %v11378_v25, %v3589_v35  ;;  %v3593_v35 = vld [vmem:[#allocation2 + $0x121] sm:$0xff] }
 0x184   : > { %v1927_v27 = vadd.f32 %v7275_v3, %v9464_v46  ;;  %7756 = vmatprep.mubr.f32.mxu0 %v3586_v30 }
 0x185   : > { %v9609_v60 = vpop.f32.mrf.mxu0  ;;  %v7355_v43 = vpop.f32.mrf.mxu1 }
 0x186   : > { %v9611_v22 = vadd.f32 %v7355_v43, %v1927_v27  ;;  %v11379_v27 = vld [vmem:[#allocation38_spill] sm:$0xff]  ;;  %v11380_v43 = vld [vmem:[#allocation36_spill] sm:$0xff] }
 0x187   : > { %v7278_v5 = vpop.f32.mrf.mxu0  ;;  %v9613_v33 = vpop.f32.mrf.mxu1  ;;  %7757 = vmatmul.mubr.f32.gmra.mxu0 %v3619_v4  ;;  %v3623_v11 = vmul.f32 %v11380_v43, %v11379_v27  ;;  %v11381_v4 = vld [vmem:[#allocation39_spill] sm:$0xff]  ;;  %v1580_v27 = vadd.f32 %v9497_v7, %v9494_v61 }
 0x188   : > { %v1929_v44 = vadd.f32 %v7278_v5, %v9474_v41  ;;  %7759 = vmatprep.mubr.f32.mxu0 %v3588_v54  ;;  %v3592_v54 = vld [vmem:[#allocation2 + $0x119] sm:$0xff] }
 0x189   : > { %v9617_v59 = vpop.f32.mrf.mxu0  ;;  %v7358_v46 = vpop.f32.mrf.mxu1 }
 0x18a   : > { %v9619_v12 = vadd.f32 %v7358_v46, %v1929_v44 }
 0x18b   : > { %v7281_v30 = vpop.f32.mrf.mxu0  ;;  %v9621_v3 = vpop.f32.mrf.mxu1  ;;  %7760 = vmatmul.mubr.f32.gmra.mxu0 %v3621_v10  ;;  %v3625_v10 = vmul.f32 %v11382_v42, %v3593_v35 }
 0x18c   : > { %v1931_v49 = vadd.f32 %v7281_v30, %v9483_v57  ;;  %7762 = vmatprep.mubr.f32.mxu0 %v11381_v4 }
 0x18d   : > { %v9627_v25 = vpop.f32.mrf.mxu0  ;;  %v7361_v41 = vpop.f32.mrf.mxu1 }
 0x18e   : > { %v9629_v5 = vadd.f32 %v7361_v41, %v1931_v49  ;;  %v1590_v41 = vadd.f32 %v9508_v55, %v9504_v53 }
 0x18f   : > { %v7284_v44 = vpop.f32.mrf.mxu0  ;;  %v9631_v46 = vpop.f32.mrf.mxu1  ;;  %7763 = vmatmul.mubr.f32.gmra.mxu0 %v3623_v11 }
 0x190   : > { %v1933_v57 = vadd.f32 %v7284_v44, %v9492_v0  ;;  %7765 = vmatprep.mubr.f32.mxu0 %v3592_v54 }
 0x191   : > { %v1885_v30 = vpop.f32.mrf.mxu0  ;;  %v7364_v43 = vpop.f32.mrf.mxu1 }
 0x192   : > { %v1932_v4 = vadd.f32 %v1885_v30, %v1580_v27  ;;  %v9637_v24 = vadd.f32 %v7364_v43, %v1933_v57 }
 0x193   : > { %v7287_v39 = vpop.f32.mrf.mxu0  ;;  %v2223_v49 = vpop.f32.mrf.mxu1  ;;  %7766 = vmatmul.mubr.f32.gmra.mxu0 %v3625_v10 }
 0x194   : > { %v1935_v11 = vadd.f32 %v7287_v39, %v9502_v29  ;;  %v9642_v42 = vadd.f32 %v2223_v49, %v1932_v4 }
 0x195   : > { %v1895_v35 = vpop.f32.mrf.mxu0  ;;  %v7367_v61 = vpop.f32.mrf.mxu1 }
 0x196   : > { %v1934_v7 = vadd.f32 %v1895_v35, %v1590_v41  ;;  %v9644_v0 = vadd.f32 %v7367_v61, %v1935_v11 }
 0x197   : > { %v2233_v54 = vpop.f32.mrf.mxu1  ;;  %v7402_v44 = vpop.f32.mrf.mxu0 }
 0x198   : > { %v9646_v27 = vadd.f32 %v2233_v54, %v1934_v7  ;;  %v2549_v57 = vadd.f32 %v7402_v44, %v9516_v58 }
 0x199   : > { %v9649_v30 = vpop.f32.mrf.mxu0  ;;  %v7482_v10 = vpop.f32.mrf.mxu1 }
 0x19a   : > { %v9651_v43 = vadd.f32 %v7482_v10, %v2549_v57 }
 0x19b   : > { %v7405_v53 = vpop.f32.mrf.mxu0  ;;  %v9653_v29 = vpop.f32.mrf.mxu1 }
 0x19c   : > { %v2551_v55 = vadd.f32 %v7405_v53, %v9525_v31 }
 0x19d   : > { %v9656_v39 = vpop.f32.mrf.mxu0  ;;  %v7485_v4 = vpop.f32.mrf.mxu1 }
 0x19e   : > { %v9658_v49 = vadd.f32 %v7485_v4, %v2551_v55 }
 0x19f   : > { %v7408_v41 = vpop.f32.mrf.mxu0  ;;  %v9660_v11 = vpop.f32.mrf.mxu1 }
 0x1a0   : > { %11383 = vst [vmem:[#allocation35_spill] sm:$0xff] %v9660_v11  ;;  %v2553_v58 = vadd.f32 %v7408_v41, %v9534_v19 }
 0x1a1   : > { %v9663_v35 = vpop.f32.mrf.mxu0  ;;  %v7488_v61 = vpop.f32.mrf.mxu1 }
 0x1a2   : > { %11384 = vst [vmem:[#allocation38_spill] sm:$0xff] %v9663_v35  ;;  %v9665_v7 = vadd.f32 %v7488_v61, %v2553_v58 }
 0x1a3   : > { %v7411_v54 = vpop.f32.mrf.mxu0  ;;  %v9667_v44 = vpop.f32.mrf.mxu1 }
 0x1a4   : > { %11385 = vst [vmem:[#allocation36_spill] sm:$0xff] %v9667_v44  ;;  %v2555_v31 = vadd.f32 %v7411_v54, %v9543_v40 }
 0x1a5   : > { %v9670_v57 = vpop.f32.mrf.mxu0  ;;  %v7491_v10 = vpop.f32.mrf.mxu1 }
 0x1a6   : > { %11386 = vst [vmem:[#allocation39_spill] sm:$0xff] %v9670_v57  ;;  %v9672_v53 = vadd.f32 %v7491_v10, %v2555_v31 }
 0x1a7   : > { %v7414_v55 = vpop.f32.mrf.mxu0  ;;  %v9674_v4 = vpop.f32.mrf.mxu1 }
 0x1a8   : > { %v2557_v19 = vadd.f32 %v7414_v55, %v9552_v2  ;;  %v2254_v2 = vadd.f32 %v9572_v45, %v9568_v20 }
 0x1a9   : > { %v9677_v41 = vpop.f32.mrf.mxu0  ;;  %v7494_v35 = vpop.f32.mrf.mxu1 }
 0x1aa   : > { %11387 = vst [vmem:[#allocation37_spill] sm:$0xff] %v9677_v41  ;;  %v9679_v58 = vadd.f32 %v7494_v35, %v2557_v19 }
 0x1ab   : > { %v7417_v61 = vpop.f32.mrf.mxu0  ;;  %v9681_v11 = vpop.f32.mrf.mxu1 }
 0x1ac   : > { %11388 = vst [vmem:[#allocation40_spill] sm:$0xff] %v9681_v11  ;;  %v2559_v40 = vadd.f32 %v7417_v61, %v9561_v63  ;;  %v1520_v11 = vadd.f32 %v9442_v16, %v9439_v8 }
 0x1ad   : > { %v9684_v54 = vpop.f32.mrf.mxu0  ;;  %v7497_v44 = vpop.f32.mrf.mxu1 }
 0x1ae   : > { %v9686_v31 = vadd.f32 %v7497_v44, %v2559_v40  ;;  %v2256_v40 = vadd.f32 %v9581_v9, %v9577_v36 }
 0x1af   : > { %v7420_v10 = vpop.f32.mrf.mxu0  ;;  %v9688_v57 = vpop.f32.mrf.mxu1 }
 0x1b0   : > { %11389 = vst [vmem:[#allocation41_spill] sm:$0xff] %v9688_v57  ;;  %v2561_v55 = vadd.f32 %v7420_v10, %v9570_v52  ;;  %v1920_v57 = vadd.f32 %v9585_v23, %v1520_v11  ;;  %v1530_v10 = vadd.f32 %v9451_v26, %v9448_v48  ;;  %v1540_v11 = vadd.f32 %v9460_v50, %v9457_v28 }
 0x1b1   : > { %v2449_v35 = vpop.f32.mrf.mxu0  ;;  %v7500_v19 = vpop.f32.mrf.mxu1 }
 0x1b2   : > { %v9695_v41 = vadd.f32 %v2449_v35, %v2254_v2  ;;  %v9697_v63 = vadd.f32 %v7500_v19, %v2561_v55  ;;  %v2258_v35 = vadd.f32 %v9589_v38, %v1920_v57  ;;  %v1922_v36 = vadd.f32 %v9593_v17, %v1530_v10 }
 0x1b3   : > { %v7423_v61 = vpop.f32.mrf.mxu0  ;;  %v9699_v44 = vpop.f32.mrf.mxu1  ;;  %v1924_v38 = vadd.f32 %v9601_v13, %v1540_v11 }
 0x1b4   : > { %v2563_v20 = vadd.f32 %v7423_v61, %v9579_v21 }
 0x1b5   : > { %v2459_v52 = vpop.f32.mrf.mxu0  ;;  %v7503_v45 = vpop.f32.mrf.mxu1  ;;  %v2262_v10 = vadd.f32 %v9605_v34, %v1924_v38 }
 0x1b6   : > { %v9707_v8 = vadd.f32 %v2459_v52, %v2256_v40  ;;  %v9709_v16 = vadd.f32 %v7503_v45, %v2563_v20  ;;  %v2260_v40 = vadd.f32 %v9597_v18, %v1922_v36  ;;  %v1550_v20 = vadd.f32 %v9469_v15, %v9466_v6 }
 0x1b7   : > { %v7426_v2 = vpop.f32.mrf.mxu0  ;;  %v9711_v55 = vpop.f32.mrf.mxu1 }
 0x1b8   : > { %v2565_v9 = vadd.f32 %v7426_v2, %v9587_v51  ;;  %v1926_v18 = vadd.f32 %v9609_v60, %v1550_v20 }
 0x1b9   : > { %v2469_v23 = vpop.f32.mrf.mxu0  ;;  %v7506_v21 = vpop.f32.mrf.mxu1 }
 0x1ba   : > { %v9718_v19 = vadd.f32 %v2469_v23, %v2258_v35  ;;  %v9720_v48 = vadd.f32 %v7506_v21, %v2565_v9  ;;  %v11390_v35 = vld [vmem:[#allocation19_spill] sm:$0xff]  ;;  %v2264_v21 = vadd.f32 %v9613_v33, %v1926_v18 }
 0x1bb   : > { %v7429_v26 = vpop.f32.mrf.mxu0  ;;  %v9722_v61 = vpop.f32.mrf.mxu1  ;;  %v1560_v36 = vadd.f32 %v11390_v35, %v9476_v37 }
 0x1bc   : > { %v2567_v17 = vadd.f32 %v7429_v26, %v9595_v32  ;;  %v11393_v26 = vld [vmem:[#allocation20_spill] sm:$0xff] }
 0x1bd   : > { %v2479_v57 = vpop.f32.mrf.mxu0  ;;  %v7509_v51 = vpop.f32.mrf.mxu1  ;;  %v1928_v34 = vadd.f32 %v9617_v59, %v1560_v36 }
 0x1be   : > { %v9729_v52 = vadd.f32 %v2479_v57, %v2260_v40  ;;  %v9731_v28 = vadd.f32 %v7509_v51, %v2567_v17  ;;  %v11394_v40 = vld [vmem:[#allocation21_spill] sm:$0xff] }
 0x1bf   : > { %v7432_v50 = vpop.f32.mrf.mxu0  ;;  %v9733_v45 = vpop.f32.mrf.mxu1  ;;  %v1570_v38 = vadd.f32 %v11394_v40, %v11393_v26  ;;  %v2266_v20 = vadd.f32 %v9621_v3, %v1928_v34 }
 0x1c0   : > { %v2569_v13 = vadd.f32 %v7432_v50, %v9603_v47 }
 0x1c1   : > { %v2489_v2 = vpop.f32.mrf.mxu0  ;;  %v7512_v32 = vpop.f32.mrf.mxu1  ;;  %v1930_v33 = vadd.f32 %v9627_v25, %v1570_v38 }
 0x1c2   : > { %v9740_v9 = vadd.f32 %v2489_v2, %v2262_v10  ;;  %v9742_v6 = vadd.f32 %v7512_v32, %v2569_v13 }
 0x1c3   : > { %v7435_v15 = vpop.f32.mrf.mxu0  ;;  %v9744_v23 = vpop.f32.mrf.mxu1  ;;  %v2268_v32 = vadd.f32 %v9631_v46, %v1930_v33 }
 0x1c4   : > { %11391 = vst [vmem:[#allocation19_spill] sm:$0xff] %v9740_v9  ;;  %11392 = vst [vmem:[#allocation42_spill] sm:$0xff] %v9744_v23  ;;  %v2571_v60 = vadd.f32 %v7435_v15, %v9611_v22 }
 0x1c5   : > { %v2499_v11 = vpop.f32.mrf.mxu0  ;;  %v7515_v47 = vpop.f32.mrf.mxu1 }
 0x1c6   : > { %v9751_v17 = vadd.f32 %v2499_v11, %v2264_v21  ;;  %v9753_v37 = vadd.f32 %v7515_v47, %v2571_v60 }
 0x1c7   : > { %v7438_v57 = vpop.f32.mrf.mxu0  ;;  %v9755_v51 = vpop.f32.mrf.mxu1 }
 0x1c8   : > { %11395 = vst [vmem:[#allocation20_spill] sm:$0xff] %v9751_v17  ;;  %11396 = vst [vmem:[#allocation21_spill] sm:$0xff] %v9755_v51  ;;  %v2573_v59 = vadd.f32 %v7438_v57, %v9619_v12 }
 0x1c9   : > { %v2509_v50 = vpop.f32.mrf.mxu0  ;;  %v7518_v22 = vpop.f32.mrf.mxu1 }
 0x1ca   : > { %v9760_v10 = vadd.f32 %v2509_v50, %v2266_v20  ;;  %v9762_v18 = vadd.f32 %v7518_v22, %v2573_v59 }
 0x1cb   : > { %v7441_v13 = vpop.f32.mrf.mxu0  ;;  %v9764_v2 = vpop.f32.mrf.mxu1 }
 0x1cc   : > { %11397 = vst [vmem:[#allocation43_spill] sm:$0xff] %v9760_v10  ;;  %11398 = vst [vmem:[#allocation44_spill] sm:$0xff] %v9764_v2  ;;  %v2575_v35 = vadd.f32 %v7441_v13, %v9629_v5 }
 0x1cd   : > { %v2519_v36 = vpop.f32.mrf.mxu0  ;;  %v7521_v15 = vpop.f32.mrf.mxu1 }
 0x1ce   : > { %v9768_v3 = vadd.f32 %v2519_v36, %v2268_v32  ;;  %v9770_v25 = vadd.f32 %v7521_v15, %v2575_v35 }
 0x1cf   : > { %v7444_v12 = vpop.f32.mrf.mxu0  ;;  %v9772_v21 = vpop.f32.mrf.mxu1 }
 0x1d0   : > { %11399 = vst [vmem:[#allocation45_spill] sm:$0xff] %v9768_v3  ;;  %11400 = vst [vmem:[#allocation46_spill] sm:$0xff] %v9772_v21  ;;  %v2577_v34 = vadd.f32 %v7444_v12, %v9637_v24 }
 0x1d1   : > { %v2529_v60 = vpop.f32.mrf.mxu0  ;;  %v7524_v11 = vpop.f32.mrf.mxu1 }
 0x1d2   : > { %v9776_v47 = vadd.f32 %v2529_v60, %v9642_v42  ;;  %v9778_v26 = vadd.f32 %v7524_v11, %v2577_v34 }
 0x1d3   : > { %v7447_v46 = vpop.f32.mrf.mxu0  ;;  %v9780_v5 = vpop.f32.mrf.mxu1 }
 0x1d4   : > { %11401 = vst [vmem:[#allocation47_spill] sm:$0xff] %v9776_v47  ;;  %11402 = vst [vmem:[#allocation48_spill] sm:$0xff] %v9780_v5  ;;  %v2579_v40 = vadd.f32 %v7447_v46, %v9644_v0 }
 0x1d5   : > { %v2539_v38 = vpop.f32.mrf.mxu0  ;;  %v7527_v57 = vpop.f32.mrf.mxu1 }
 0x1d6   : > { %v9784_v20 = vadd.f32 %v2539_v38, %v9646_v27  ;;  %v9786_v33 = vadd.f32 %v7527_v57, %v2579_v40 }
 0x1d7   : > { %v9788_v24 = vpop.f32.mrf.mxu1  ;;  %v7562_v59 = vpop.f32.mrf.mxu0 }
 0x1d8   : > { %11403 = vst [vmem:[#allocation49_spill] sm:$0xff] %v9784_v20  ;;  %11404 = vst [vmem:[#allocation50_spill] sm:$0xff] %v9788_v24  ;;  %v9791_v42 = vadd.f32 %v7562_v59, %v9651_v43 }
 0x1d9   : > { %v9793_v50 = vpop.f32.mrf.mxu0  ;;  %v9795_v22 = vpop.f32.mrf.mxu1 }
 0x1db   : > { %v7565_v13 = vpop.f32.mrf.mxu0  ;;  %v9797_v32 = vpop.f32.mrf.mxu1 }
 0x1dc   : > { %v9800_v0 = vadd.f32 %v7565_v13, %v9658_v49 }
 0x1dd   : > { %v9802_v27 = vpop.f32.mrf.mxu0  ;;  %v9804_v35 = vpop.f32.mrf.mxu1 }
 0x1df   : > { %v7568_v36 = vpop.f32.mrf.mxu0  ;;  %v9809_v43 = vpop.f32.mrf.mxu1 }
 0x1e0   : > { %v9807_v15 = vadd.f32 %v7568_v36, %v9665_v7 }
 0x1e1   : > { %v9811_v12 = vpop.f32.mrf.mxu0  ;;  %v9813_v60 = vpop.f32.mrf.mxu1 }
 0x1e3   : > { %v7571_v34 = vpop.f32.mrf.mxu0  ;;  %v9820_v40 = vpop.f32.mrf.mxu1 }
 0x1e4   : > { %v9816_v11 = vadd.f32 %v7571_v34, %v9672_v53 }
 0x1e5   : > { %v9818_v49 = vpop.f32.mrf.mxu0  ;;  %v9827_v59 = vpop.f32.mrf.mxu1 }
 0x1e7   : > { %v7574_v46 = vpop.f32.mrf.mxu0  ;;  %v9834_v34 = vpop.f32.mrf.mxu1 }
 0x1e8   : > { %v9823_v38 = vadd.f32 %v7574_v46, %v9679_v58 }
 0x1e9   : > { %v9825_v7 = vpop.f32.mrf.mxu0  ;;  %v9841_v46 = vpop.f32.mrf.mxu1 }
 0x1eb   : > { %v7577_v57 = vpop.f32.mrf.mxu0 }
 0x1ec   : > { %v9830_v13 = vadd.f32 %v7577_v57, %v9686_v31  ;;  %v9848_v57 = vpop.f32.mrf.mxu1 }
 0x1ed   : > { %v9832_v36 = vpop.f32.mrf.mxu0 }
 0x1ef   : > { %v7580_v53 = vpop.f32.mrf.mxu0 }
 0x1f0   : > { %v9837_v24 = vadd.f32 %v7580_v53, %v9697_v63  ;;  %v9855_v53 = vpop.f32.mrf.mxu1 }
 0x1f1   : > { %v9839_v20 = vpop.f32.mrf.mxu0 }
 0x1f3   : > { %v7583_v58 = vpop.f32.mrf.mxu0 }
 0x1f4   : > { %v9844_v5 = vadd.f32 %v7583_v58, %v9709_v16  ;;  %v9862_v58 = vpop.f32.mrf.mxu1 }
 0x1f5   : > { %v9846_v47 = vpop.f32.mrf.mxu0 }
 0x1f7   : > { %v7586_v31 = vpop.f32.mrf.mxu0 }
 0x1f8   : > { %v9851_v21 = vadd.f32 %v7586_v31, %v9720_v48  ;;  %v9869_v31 = vpop.f32.mrf.mxu1 }
 0x1f9   : > { %v9853_v3 = vpop.f32.mrf.mxu0 }
 0x1fb   : > { %v7589_v63 = vpop.f32.mrf.mxu0 }
 0x1fc   : > { %v9858_v2 = vadd.f32 %v7589_v63, %v9731_v28  ;;  %v9876_v63 = vpop.f32.mrf.mxu1 }
 0x1fd   : > { %v9860_v10 = vpop.f32.mrf.mxu0 }
 0x1fe   : > { %11405 = vst [vmem:[#allocation51_spill] sm:$0xff] %v9858_v2  ;;  %11406 = vst [vmem:[#allocation52_spill] sm:$0xff] %v9860_v10 }
 0x1ff   : > { %v7592_v16 = vpop.f32.mrf.mxu0 }
 0x200   : > { %v9865_v51 = vadd.f32 %v7592_v16, %v9742_v6  ;;  %v2242_v16 = vadd.f32 %v9518_v56, %v9514_v1 }
 0x201   : > { %v9867_v17 = vpop.f32.mrf.mxu0 }
 0x202   : > { %11407 = vst [vmem:[#allocation53_spill] sm:$0xff] %v9865_v51  ;;  %11408 = vst [vmem:[#allocation54_spill] sm:$0xff] %v9867_v17  ;;  %v9885_v51 = vpop.f32.mrf.mxu1 }
 0x203   : > { %v7595_v48 = vpop.f32.mrf.mxu0 }
 0x204   : > { %v9872_v23 = vadd.f32 %v7595_v48, %v9753_v37  ;;  %v2548_v48 = vadd.f32 %v9649_v30, %v2242_v16 }
 0x205   : > { %v9874_v9 = vpop.f32.mrf.mxu0 }
 0x206   : > { %11409 = vst [vmem:[#allocation55_spill] sm:$0xff] %v9872_v23  ;;  %v2244_v23 = vadd.f32 %v9527_v62, %v9523_v14  ;;  %v11419_v62 = vld [vmem:[#allocation35_spill] sm:$0xff] }
 0x207   : > { %v7598_v28 = vpop.f32.mrf.mxu0 }
 0x208   : > { %v9879_v2 = vadd.f32 %v7598_v28, %v9762_v18  ;;  %v9895_v28 = vpop.f32.mrf.mxu1  ;;  %v2550_v56 = vadd.f32 %v9656_v39, %v2244_v23  ;;  %v11420_v39 = vlaneseq }
 0x209   : > { %v9881_v10 = vpop.f32.mrf.mxu0 }
 0x20a   : > { %11410 = vst [vmem:[#allocation56_spill] sm:$0xff] %v9879_v2  ;;  %11411 = vst [vmem:[#allocation57_spill] sm:$0xff] %v9881_v10  ;;  %v9907_v16 = vpop.f32.mrf.mxu1  ;;  %v3940_v23 = vand.u32 127, %v11420_v39  ;;  %v11426_v39 = vld [vmem:[#allocation29_spill] sm:$0xff] }
 0x20b   : > { %v7601_v6 = vpop.f32.mrf.mxu0 }
 0x20c   : > { %v9888_v17 = vadd.f32 %v7601_v6, %v9770_v25  ;;  %v2886_v25 = vadd.f32 %v9653_v29, %v2548_v48  ;;  %v3531_v29 = vadd.f32 %v9795_v22, %v9791_v42  ;;  %v11422_v48 = vld [vmem:[#allocation27_spill] sm:$0xff]  ;;  %vm3941_vm1 = vcmp.lt.s32.totalorder %v3940_v23, 4  ;;  %v11425_v42 = vld [vmem:[#allocation36_spill] sm:$0xff] }
 0x20d   : > { %v9890_v37 = vpop.f32.mrf.mxu0 }
 0x20e   : > { %11412 = vst [vmem:[#allocation58_spill] sm:$0xff] %v9888_v17  ;;  %11413 = vst [vmem:[#allocation59_spill] sm:$0xff] %v9890_v37  ;;  %v11416_v17 = vld [vmem:[#allocation24_spill] sm:$0xff]  ;;  %v11417_v37 = vld [vmem:[#allocation25_spill] sm:$0xff]  ;;  %v3224_v30 = vadd.f32 %v9793_v50, %v2886_v25 }
 0x20f   : > { %v7604_v18 = vpop.f32.mrf.mxu0  ;;  %v2246_v10 = vadd.f32 %v11417_v37, %v11416_v17  ;;  %v11423_v17 = vld [vmem:[#allocation28_spill] sm:$0xff] }
 0x210   : > { %v9898_v2 = vadd.f32 %v7604_v18, %v9778_v26  ;;  %v2888_v26 = vadd.f32 %v11419_v62, %v2550_v56  ;;  %v2248_v37 = vadd.f32 %v11423_v17, %v11422_v48  ;;  %v11424_v62 = vld [vmem:[#allocation39_spill] sm:$0xff] }
 0x211   : > { %v9901_v1 = vpop.f32.mrf.mxu0 }
 0x212   : > { %11414 = vst [vmem:[#allocation60_spill] sm:$0xff] %v9898_v2  ;;  %11415 = vst [vmem:[#allocation61_spill] sm:$0xff] %v9901_v1  ;;  %v11421_v2 = vld [vmem:[#allocation38_spill] sm:$0xff]  ;;  %v3226_v50 = vadd.f32 %v9802_v27, %v2888_v26  ;;  %v3533_v27 = vadd.f32 %v9804_v35, %v9800_v0 }
 0x213   : > { %v7607_v6 = vpop.f32.mrf.mxu0  ;;  %v2552_v1 = vadd.f32 %v11421_v2, %v2246_v10  ;;  %v9929_v10 = vld [vmem:[%s11265_s2] ss:$0 sm:$0xff] }
 0x214   : > { %v9910_v14 = vadd.f32 %v7607_v6, %v9786_v33  ;;  %v3530_v33 = vadd.f32 %v9797_v32, %v3224_v30  ;;  %v9923_v6 = vpop.f32.mrf.mxu1  ;;  %v11427_v32 = vld [vmem:[#allocation30_spill] sm:$0xff] }
 0x215   : > { %v9913_v18 = vpop.f32.mrf.mxu0  ;;  %v2890_v22 = vadd.f32 %v11425_v42, %v2552_v1  ;;  %v2250_v30 = vadd.f32 %v11427_v32, %v11426_v39  ;;  %v11430_v42 = vld [vmem:[#allocation31_spill] sm:$0xff] }
 0x216   : > { %11418 = vst [vmem:[#allocation24_spill] sm:$0xff] %v9910_v14  ;;  %v2554_v14 = vadd.f32 %v11424_v62, %v2248_v37  ;;  %v9938_v37 = vpop.f32.mrf.mxu1  ;;  %v11428_v62 = vld [vmem:[#allocation23_spill] sm:$0xff] }
 0x217   : > { %v7722_v25 = vpop.f32.mrf.mxu0  ;;  %v3228_v17 = vadd.f32 %v9811_v12, %v2890_v22  ;;  %v9947_v0 = vsel %vm3941_vm1, 1.0, %v11428_v62  ;;  %v3535_v12 = vadd.f32 %v9813_v60, %v9807_v15  ;;  %v11431_v22 = vld [vmem:[#allocation26_spill] sm:$0xff] }
 0x218   : > { %v3869_v56 = vadd.f32 %v7722_v25, %v3531_v29  ;;  %v3532_v29 = vadd.f32 %v9809_v43, %v3226_v50  ;;  %v2892_v35 = vadd.f32 %v9674_v4, %v2554_v14  ;;  %v9962_v14 = vpop.f32.mrf.mxu1 }
 0x219   : > { %v3709_v2 = vpop.f32.mrf.mxu0  ;;  %v3534_v4 = vadd.f32 %v9820_v40, %v3228_v17 }
 0x21a   : > { %v3868_v26 = vadd.f32 %v3709_v2, %v3530_v33  ;;  %v9941_v25 = vadd.f32 %v9929_v10, %v3869_v56  ;;  %v11429_v33 = vld [vmem:[#allocation37_spill] sm:$0xff] }
 0x21b   : > { %v7725_v48 = vpop.f32.mrf.mxu0  ;;  %v2556_v2 = vadd.f32 %v11429_v33, %v2250_v30 }
 0x21c   : > { %v9944_v23 = vadd.f32 %v9929_v10, %v3868_v26  ;;  %v3871_v1 = vadd.f32 %v7725_v48, %v3533_v27  ;;  %v2252_v26 = vadd.f32 %v11431_v22, %v11430_v42  ;;  %v3230_v27 = vadd.f32 %v9818_v49, %v2892_v35 }
 0x21d   : > { %v3719_v43 = vpop.f32.mrf.mxu0  ;;  %v3945_v15 = vmul.f32 %v9947_v0, %v9941_v25 }
 0x21e   : > { %v3944_v50 = vmul.f32 %v9947_v0, %v9944_v23  ;;  %v3870_v56 = vadd.f32 %v3719_v43, %v3532_v29  ;;  %v9959_v39 = vadd.f32 %v9929_v10, %v3871_v1  ;;  %v11432_v29 = vld [vmem:[#allocation40_spill] sm:$0xff]  ;;  %v2558_v62 = vadd.f32 %v9684_v54, %v2252_v26 }
 0x21f   : > { %v7728_v32 = vpop.f32.mrf.mxu0  ;;  %v2894_v48 = vadd.f32 %v11432_v29, %v2556_v2  ;;  %v3537_v1 = vadd.f32 %v9827_v59, %v9816_v11  ;;  %v3536_v33 = vadd.f32 %v9834_v34, %v3230_v27  ;;  %v9979_v2 = vpop.f32.mrf.mxu1 }
 0x220   : > { %v9967_v60 = vadd.f32 %v9929_v10, %v3870_v56  ;;  %v3873_v30 = vadd.f32 %v7728_v32, %v3535_v12  ;;  %v3976_v35 = vadd.f32 %v3945_v15, %v3944_v50  ;;  %v3947_v12 = vmul.f32 %v9947_v0, %v9959_v39  ;;  %v11433_v50 = vld [vmem:[#allocation41_spill] sm:$0xff] }
 0x221   : > { %v3729_v49 = vpop.f32.mrf.mxu0  ;;  %v3232_v43 = vadd.f32 %v9825_v7, %v2894_v48  ;;  %v2896_v22 = vadd.f32 %v11433_v50, %v2558_v62  ;;  %v3539_v7 = vadd.f32 %v9841_v46, %v9823_v38  ;;  %v9997_v48 = vpop.f32.mrf.mxu1 }
 0x222   : > { %v3946_v40 = vmul.f32 %v9947_v0, %v9967_v60  ;;  %v3872_v17 = vadd.f32 %v3729_v49, %v3534_v4  ;;  %v9982_v42 = vadd.f32 %v9929_v10, %v3873_v30 }
 0x223   : > { %v7731_v56 = vpop.f32.mrf.mxu0  ;;  %v3538_v4 = vadd.f32 %v9848_v57, %v3232_v43  ;;  %v3234_v15 = vadd.f32 %v9832_v36, %v2896_v22  ;;  %v3541_v36 = vadd.f32 %v9855_v53, %v9830_v13 }
 0x224   : > { %v3977_v54 = vadd.f32 %v3976_v35, %v3946_v40  ;;  %v9985_v11 = vadd.f32 %v9929_v10, %v3872_v17  ;;  %v3875_v59 = vadd.f32 %v7731_v56, %v3537_v1  ;;  %v3949_v62 = vmul.f32 %v9947_v0, %v9982_v42 }
 0x225   : > { %v3739_v26 = vpop.f32.mrf.mxu0  ;;  %v2898_v1 = vadd.f32 %v9699_v44, %v9695_v41 }
 0x226   : > { %v3948_v34 = vmul.f32 %v9947_v0, %v9985_v11  ;;  %v3978_v27 = vadd.f32 %v3977_v54, %v3947_v12  ;;  %v3874_v32 = vadd.f32 %v3739_v26, %v3536_v33  ;;  %v9995_v30 = vadd.f32 %v9929_v10, %v3875_v59  ;;  %v10014_v54 = vpop.f32.mrf.mxu1 }
 0x227   : > { %v7734_v29 = vpop.f32.mrf.mxu0  ;;  %v3540_v33 = vadd.f32 %v9862_v58, %v3234_v15  ;;  %v3236_v43 = vadd.f32 %v9839_v20, %v2898_v1  ;;  %v2900_v59 = vadd.f32 %v9711_v55, %v9707_v8  ;;  %v3543_v20 = vadd.f32 %v9869_v31, %v9837_v24 }
 0x228   : > { %v3979_v49 = vadd.f32 %v3978_v27, %v3948_v34  ;;  %v10002_v38 = vadd.f32 %v9929_v10, %v3874_v32  ;;  %v3877_v46 = vadd.f32 %v7734_v29, %v3539_v7  ;;  %v3951_v12 = vmul.f32 %v9947_v0, %v9995_v30 }
 0x229   : > { %v3749_v57 = vpop.f32.mrf.mxu0  ;;  %v3542_v7 = vadd.f32 %v9876_v63, %v3236_v43  ;;  %v3238_v34 = vadd.f32 %v9846_v47, %v2900_v59  ;;  %v2902_v15 = vadd.f32 %v9722_v61, %v9718_v19  ;;  %v3545_v47 = vadd.f32 %v9885_v51, %v9844_v5 }
 0x22a   : > { %v3950_v35 = vmul.f32 %v9947_v0, %v10002_v38  ;;  %v3980_v40 = vadd.f32 %v3979_v49, %v3949_v62  ;;  %v3876_v17 = vadd.f32 %v3749_v57, %v3538_v4  ;;  %v10017_v44 = vadd.f32 %v9929_v10, %v3877_v46  ;;  %v10033_v4 = vpop.f32.mrf.mxu1 }
 0x22b   : > { %v7737_v56 = vpop.f32.mrf.mxu0  ;;  %v3544_v46 = vadd.f32 %v9895_v28, %v3238_v34  ;;  %v3240_v1 = vadd.f32 %v9853_v3, %v2902_v15  ;;  %v3547_v3 = vadd.f32 %v9907_v16, %v9851_v21 }
 0x22c   : > { %v3981_v41 = vadd.f32 %v3980_v40, %v3950_v35  ;;  %v10020_v13 = vadd.f32 %v9929_v10, %v3876_v17  ;;  %v3879_v53 = vadd.f32 %v7737_v56, %v3541_v36  ;;  %v3953_v8 = vmul.f32 %v9947_v0, %v10017_v44  ;;  %v10050_v35 = vpop.f32.mrf.mxu1  ;;  %v11434_v56 = vld [vmem:[#allocation52_spill] sm:$0xff] }
 0x22d   : > { %v3759_v58 = vpop.f32.mrf.mxu0  ;;  %v2904_v40 = vadd.f32 %v9733_v45, %v9729_v52 }
 0x22e   : > { %v3952_v50 = vmul.f32 %v9947_v0, %v10020_v13  ;;  %v3982_v22 = vadd.f32 %v3981_v41, %v3951_v12  ;;  %v3878_v26 = vadd.f32 %v3759_v58, %v3540_v33  ;;  %v10031_v27 = vadd.f32 %v9929_v10, %v3879_v53  ;;  %v3491_v58 = vpop.f32.mrf.mxu1 }
 0x22f   : > { %v7740_v32 = vpop.f32.mrf.mxu0  ;;  %v3546_v12 = vadd.f32 %v9923_v6, %v3240_v1  ;;  %v3242_v41 = vadd.f32 %v11434_v56, %v2904_v40  ;;  %v11437_v6 = vld [vmem:[#allocation51_spill] sm:$0xff]  ;;  %v11439_v1 = vld [vmem:[#allocation20_spill] sm:$0xff] }
 0x230   : > { %v3983_v55 = vadd.f32 %v3982_v22, %v3952_v50  ;;  %v10038_v24 = vadd.f32 %v9929_v10, %v3878_v26  ;;  %v3881_v31 = vadd.f32 %v7740_v32, %v3543_v20  ;;  %v3955_v57 = vmul.f32 %v9947_v0, %v10031_v27  ;;  %v11435_v20 = vld [vmem:[#allocation19_spill] sm:$0xff]  ;;  %v11436_v50 = vld [vmem:[#allocation42_spill] sm:$0xff] }
 0x231   : > { %v3769_v63 = vpop.f32.mrf.mxu0  ;;  %v2906_v22 = vadd.f32 %v11436_v50, %v11435_v20 }
 0x232   : > { %v3954_v29 = vmul.f32 %v9947_v0, %v10038_v24  ;;  %v3984_v62 = vadd.f32 %v3983_v55, %v3953_v8  ;;  %v3880_v49 = vadd.f32 %v3769_v63, %v3542_v7  ;;  %v10053_v61 = vadd.f32 %v9929_v10, %v3881_v31  ;;  %v11438_v31 = vld [vmem:[#allocation54_spill] sm:$0xff] }
 0x233   : > { %v7743_v36 = vpop.f32.mrf.mxu0  ;;  %v3549_v7 = vadd.f32 %v9938_v37, %v11437_v6  ;;  %v3548_v55 = vadd.f32 %v9962_v14, %v3242_v41  ;;  %v3244_v15 = vadd.f32 %v11438_v31, %v2906_v22  ;;  %v11441_v14 = vld [vmem:[#allocation53_spill] sm:$0xff] }
 0x234   : > { %v3985_v19 = vadd.f32 %v3984_v62, %v3954_v29  ;;  %v10056_v51 = vadd.f32 %v9929_v10, %v3880_v49  ;;  %v3883_v5 = vadd.f32 %v7743_v36, %v3545_v47  ;;  %v3957_v52 = vmul.f32 %v9947_v0, %v10053_v61  ;;  %v7681_v29 = vpop.f32.mrf.mxu1 }
 0x235   : > { %v3779_v28 = vpop.f32.mrf.mxu0 }
 0x236   : > { %v3956_v17 = vmul.f32 %v9947_v0, %v10056_v51  ;;  %v3986_v33 = vadd.f32 %v3985_v19, %v3955_v57  ;;  %v3882_v43 = vadd.f32 %v3779_v28, %v3544_v46  ;;  %v10067_v53 = vadd.f32 %v9929_v10, %v3883_v5  ;;  %v11440_v57 = vld [vmem:[#allocation21_spill] sm:$0xff]  ;;  %v3501_v56 = vpop.f32.mrf.mxu1 }
 0x237   : > { %v7746_v59 = vpop.f32.mrf.mxu0  ;;  %v2908_v36 = vadd.f32 %v11440_v57, %v11439_v1  ;;  %v3551_v5 = vadd.f32 %v9979_v2, %v11441_v14 }
 0x238   : > { %v3987_v45 = vadd.f32 %v3986_v33, %v3956_v17  ;;  %v10072_v21 = vadd.f32 %v9929_v10, %v3882_v43  ;;  %v3885_v16 = vadd.f32 %v7746_v59, %v3547_v3  ;;  %v3959_v63 = vmul.f32 %v9947_v0, %v10067_v53  ;;  %v7684_v31 = vpop.f32.mrf.mxu1 }
 0x239   : > { %v3789_v26 = vpop.f32.mrf.mxu0  ;;  %v3550_v17 = vadd.f32 %v9997_v48, %v3244_v15  ;;  %v3246_v33 = vadd.f32 %v9874_v9, %v2908_v36  ;;  %v11444_v48 = vld [vmem:[#allocation55_spill] sm:$0xff] }
 0x23a   : > { %v3958_v34 = vmul.f32 %v9947_v0, %v10072_v21  ;;  %v3988_v32 = vadd.f32 %v3987_v45, %v3957_v52  ;;  %v3884_v8 = vadd.f32 %v3789_v26, %v3546_v12  ;;  %v10085_v49 = vadd.f32 %v9929_v10, %v3885_v16  ;;  %v11442_v45 = vld [vmem:[#allocation43_spill] sm:$0xff]  ;;  %v11443_v16 = vld [vmem:[#allocation44_spill] sm:$0xff] }
 0x23b   : > { %v7749_v47 = vpop.f32.mrf.mxu0  ;;  %v2910_v20 = vadd.f32 %v11443_v16, %v11442_v45  ;;  %v3553_v9 = vadd.f32 %v10014_v54, %v11444_v48  ;;  %v11450_v45 = vld [vmem:[#allocation47_spill] sm:$0xff]  ;;  %v11451_v16 = vld [vmem:[#allocation48_spill] sm:$0xff] }
 0x23c   : > { %v3989_v62 = vadd.f32 %v3988_v32, %v3958_v34  ;;  %v10088_v37 = vadd.f32 %v9929_v10, %v3884_v8  ;;  %v3887_v46 = vadd.f32 %v7749_v47, %v3549_v7  ;;  %v3961_v41 = vmul.f32 %v9947_v0, %v10085_v49  ;;  %v11445_v34 = vld [vmem:[#allocation57_spill] sm:$0xff] }
 0x23d   : > { %v3799_v19 = vpop.f32.mrf.mxu0  ;;  %v3552_v7 = vadd.f32 %v10033_v4, %v3246_v33  ;;  %v3248_v32 = vadd.f32 %v11445_v34, %v2910_v20  ;;  %v11448_v4 = vld [vmem:[#allocation56_spill] sm:$0xff]  ;;  %v2914_v20 = vadd.f32 %v11451_v16, %v11450_v45 }
 0x23e   : > { %v3960_v40 = vmul.f32 %v9947_v0, %v10088_v37  ;;  %v3990_v28 = vadd.f32 %v3989_v62, %v3959_v63  ;;  %v3886_v3 = vadd.f32 %v3799_v19, %v3548_v55  ;;  %v10099_v43 = vadd.f32 %v9929_v10, %v3887_v46  ;;  %v11446_v62 = vld [vmem:[#allocation45_spill] sm:$0xff]  ;;  %v11447_v46 = vld [vmem:[#allocation46_spill] sm:$0xff] }
 0x23f   : > { %v7752_v12 = vpop.f32.mrf.mxu0  ;;  %v2912_v1 = vadd.f32 %v11447_v46, %v11446_v62  ;;  %v3555_v36 = vadd.f32 %v10050_v35, %v11448_v4  ;;  %v11454_v46 = vld [vmem:[#allocation49_spill] sm:$0xff] }
 0x240   : > { %v3991_v59 = vadd.f32 %v3990_v28, %v3960_v40  ;;  %v10104_v2 = vadd.f32 %v9929_v10, %v3886_v3  ;;  %v3889_v52 = vadd.f32 %v7752_v12, %v3551_v5  ;;  %v3963_v8 = vmul.f32 %v9947_v0, %v10099_v43  ;;  %v11449_v28 = vld [vmem:[#allocation59_spill] sm:$0xff]  ;;  %v3511_v12 = vpop.f32.mrf.mxu1 }
 0x241   : > { %v3809_v50 = vpop.f32.mrf.mxu0  ;;  %v3554_v40 = vadd.f32 %v3491_v58, %v3248_v32  ;;  %v3250_v3 = vadd.f32 %v11449_v28, %v2912_v1  ;;  %v11452_v58 = vld [vmem:[#allocation58_spill] sm:$0xff] }
 0x242   : > { %v3962_v22 = vmul.f32 %v9947_v0, %v10104_v2  ;;  %v3992_v26 = vadd.f32 %v3991_v59, %v3961_v41  ;;  %v3888_v6 = vadd.f32 %v3809_v50, %v3550_v17  ;;  %v10117_v63 = vadd.f32 %v9929_v10, %v3889_v52  ;;  %v11455_v1 = vld [vmem:[#allocation50_spill] sm:$0xff] }
 0x243   : > { %v7755_v55 = vpop.f32.mrf.mxu0  ;;  %v3557_v48 = vadd.f32 %v7681_v29, %v11452_v58 }
 0x244   : > { %v3993_v15 = vadd.f32 %v3992_v26, %v3962_v22  ;;  %v10120_v54 = vadd.f32 %v9929_v10, %v3888_v6  ;;  %v3891_v47 = vadd.f32 %v7755_v55, %v3553_v9  ;;  %v3965_v41 = vmul.f32 %v9947_v0, %v10117_v63  ;;  %v7687_v55 = vpop.f32.mrf.mxu1 }
 0x245   : > { %v3819_v57 = vpop.f32.mrf.mxu0  ;;  %v3556_v6 = vadd.f32 %v3501_v56, %v3250_v3  ;;  %v11456_v56 = vld [vmem:[#allocation60_spill] sm:$0xff] }
 0x246   : > { %v3964_v19 = vmul.f32 %v9947_v0, %v10120_v54  ;;  %v3994_v14 = vadd.f32 %v3993_v15, %v3963_v8  ;;  %v3890_v5 = vadd.f32 %v3819_v57, %v3552_v7  ;;  %v10130_v17 = vadd.f32 %v9929_v10, %v3891_v47  ;;  %v11453_v7 = vld [vmem:[#allocation61_spill] sm:$0xff] }
 0x247   : > { %v7758_v33 = vpop.f32.mrf.mxu0  ;;  %v3252_v34 = vadd.f32 %v11453_v7, %v2914_v20  ;;  %v2916_v57 = vadd.f32 %v11455_v1, %v11454_v46  ;;  %v11457_v20 = vld [vmem:[#allocation24_spill] sm:$0xff] }
 0x248   : > { %v3995_v59 = vadd.f32 %v3994_v14, %v3964_v19  ;;  %v10135_v52 = vadd.f32 %v9929_v10, %v3890_v5  ;;  %v3893_v35 = vadd.f32 %v7758_v33, %v3555_v36  ;;  %v3967_v32 = vmul.f32 %v9947_v0, %v10130_v17 }
 0x249   : > { %v3829_v50 = vpop.f32.mrf.mxu0  ;;  %v3559_v36 = vadd.f32 %v7684_v31, %v11456_v56  ;;  %v3254_v28 = vadd.f32 %v9913_v18, %v2916_v57 }
 0x24a   : > { %v3966_v9 = vmul.f32 %v9947_v0, %v10135_v52  ;;  %v3996_v22 = vadd.f32 %v3995_v59, %v3965_v41  ;;  %v3892_v26 = vadd.f32 %v3829_v50, %v3554_v40  ;;  %v10146_v47 = vadd.f32 %v9929_v10, %v3893_v35  ;;  %v3521_v41 = vpop.f32.mrf.mxu1 }
 0x24b   : > { %v7761_v8 = vpop.f32.mrf.mxu0  ;;  %v3558_v40 = vadd.f32 %v3511_v12, %v3252_v34  ;;  %v3561_v50 = vadd.f32 %v7687_v55, %v11457_v20 }
 0x24c   : > { %v3997_v15 = vadd.f32 %v3996_v22, %v3966_v9  ;;  %v10149_v62 = vadd.f32 %v9929_v10, %v3892_v26  ;;  %v3895_v29 = vadd.f32 %v7761_v8, %v3557_v48  ;;  %v3969_v59 = vmul.f32 %v9947_v0, %v10146_v47 }
 0x24d   : > { %v3839_v4 = vpop.f32.mrf.mxu0  ;;  %v3560_v48 = vadd.f32 %v3521_v41, %v3254_v28 }
 0x24e   : > { %v3968_v19 = vmul.f32 %v9947_v0, %v10149_v62  ;;  %v3998_v14 = vadd.f32 %v3997_v15, %v3967_v32  ;;  %v3894_v5 = vadd.f32 %v3839_v4, %v3556_v6  ;;  %v10158_v3 = vadd.f32 %v9929_v10, %v3895_v29 }
 0x24f   : > { %v7764_v33 = vpop.f32.mrf.mxu0 }
 0x250   : > { %v3999_v35 = vadd.f32 %v3998_v14, %v3968_v19  ;;  %v10163_v45 = vadd.f32 %v9929_v10, %v3894_v5  ;;  %v3897_v31 = vadd.f32 %v7764_v33, %v3559_v36  ;;  %v3971_v9 = vmul.f32 %v9947_v0, %v10158_v3 }
 0x251   : > { %v3849_v16 = vpop.f32.mrf.mxu0 }
 0x252   : > { %v3970_v12 = vmul.f32 %v9947_v0, %v10163_v45  ;;  %v4000_v18 = vadd.f32 %v3999_v35, %v3969_v59  ;;  %v3896_v58 = vadd.f32 %v3849_v16, %v3558_v40  ;;  %v10171_v6 = vadd.f32 %v9929_v10, %v3897_v31 }
 0x253   : > { %v7767_v22 = vpop.f32.mrf.mxu0 }
 0x254   : > { %v4001_v26 = vadd.f32 %v4000_v18, %v3970_v12  ;;  %v10174_v7 = vadd.f32 %v9929_v10, %v3896_v58  ;;  %v3899_v34 = vadd.f32 %v7767_v22, %v3561_v50  ;;  %v3973_v29 = vmul.f32 %v9947_v0, %v10171_v6 }
 0x255   : > { %v3859_v32 = vpop.f32.mrf.mxu0 }
 0x256   : > { %v3972_v8 = vmul.f32 %v9947_v0, %v10174_v7  ;;  %v3898_v55 = vadd.f32 %v3859_v32, %v3560_v48  ;;  %v4002_v15 = vadd.f32 %v4001_v26, %v3971_v9  ;;  %v10181_v46 = vadd.f32 %v9929_v10, %v3899_v34 }
 0x258   : > { %v10184_v1 = vadd.f32 %v9929_v10, %v3898_v55  ;;  %v4003_v57 = vadd.f32 %v4002_v15, %v3972_v8  ;;  %v3975_v36 = vmul.f32 %v9947_v0, %v10181_v46 }
 0x25a   : > { %v3974_v4 = vmul.f32 %v9947_v0, %v10184_v1  ;;  %v4004_v56 = vadd.f32 %v4003_v57, %v3973_v29 }
 0x25c   : > { %v4005_v19 = vadd.f32 %v4004_v56, %v3974_v4 }
 0x25e   : > { %v4006_v14 = vadd.f32 %v4005_v19, %v3975_v36 }
 0x260   : > { %4007 = vadd.xlane.f32.xlu0 %v4006_v14 }
 0x2e9   : > { %v4008_v5 = vpop.xlane.xlu0 %4007 }
 0x2ea   : > { %v4009_v40 = vrot.slane %v4008_v5, 4 }
 0x2ec   : > { %v4010_v28 = vadd.f32 %v4009_v40, %v4008_v5 }
 0x2ee   : > { %v4011_v33 = vrot.slane %v4010_v28, 2 }
 0x2f0   : > { %v4012_v41 = vadd.f32 %v4011_v33, %v4010_v28 }
 0x2f2   : > { %v4013_v59 = vrot.slane %v4012_v41, 1 }
 0x2f4   : > { %v4014_v35 = vadd.f32 %v4013_v59, %v4012_v41 }
 0x2f6   : > { %8196 = vpush %v4014_v35 }
 0x327   : > { %s8197_s20 = spop %8196 }
 0x328   : > { %v4016_v10 = vstv %s8197_s20 }
 0x329   : > { %v10190_v31 = vmul.f32 0.0009765625, %v4016_v10 }
 0x32b   : > { %v4018_v16 = vsub.f32 %v9944_v23, %v10190_v31  ;;  %v4019_v20 = vsub.f32 %v9941_v25, %v10190_v31  ;;  %v4020_v50 = vsub.f32 %v9967_v60, %v10190_v31  ;;  %v4021_v58 = vsub.f32 %v9959_v39, %v10190_v31 }
 0x32c   : > { %v4022_v48 = vsub.f32 %v9985_v11, %v10190_v31  ;;  %v4023_v9 = vsub.f32 %v9982_v42, %v10190_v31  ;;  %v4024_v39 = vsub.f32 %v10002_v38, %v10190_v31  ;;  %v4025_v32 = vsub.f32 %v9995_v30, %v10190_v31 }
 0x32d   : > { %v10199_v12 = vmul.f32 %v9947_v0, %v4018_v16  ;;  %v10202_v18 = vmul.f32 %v9947_v0, %v4019_v20  ;;  %v10209_v23 = vmul.f32 %v9947_v0, %v4020_v50  ;;  %v10218_v22 = vmul.f32 %v9947_v0, %v4021_v58 }
 0x32e   : > { %v10223_v11 = vmul.f32 %v9947_v0, %v4022_v48  ;;  %v10230_v8 = vmul.f32 %v9947_v0, %v4023_v9  ;;  %v4026_v38 = vsub.f32 %v10020_v13, %v10190_v31  ;;  %v10237_v15 = vmul.f32 %v9947_v0, %v4024_v39 }
 0x32f   : > { %v4082_v25 = vmul.f32 %v10199_v12, %v10199_v12  ;;  %v4083_v60 = vmul.f32 %v10202_v18, %v10202_v18  ;;  %v4084_v26 = vmul.f32 %v10209_v23, %v10209_v23  ;;  %v4085_v42 = vmul.f32 %v10218_v22, %v10218_v22 }
 0x330   : > { %v4086_v29 = vmul.f32 %v10223_v11, %v10223_v11  ;;  %v4027_v30 = vsub.f32 %v10017_v44, %v10190_v31  ;;  %v10244_v4 = vmul.f32 %v9947_v0, %v4025_v32  ;;  %v4087_v56 = vmul.f32 %v10230_v8, %v10230_v8 }
 0x331   : > { %v4114_v34 = vadd.f32 %v4083_v60, %v4082_v25  ;;  %v4028_v13 = vsub.f32 %v10038_v24, %v10190_v31  ;;  %v10251_v19 = vmul.f32 %v9947_v0, %v4026_v38  ;;  %v4088_v14 = vmul.f32 %v10237_v15, %v10237_v15 }
 0x332   : > { %v4029_v44 = vsub.f32 %v10031_v27, %v10190_v31  ;;  %v10258_v40 = vmul.f32 %v9947_v0, %v4027_v30  ;;  %v4089_v28 = vmul.f32 %v10244_v4, %v10244_v4  ;;  %v4030_v24 = vsub.f32 %v10056_v51, %v10190_v31 }
 0x333   : > { %v4115_v55 = vadd.f32 %v4114_v34, %v4084_v26  ;;  %v10265_v41 = vmul.f32 %v9947_v0, %v4028_v13  ;;  %v4090_v59 = vmul.f32 %v10251_v19, %v10251_v19  ;;  %v4031_v27 = vsub.f32 %v10053_v61, %v10190_v31 }
 0x334   : > { %v10272_v10 = vmul.f32 %v9947_v0, %v4029_v44  ;;  %v4091_v16 = vmul.f32 %v10258_v40, %v10258_v40  ;;  %v4032_v51 = vsub.f32 %v10072_v21, %v10190_v31  ;;  %v10279_v50 = vmul.f32 %v9947_v0, %v4030_v24 }
 0x335   : > { %v4116_v57 = vadd.f32 %v4115_v55, %v4085_v42  ;;  %v4092_v58 = vmul.f32 %v10265_v41, %v10265_v41  ;;  %v4033_v61 = vsub.f32 %v10067_v53, %v10190_v31  ;;  %v10286_v25 = vmul.f32 %v9947_v0, %v4031_v27 }
 0x336   : > { %v4093_v60 = vmul.f32 %v10272_v10, %v10272_v10  ;;  %v4034_v21 = vsub.f32 %v10088_v37, %v10190_v31  ;;  %v10293_v39 = vmul.f32 %v9947_v0, %v4032_v51  ;;  %v4094_v26 = vmul.f32 %v10279_v50, %v10279_v50 }
 0x337   : > { %v4117_v36 = vadd.f32 %v4116_v57, %v4086_v29  ;;  %v4035_v53 = vsub.f32 %v10085_v49, %v10190_v31  ;;  %v10300_v32 = vmul.f32 %v9947_v0, %v4033_v61  ;;  %v4095_v42 = vmul.f32 %v10286_v25, %v10286_v25 }
 0x338   : > { %v4036_v37 = vsub.f32 %v10104_v2, %v10190_v31  ;;  %v10307_v38 = vmul.f32 %v9947_v0, %v4034_v21  ;;  %v4096_v29 = vmul.f32 %v10293_v39, %v10293_v39  ;;  %v4037_v49 = vsub.f32 %v10099_v43, %v10190_v31 }
 0x339   : > { %v4118_v5 = vadd.f32 %v4117_v36, %v4087_v56  ;;  %v10314_v30 = vmul.f32 %v9947_v0, %v4035_v53  ;;  %v4097_v56 = vmul.f32 %v10300_v32, %v10300_v32  ;;  %v4038_v2 = vsub.f32 %v10120_v54, %v10190_v31 }
 0x33a   : > { %v10321_v13 = vmul.f32 %v9947_v0, %v4036_v37  ;;  %v4039_v43 = vsub.f32 %v10117_v63, %v10190_v31  ;;  %v10328_v44 = vmul.f32 %v9947_v0, %v4037_v49  ;;  %v4040_v54 = vsub.f32 %v10135_v52, %v10190_v31 }
 0x33b   : > { %v4119_v33 = vadd.f32 %v4118_v5, %v4088_v14  ;;  %v4098_v14 = vmul.f32 %v10307_v38, %v10307_v38  ;;  %v10335_v24 = vmul.f32 %v9947_v0, %v4038_v2  ;;  %v4041_v63 = vsub.f32 %v10130_v17, %v10190_v31 }
 0x33c   : > { %v10342_v27 = vmul.f32 %v9947_v0, %v4039_v43  ;;  %v4042_v52 = vsub.f32 %v10149_v62, %v10190_v31  ;;  %v10349_v51 = vmul.f32 %v9947_v0, %v4040_v54  ;;  %v4043_v17 = vsub.f32 %v10146_v47, %v10190_v31 }
 0x33d   : > { %v4120_v35 = vadd.f32 %v4119_v33, %v4089_v28  ;;  %v4099_v28 = vmul.f32 %v10314_v30, %v10314_v30  ;;  %v10356_v61 = vmul.f32 %v9947_v0, %v4041_v63  ;;  %v4044_v62 = vsub.f32 %v10163_v45, %v10190_v31 }
 0x33e   : > { %v10363_v21 = vmul.f32 %v9947_v0, %v4042_v52  ;;  %v4045_v47 = vsub.f32 %v10158_v3, %v10190_v31  ;;  %v10370_v53 = vmul.f32 %v9947_v0, %v4043_v17  ;;  %v4046_v45 = vsub.f32 %v10174_v7, %v10190_v31 }
 0x33f   : > { %v4121_v20 = vadd.f32 %v4120_v35, %v4090_v59  ;;  %v4100_v59 = vmul.f32 %v10321_v13, %v10321_v13  ;;  %v10377_v37 = vmul.f32 %v9947_v0, %v4044_v62  ;;  %v4047_v3 = vsub.f32 %v10171_v6, %v10190_v31 }
 0x340   : > { %v10384_v49 = vmul.f32 %v9947_v0, %v4045_v47  ;;  %v4048_v7 = vsub.f32 %v10184_v1, %v10190_v31  ;;  %v10391_v2 = vmul.f32 %v9947_v0, %v4046_v45  ;;  %v4049_v6 = vsub.f32 %v10181_v46, %v10190_v31  ;;  %v4846_v47 = vld [vmem:[#allocation9 + $0xf0] sm:$0xff]  ;;  %v4843_v45 = vld [vmem:[#allocation9 + $0xd8] sm:$0xff] }
 0x341   : > { %v4122_v48 = vadd.f32 %v4121_v20, %v4091_v16  ;;  %v4101_v16 = vmul.f32 %v10328_v44, %v10328_v44  ;;  %v10398_v43 = vmul.f32 %v9947_v0, %v4047_v3  ;;  %v4841_v3 = vld [vmem:[#allocation9 + $0xc8] sm:$0xff] }
 0x342   : > { %v10403_v54 = vmul.f32 %v9947_v0, %v4048_v7  ;;  %v4110_v1 = vmul.f32 %v10391_v2, %v10391_v2  ;;  %v5088_v7 = vld [vmem:[#allocation9 + $0x168] sm:$0xff] }
 0x343   : > { %v4123_v9 = vadd.f32 %v4122_v48, %v4092_v58  ;;  %v4102_v58 = vmul.f32 %v10335_v24, %v10335_v24  ;;  %v4111_v46 = vmul.f32 %v10398_v43, %v10398_v43 }
 0x344   : > { %v4112_v63 = vmul.f32 %v10403_v54, %v10403_v54 }
 0x345   : > { %v4124_v34 = vadd.f32 %v4123_v9, %v4093_v60  ;;  %v4103_v60 = vmul.f32 %v10342_v27, %v10342_v27 }
 0x347   : > { %v4125_v55 = vadd.f32 %v4124_v34, %v4094_v26  ;;  %v4104_v26 = vmul.f32 %v10349_v51, %v10349_v51 }
 0x349   : > { %v4126_v57 = vadd.f32 %v4125_v55, %v4095_v42  ;;  %v4105_v42 = vmul.f32 %v10356_v61, %v10356_v61 }
 0x34b   : > { %v4127_v36 = vadd.f32 %v4126_v57, %v4096_v29  ;;  %v4106_v29 = vmul.f32 %v10363_v21, %v10363_v21 }
 0x34d   : > { %v4128_v5 = vadd.f32 %v4127_v36, %v4097_v56  ;;  %v4107_v56 = vmul.f32 %v10370_v53, %v10370_v53 }
 0x34f   : > { %v4129_v33 = vadd.f32 %v4128_v5, %v4098_v14  ;;  %v4108_v14 = vmul.f32 %v10377_v37, %v10377_v37 }
 0x351   : > { %v4130_v35 = vadd.f32 %v4129_v33, %v4099_v28  ;;  %v4109_v28 = vmul.f32 %v10384_v49, %v10384_v49 }
 0x353   : > { %v4131_v20 = vadd.f32 %v4130_v35, %v4100_v59  ;;  %v10408_v35 = vmul.f32 %v9947_v0, %v4049_v6  ;;  %v4838_v6 = vld [vmem:[#allocation9 + $0xb0] sm:$0xff] }
 0x355   : > { %v4132_v48 = vadd.f32 %v4131_v20, %v4101_v16  ;;  %v4113_v20 = vmul.f32 %v10408_v35, %v10408_v35 }
 0x357   : > { %v4133_v9 = vadd.f32 %v4132_v48, %v4102_v58 }
 0x359   : > { %v4134_v34 = vadd.f32 %v4133_v9, %v4103_v60 }
 0x35b   : > { %v4135_v55 = vadd.f32 %v4134_v34, %v4104_v26  ;;  %v4847_v34 = vld [vmem:[#allocation9 + $0xf8] sm:$0xff] }
 0x35c   : > { %7768 = vmatprep.subr.mxu1 %v4847_v34 }
 0x35d   : > { %v4136_v57 = vadd.f32 %v4135_v55, %v4105_v42  ;;  %7769 = vmatpush3.msra.mxu1 %v4847_v34  ;;  %v4845_v42 = vld [vmem:[#allocation9 + $0xe8] sm:$0xff]  ;;  %v4844_v55 = vld [vmem:[#allocation9 + $0xe0] sm:$0xff] }
 0x35e   : > { %7770 = vmatprep.subr.mxu1 %v4846_v47 }
 0x35f   : > { %v4137_v36 = vadd.f32 %v4136_v57, %v4106_v29  ;;  %7771 = vmatpush3.msra.mxu1 %v4846_v47  ;;  %v4842_v29 = vld [vmem:[#allocation9 + $0xd0] sm:$0xff]  ;;  %v5090_v57 = vld [vmem:[#allocation9 + $0x178] sm:$0xff] }
 0x360   : > { %7772 = vmatprep.subr.mxu1 %v4845_v42  ;;  %7856 = vmatprep.subr.mxu0 %v5090_v57  ;;  %v5077_v47 = vld [vmem:[#allocation9 + $0x110] sm:$0xff] }
 0x361   : > { %v4138_v5 = vadd.f32 %v4137_v36, %v4107_v56  ;;  %7773 = vmatpush3.msra.mxu1 %v4845_v42  ;;  %7857 = vmatpush3.msra.mxu0 %v5090_v57  ;;  %v5089_v56 = vld [vmem:[#allocation9 + $0x170] sm:$0xff]  ;;  %v4840_v36 = vld [vmem:[#allocation9 + $0xc0] sm:$0xff]  ;;  %v5076_v42 = vld [vmem:[#allocation9 + $0x108] sm:$0xff] }
 0x362   : > { %7774 = vmatprep.subr.mxu1 %v4844_v55  ;;  %7858 = vmatprep.subr.mxu0 %v5089_v56 }
 0x363   : > { %v4139_v33 = vadd.f32 %v4138_v5, %v4108_v14  ;;  %7775 = vmatpush3.msra.mxu1 %v4844_v55  ;;  %7859 = vmatpush3.msra.mxu0 %v5089_v56  ;;  %v4839_v14 = vld [vmem:[#allocation9 + $0xb8] sm:$0xff]  ;;  %v5087_v5 = vld [vmem:[#allocation9 + $0x160] sm:$0xff] }
 0x364   : > { %7776 = vmatprep.subr.mxu1 %v4843_v45  ;;  %7860 = vmatprep.subr.mxu0 %v5088_v7  ;;  %v5075_v55 = vld [vmem:[#allocation9 + $0x100] sm:$0xff] }
 0x365   : > { %v4140_v59 = vadd.f32 %v4139_v33, %v4109_v28  ;;  %7777 = vmatpush3.msra.mxu1 %v4843_v45  ;;  %7861 = vmatpush3.msra.mxu0 %v5088_v7  ;;  %v5086_v28 = vld [vmem:[#allocation9 + $0x158] sm:$0xff]  ;;  %v4837_v33 = vld [vmem:[#allocation9 + $0xa8] sm:$0xff]  ;;  %v10429_v7 = vld [vmem:[%s11266_s3] ss:$0 sm:$0xff] }
 0x366   : > { %7778 = vmatprep.subr.mxu1 %v4842_v29  ;;  %7862 = vmatprep.subr.mxu0 %v5087_v5  ;;  %v10419_v45 = vld [vmem:[#allocation9 + $0x278] sm:$0xff] }
 0x367   : > { %v4141_v31 = vadd.f32 %v4140_v59, %v4110_v1  ;;  %7779 = vmatpush3.msra.mxu1 %v4842_v29  ;;  %7863 = vmatpush3.msra.mxu0 %v5087_v5  ;;  %v5085_v1 = vld [vmem:[#allocation9 + $0x150] sm:$0xff]  ;;  %v4836_v59 = vld [vmem:[#allocation9 + $0xa0] sm:$0xff]  ;;  %11458 = vst [vmem:[#allocation25_spill] sm:$0xff] %v10419_v45 }
 0x368   : > { %7780 = vmatprep.subr.mxu1 %v4841_v3  ;;  %7864 = vmatprep.subr.mxu0 %v5086_v28 }
 0x369   : > { %v4142_v16 = vadd.f32 %v4141_v31, %v4111_v46  ;;  %7781 = vmatpush3.msra.mxu1 %v4841_v3  ;;  %7865 = vmatpush3.msra.mxu0 %v5086_v28  ;;  %v5084_v46 = vld [vmem:[#allocation9 + $0x148] sm:$0xff]  ;;  %v4835_v31 = vld [vmem:[#allocation9 + $0x98] sm:$0xff] }
 0x36a   : > { %7782 = vmatprep.subr.mxu1 %v4840_v36  ;;  %7866 = vmatprep.subr.mxu0 %v5085_v1 }
 0x36b   : > { %v4143_v52 = vadd.f32 %v4142_v16, %v4112_v63  ;;  %7783 = vmatpush3.msra.mxu1 %v4840_v36  ;;  %7867 = vmatpush3.msra.mxu0 %v5085_v1  ;;  %v5083_v63 = vld [vmem:[#allocation9 + $0x140] sm:$0xff]  ;;  %v4834_v16 = vld [vmem:[#allocation9 + $0x90] sm:$0xff] }
 0x36c   : > { %7784 = vmatprep.subr.mxu1 %v4839_v14  ;;  %7868 = vmatprep.subr.mxu0 %v5084_v46 }
 0x36d   : > { %v4144_v58 = vadd.f32 %v4143_v52, %v4113_v20  ;;  %7785 = vmatpush3.msra.mxu1 %v4839_v14  ;;  %7869 = vmatpush3.msra.mxu0 %v5084_v46  ;;  %v5082_v20 = vld [vmem:[#allocation9 + $0x138] sm:$0xff] }
 0x36e   : > { %7786 = vmatprep.subr.mxu1 %v4838_v6  ;;  %7870 = vmatprep.subr.mxu0 %v5083_v63 }
 0x36f   : > { %4145 = vadd.xlane.f32.xlu0 %v4144_v58  ;;  %7787 = vmatpush3.msra.mxu1 %v4838_v6  ;;  %v4833_v58 = vld [vmem:[#allocation9 + $0x88] sm:$0xff] }
 0x370   : > { %7788 = vmatprep.subr.mxu1 %v4837_v33  ;;  %7871 = vmatpush3.msra.mxu0 %v5083_v63 }
 0x371   : > { %7789 = vmatpush3.msra.mxu1 %v4837_v33  ;;  %7872 = vmatprep.subr.mxu0 %v5082_v20 }
 0x372   : > { %7790 = vmatprep.subr.mxu1 %v4836_v59  ;;  %7873 = vmatpush3.msra.mxu0 %v5082_v20 }
 0x373   : > { %7791 = vmatpush3.msra.mxu1 %v4836_v59 }
 0x374   : > { %7792 = vmatprep.subr.mxu1 %v4835_v31 }
 0x375   : > { %7793 = vmatpush3.msra.mxu1 %v4835_v31 }
 0x376   : > { %7794 = vmatprep.subr.mxu1 %v4834_v16 }
 0x377   : > { %7795 = vmatpush3.msra.mxu1 %v4834_v16 }
 0x378   : > { %7796 = vmatprep.subr.mxu1 %v4833_v58 }
 0x379   : > { %7797 = vmatpush3.msra.mxu1 %v4833_v58 }
 0x3f8   : > { %v4146_v48 = vpop.xlane.xlu0 %4145 }
 0x3f9   : > { %v4147_v17 = vrot.slane %v4146_v48, 4 }
 0x3fb   : > { %v4148_v60 = vadd.f32 %v4147_v17, %v4146_v48  ;;  %v5081_v48 = vld [vmem:[#allocation9 + $0x130] sm:$0xff]  ;;  %v4832_v17 = vld [vmem:[#allocation9 + $0x80] sm:$0xff] }
 0x3fc   : > { %7874 = vmatprep.subr.mxu0 %v5081_v48  ;;  %7798 = vmatprep.subr.mxu1 %v4832_v17 }
 0x3fd   : > { %v4149_v9 = vrot.slane %v4148_v60, 2  ;;  %7875 = vmatpush3.msra.mxu0 %v5081_v48  ;;  %7799 = vmatpush3.msra.mxu1 %v4832_v17 }
 0x3ff   : > { %v4150_v0 = vadd.f32 %v4149_v9, %v4148_v60  ;;  %v5080_v9 = vld [vmem:[#allocation9 + $0x128] sm:$0xff] }
 0x400   : > { %7876 = vmatprep.subr.mxu0 %v5080_v9 }
 0x401   : > { %v4151_v62 = vrot.slane %v4150_v0, 1  ;;  %7877 = vmatpush3.msra.mxu0 %v5080_v9 }
 0x403   : > { %v4152_v26 = vadd.f32 %v4151_v62, %v4150_v0  ;;  %v10416_v0 = vld [vmem:[#allocation9 + $0x78] sm:$0xff]  ;;  %v5079_v62 = vld [vmem:[#allocation9 + $0x120] sm:$0xff] }
 0x404   : > { %7812 = vmatprep.subr.mxu1 %v10416_v0  ;;  %7878 = vmatprep.subr.mxu0 %v5079_v62 }
 0x405   : > { %8198 = vpush %v4152_v26  ;;  %v5078_v26 = vld [vmem:[#allocation9 + $0x118] sm:$0xff]  ;;  %7879 = vmatpush3.msra.mxu0 %v5079_v62 }
 0x406   : > { %7880 = vmatprep.subr.mxu0 %v5078_v26 }
 0x407   : > { %7881 = vmatpush3.msra.mxu0 %v5078_v26 }
 0x408   : > { %7882 = vmatprep.subr.mxu0 %v5077_v47 }
 0x409   : > { %7883 = vmatpush3.msra.mxu0 %v5077_v47 }
 0x40a   : > { %7884 = vmatprep.subr.mxu0 %v5076_v42 }
 0x40b   : > { %7885 = vmatpush3.msra.mxu0 %v5076_v42 }
 0x40c   : > { %7886 = vmatprep.subr.mxu0 %v5075_v55 }
 0x40d   : > { %7887 = vmatpush3.msra.mxu0 %v5075_v55 }
 0x40e   : > { %7944 = vmatprep.subr.mxu0 %v10419_v45 }
 0x436   : > { %s8199_s21 = spop %8198 }
 0x437   : > { %v4154_v52 = vstv %s8199_s21  ;;  %s11215_s21 = scalar_lea.hbm %s11270_s7, %s6399_s17 }
 0x438   : > { %v4155_v60 = vmul.f32 0.0009765625, %v4154_v52 }
 0x43a   : > { %v4156_v34 = vadd.f32 1e-05, %v4155_v60 }
 0x43c   : > { %8265 = vrsqrt.f32 %v4156_v34 }
 0x449   : > { %v8266_v29 = vpop.eup %8265 }
 0x44a   : > { %v4158_v57 = vmul.f32 %v8266_v29, %v10199_v12  ;;  %v4159_v3 = vmul.f32 %v8266_v29, %v10202_v18  ;;  %v4160_v56 = vmul.f32 %v8266_v29, %v10209_v23  ;;  %v4161_v36 = vmul.f32 %v8266_v29, %v10218_v22 }
 0x44b   : > { %v4162_v14 = vmul.f32 %v8266_v29, %v10223_v11  ;;  %v4163_v5 = vmul.f32 %v8266_v29, %v10230_v8  ;;  %v4164_v6 = vmul.f32 %v8266_v29, %v10237_v15  ;;  %v4165_v28 = vmul.f32 %v8266_v29, %v10244_v4 }
 0x44c   : > { %v4166_v12 = vmul.f32 %v8266_v29, %v10251_v19  ;;  %v4167_v18 = vmul.f32 %v8266_v29, %v10258_v40  ;;  %v4168_v23 = vmul.f32 %v8266_v29, %v10265_v41  ;;  %v4169_v22 = vmul.f32 %v8266_v29, %v10272_v10  ;;  %v10450_v41 = vld [vmem:[%s11267_s4] ss:$0 sm:$0xff] }
 0x44d   : > { %v4170_v33 = vmul.f32 %v8266_v29, %v10279_v50  ;;  %v4171_v1 = vmul.f32 %v8266_v29, %v10286_v25  ;;  %v4172_v11 = vmul.f32 %v8266_v29, %v10293_v39  ;;  %v4173_v8 = vmul.f32 %v8266_v29, %v10300_v32 }
 0x44e   : > { %v4174_v15 = vmul.f32 %v8266_v29, %v10307_v38  ;;  %v4197_v4 = vmul.f32 %v10429_v7, %v4158_v57  ;;  %v4198_v19 = vmul.f32 %v10429_v7, %v4159_v3  ;;  %v4199_v40 = vmul.f32 %v10429_v7, %v4160_v56 }
 0x44f   : > { %v4175_v10 = vmul.f32 %v8266_v29, %v10314_v30  ;;  %v4176_v50 = vmul.f32 %v8266_v29, %v10321_v13  ;;  %v4177_v25 = vmul.f32 %v8266_v29, %v10328_v44  ;;  %v4200_v39 = vmul.f32 %v10429_v7, %v4161_v36 }
 0x450   : > { %v10457_v32 = vmul.f32 %v8266_v29, %v10335_v24  ;;  %v10460_v38 = vmul.f32 %v8266_v29, %v10342_v27  ;;  %v10463_v59 = vmul.f32 %v8266_v29, %v10349_v51  ;;  %v4201_v46 = vmul.f32 %v10429_v7, %v4162_v14 }
 0x451   : > { %v10467_v31 = vmul.f32 %v8266_v29, %v10356_v61  ;;  %v10470_v30 = vmul.f32 %v8266_v29, %v10363_v21  ;;  %v10473_v13 = vmul.f32 %v8266_v29, %v10370_v53  ;;  %v4202_v44 = vmul.f32 %v10429_v7, %v4163_v5 }
 0x452   : > { %v4203_v24 = vmul.f32 %v10429_v7, %v4164_v6  ;;  %v10478_v27 = vadd.f32 %v10450_v41, %v4197_v4  ;;  %v10481_v51 = vadd.f32 %v10450_v41, %v4198_v19  ;;  %v10484_v63 = vadd.f32 %v10450_v41, %v4199_v40 }
 0x453   : > { %v10487_v61 = vmul.f32 %v8266_v29, %v10377_v37  ;;  %v10490_v21 = vmul.f32 %v8266_v29, %v10384_v49  ;;  %v4204_v53 = vmul.f32 %v10429_v7, %v4165_v28  ;;  %v10494_v16 = vadd.f32 %v10450_v41, %v4200_v39 }
 0x454   : > { %v10497_v20 = vmul.f32 %v8266_v29, %v10391_v2  ;;  %v10500_v52 = vmul.f32 %v8266_v29, %v10398_v43  ;;  %v4205_v58 = vmul.f32 %v10429_v7, %v4166_v12  ;;  %v10504_v48 = vadd.f32 %v10450_v41, %v4201_v46 }
 0x455   : > { %v10507_v37 = vmul.f32 %v8266_v29, %v10403_v54  ;;  %v4206_v49 = vmul.f32 %v10429_v7, %v4167_v18  ;;  %v4207_v17 = vmul.f32 %v10429_v7, %v4168_v23  ;;  %v10512_v60 = vadd.f32 %v10450_v41, %v4202_v44 }
 0x456   : > { %v10515_v2 = vadd.f32 %v10450_v41, %v4203_v24  ;;  %v6344_v43 = vmul.f32 -1.442695, %v10478_v27  ;;  %v6345_v9 = vmul.f32 -1.442695, %v10481_v51  ;;  %v6346_v62 = vmul.f32 -1.442695, %v10484_v63 }
 0x457   : > { %v10521_v26 = vmul.f32 %v8266_v29, %v10408_v35  ;;  %v4208_v54 = vmul.f32 %v10429_v7, %v4169_v22  ;;  %v10525_v34 = vadd.f32 %v10450_v41, %v4204_v53  ;;  %v6347_v47 = vmul.f32 -1.442695, %v10494_v16 }
 0x458   : > { %v4209_v42 = vmul.f32 %v10429_v7, %v4170_v33  ;;  %v10530_v55 = vadd.f32 %v10450_v41, %v4205_v58  ;;  %8267 = vpow2.f32 %v6344_v43  ;;  %v6348_v57 = vmul.f32 -1.442695, %v10504_v48 }
 0x459   : > { %v4210_v3 = vmul.f32 %v10429_v7, %v4171_v1  ;;  %v10535_v35 = vadd.f32 %v10450_v41, %v4206_v49  ;;  %8269 = vpow2.f32 %v6345_v9  ;;  %v6349_v29 = vmul.f32 -1.442695, %v10512_v60 }
 0x45a   : > { %v4211_v56 = vmul.f32 %v10429_v7, %v4172_v11  ;;  %v10540_v36 = vadd.f32 %v10450_v41, %v4207_v17  ;;  %8271 = vpow2.f32 %v6346_v62  ;;  %v6350_v14 = vmul.f32 -1.442695, %v10515_v2 }
 0x45b   : > { %v4212_v5 = vmul.f32 %v10429_v7, %v4173_v8  ;;  %v10545_v6 = vadd.f32 %v10450_v41, %v4208_v54  ;;  %8273 = vpow2.f32 %v6347_v47  ;;  %v6351_v28 = vmul.f32 -1.442695, %v10525_v34 }
 0x45c   : > { %v4213_v12 = vmul.f32 %v10429_v7, %v4174_v15  ;;  %v10550_v18 = vadd.f32 %v10450_v41, %v4209_v42  ;;  %8275 = vpow2.f32 %v6348_v57  ;;  %v6352_v23 = vmul.f32 -1.442695, %v10530_v55 }
 0x45d   : > { %v4214_v22 = vmul.f32 %v10429_v7, %v4175_v10  ;;  %v10555_v33 = vadd.f32 %v10450_v41, %v4210_v3  ;;  %8277 = vpow2.f32 %v6349_v29  ;;  %v6353_v1 = vmul.f32 -1.442695, %v10535_v35 }
 0x45e   : > { %v4215_v11 = vmul.f32 %v10429_v7, %v4176_v50  ;;  %v10560_v8 = vadd.f32 %v10450_v41, %v4211_v56  ;;  %8279 = vpow2.f32 %v6350_v14  ;;  %v6354_v15 = vmul.f32 -1.442695, %v10540_v36 }
 0x45f   : > { %v4216_v4 = vmul.f32 %v10429_v7, %v4177_v25  ;;  %v10565_v19 = vadd.f32 %v10450_v41, %v4212_v5  ;;  %8281 = vpow2.f32 %v6351_v28  ;;  %v6355_v40 = vmul.f32 -1.442695, %v10545_v6 }
 0x460   : > { %v4217_v10 = vmul.f32 %v10429_v7, %v10457_v32  ;;  %v10571_v39 = vadd.f32 %v10450_v41, %v4213_v12  ;;  %8283 = vpow2.f32 %v6352_v23  ;;  %v6356_v50 = vmul.f32 -1.442695, %v10550_v18 }
 0x461   : > { %v4218_v46 = vmul.f32 %v10429_v7, %v10460_v38  ;;  %v10577_v25 = vadd.f32 %v10450_v41, %v4214_v22  ;;  %8285 = vpow2.f32 %v6353_v1  ;;  %v6357_v44 = vmul.f32 -1.442695, %v10555_v33 }
 0x462   : > { %v4219_v24 = vmul.f32 %v10429_v7, %v10463_v59  ;;  %v10583_v32 = vadd.f32 %v10450_v41, %v4215_v11  ;;  %8287 = vpow2.f32 %v6354_v15  ;;  %v6358_v53 = vmul.f32 -1.442695, %v10560_v8 }
 0x463   : > { %v4220_v58 = vmul.f32 %v10429_v7, %v10467_v31  ;;  %v10589_v38 = vadd.f32 %v10450_v41, %v4216_v4  ;;  %8289 = vpow2.f32 %v6355_v40  ;;  %v6359_v49 = vmul.f32 -1.442695, %v10565_v19 }
 0x464   : > { %v4221_v17 = vmul.f32 %v10429_v7, %v10470_v30  ;;  %v10595_v59 = vadd.f32 %v10450_v41, %v4217_v10  ;;  %8291 = vpow2.f32 %v6356_v50  ;;  %v6360_v43 = vmul.f32 -1.442695, %v10571_v39 }
 0x465   : > { %v10598_v9 = vpop.eup %8267  ;;  %v4222_v31 = vmul.f32 %v10429_v7, %v10473_v13  ;;  %v10603_v62 = vadd.f32 %v10450_v41, %v4218_v46  ;;  %8293 = vpow2.f32 %v6357_v44  ;;  %v6361_v54 = vmul.f32 -1.442695, %v10577_v25 }
 0x466   : > { %v8270_v47 = vpop.eup %8269  ;;  %v4223_v30 = vmul.f32 %v10429_v7, %v10487_v61  ;;  %v10609_v42 = vadd.f32 %v10450_v41, %v4219_v24  ;;  %8295 = vpow2.f32 %v6358_v53  ;;  %v6362_v57 = vmul.f32 -1.442695, %v10583_v32 }
 0x467   : > { %v8272_v3 = vpop.eup %8271  ;;  %v4224_v13 = vmul.f32 %v10429_v7, %v10490_v21  ;;  %v10615_v29 = vadd.f32 %v10450_v41, %v4220_v58  ;;  %8297 = vpow2.f32 %v6359_v49  ;;  %v6363_v56 = vmul.f32 -1.442695, %v10589_v38 }
 0x468   : > { %v8274_v14 = vpop.eup %8273  ;;  %v4225_v61 = vmul.f32 %v10429_v7, %v10497_v20  ;;  %v10621_v5 = vadd.f32 %v10450_v41, %v4221_v17  ;;  %8299 = vpow2.f32 %v6360_v43  ;;  %v6364_v28 = vmul.f32 -1.442695, %v10595_v59 }
 0x469   : > { %v8276_v12 = vpop.eup %8275  ;;  %v4226_v21 = vmul.f32 %v10429_v7, %v10500_v52  ;;  %v10627_v23 = vadd.f32 %v10450_v41, %v4222_v31  ;;  %8301 = vpow2.f32 %v6361_v54  ;;  %v6365_v22 = vmul.f32 -1.442695, %v10603_v62 }
 0x46a   : > { %v8278_v1 = vpop.eup %8277  ;;  %v4227_v20 = vmul.f32 %v10429_v7, %v10507_v37  ;;  %v10633_v11 = vadd.f32 %v10450_v41, %v4223_v30  ;;  %8303 = vpow2.f32 %v6362_v57  ;;  %v6366_v15 = vmul.f32 -1.442695, %v10609_v42 }
 0x46b   : > { %v8280_v4 = vpop.eup %8279  ;;  %v4228_v52 = vmul.f32 %v10429_v7, %v10521_v26  ;;  %v10639_v40 = vadd.f32 %v10450_v41, %v4224_v13  ;;  %8305 = vpow2.f32 %v6363_v56  ;;  %v6367_v10 = vmul.f32 -1.442695, %v10615_v29 }
 0x46c   : > { %v8282_v50 = vpop.eup %8281  ;;  %v10643_v46 = vadd.f32 %v10450_v41, %v4225_v61  ;;  %8307 = vpow2.f32 %v6364_v28  ;;  %v6368_v37 = vmul.f32 -1.442695, %v10621_v5  ;;  %v10647_v24 = vadd.f32 %v10450_v41, %v4226_v21 }
 0x46d   : > { %v8284_v44 = vpop.eup %8283  ;;  %8309 = vpow2.f32 %v6365_v22  ;;  %v6369_v7 = vmul.f32 -1.442695, %v10627_v23  ;;  %v10651_v53 = vadd.f32 %v10450_v41, %v4227_v20  ;;  %v6370_v58 = vmul.f32 -1.442695, %v10633_v11 }
 0x46e   : > { %v8286_v26 = vpop.eup %8285  ;;  %8311 = vpow2.f32 %v6366_v15  ;;  %v10655_v17 = vadd.f32 %v10450_v41, %v4228_v52  ;;  %v6371_v43 = vmul.f32 -1.442695, %v10639_v40  ;;  %v6372_v54 = vmul.f32 -1.442695, %v10643_v46 }
 0x46f   : > { %11459 = vst [vmem:[#allocation35_spill] sm:$0xff] %v10651_v53  ;;  %v8288_v49 = vpop.eup %8287  ;;  %8313 = vpow2.f32 %v6367_v10  ;;  %v6373_v57 = vmul.f32 -1.442695, %v10647_v24  ;;  %v6374_v56 = vmul.f32 -1.442695, %v10651_v53  ;;  %v4364_v21 = vadd.f32 1.0, %v10598_v9 }
 0x470   : > { %11460 = vst [vmem:[#allocation38_spill] sm:$0xff] %v10655_v17  ;;  %v8290_v31 = vpop.eup %8289  ;;  %8315 = vpow2.f32 %v6368_v37  ;;  %v6375_v41 = vmul.f32 -1.442695, %v10655_v17  ;;  %v4365_v20 = vadd.f32 1.0, %v8270_v47  ;;  %v4366_v52 = vadd.f32 1.0, %v8272_v3 }
 0x471   : > { %v8292_v30 = vpop.eup %8291  ;;  %8317 = vpow2.f32 %v6369_v7  ;;  %v4367_v37 = vadd.f32 1.0, %v8274_v14  ;;  %v4370_v53 = vadd.f32 1.0, %v8280_v4  ;;  %v4371_v9 = vadd.f32 1.0, %v8282_v50 }
 0x472   : > { %v8294_v13 = vpop.eup %8293  ;;  %8319 = vpow2.f32 %v6370_v58  ;;  %v4368_v58 = vadd.f32 1.0, %v8276_v12  ;;  %v4372_v47 = vadd.f32 1.0, %v8284_v44  ;;  %v4373_v3 = vadd.f32 1.0, %v8286_v26 }
 0x473   : > { %v8296_v61 = vpop.eup %8295  ;;  %8321 = vpow2.f32 %v6371_v43  ;;  %v4369_v43 = vadd.f32 1.0, %v8278_v1  ;;  %v4374_v14 = vadd.f32 1.0, %v8288_v49  ;;  %v4377_v50 = vadd.f32 1.0, %v8294_v13 }
 0x474   : > { %v8298_v28 = vpop.eup %8297  ;;  %8323 = vpow2.f32 %v6372_v54  ;;  %v4378_v44 = vadd.f32 1.0, %v8296_v61 }
 0x475   : > { %v8300_v22 = vpop.eup %8299  ;;  %8325 = vpow2.f32 %v6373_v57 }
 0x476   : > { %v8302_v15 = vpop.eup %8301  ;;  %8327 = vpow2.f32 %v6374_v56  ;;  %v4380_v49 = vadd.f32 1.0, %v8300_v22 }
 0x477   : > { %v8304_v10 = vpop.eup %8303  ;;  %8329 = vpow2.f32 %v6375_v41 }
 0x478   : > { %v8306_v7 = vpop.eup %8305  ;;  %8331 = vrcp.f32 %v4364_v21  ;;  %v4375_v21 = vadd.f32 1.0, %v8290_v31 }
 0x479   : > { %v8308_v45 = vpop.eup %8307  ;;  %8333 = vrcp.f32 %v4365_v20  ;;  %v4376_v20 = vadd.f32 1.0, %v8292_v30 }
 0x47a   : > { %v8310_v17 = vpop.eup %8309  ;;  %8335 = vrcp.f32 %v4366_v52 }
 0x47b   : > { %v8312_v54 = vpop.eup %8311  ;;  %8337 = vrcp.f32 %v4367_v37  ;;  %v4379_v37 = vadd.f32 1.0, %v8298_v28  ;;  %v4384_v28 = vadd.f32 1.0, %v8308_v45 }
 0x47c   : > { %v8314_v57 = vpop.eup %8313  ;;  %8339 = vrcp.f32 %v4368_v58  ;;  %v4381_v58 = vadd.f32 1.0, %v8302_v15 }
 0x47d   : > { %v8316_v56 = vpop.eup %8315  ;;  %8341 = vrcp.f32 %v4369_v43  ;;  %v4382_v43 = vadd.f32 1.0, %v8304_v10  ;;  %v4386_v10 = vadd.f32 1.0, %v8312_v54 }
 0x47e   : > { %v8318_v41 = vpop.eup %8317  ;;  %8343 = vrcp.f32 %v4370_v53 }
 0x47f   : > { %v8320_v12 = vpop.eup %8319  ;;  %8345 = vrcp.f32 %v4371_v9  ;;  %v4389_v54 = vadd.f32 1.0, %v8318_v41 }
 0x480   : > { %v10663_v1 = vpop.eup %8321  ;;  %8347 = vrcp.f32 %v4372_v47  ;;  %v4383_v47 = vadd.f32 1.0, %v8306_v7 }
 0x481   : > { %v10665_v4 = vpop.eup %8323  ;;  %8349 = vrcp.f32 %v4373_v3 }
 0x482   : > { %v10667_v52 = vpop.eup %8325  ;;  %8351 = vrcp.f32 %v4374_v14 }
 0x483   : > { %v10669_v26 = vpop.eup %8327  ;;  %8353 = vrcp.f32 %v4375_v21  ;;  %v4385_v21 = vadd.f32 1.0, %v8310_v17 }
 0x484   : > { %v10671_v53 = vpop.eup %8329  ;;  %8355 = vrcp.f32 %v4376_v20 }
 0x485   : > { %v8332_v31 = vpop.eup %8331  ;;  %8357 = vrcp.f32 %v4377_v50 }
 0x486   : > { %v8334_v30 = vpop.eup %8333  ;;  %8359 = vrcp.f32 %v4378_v44  ;;  %v4460_v13 = vmul.f32 %v8332_v31, %v10478_v27  ;;  %v4387_v44 = vadd.f32 1.0, %v8314_v57  ;;  %v6081_v31 = vld [vmem:[#allocation2 + $0x28] sm:$0xff]  ;;  %v6080_v57 = vld [vmem:[#allocation2 + $0x20] sm:$0xff] }
 0x487   : > { %v8336_v9 = vpop.eup %8335  ;;  %8361 = vrcp.f32 %v4379_v37  ;;  %v4461_v61 = vmul.f32 %v8334_v30, %v10481_v51  ;;  %v6082_v30 = vld [vmem:[#allocation2 + $0x30] sm:$0xff] }
 0x488   : > { %v8338_v3 = vpop.eup %8337  ;;  %8363 = vrcp.f32 %v4380_v49  ;;  %v4462_v14 = vmul.f32 %v8336_v9, %v10484_v63  ;;  %v4388_v49 = vadd.f32 1.0, %v8316_v56 }
 0x489   : > { %v8340_v22 = vpop.eup %8339  ;;  %8365 = vrcp.f32 %v4381_v58  ;;  %v4463_v15 = vmul.f32 %v8338_v3, %v10494_v16  ;;  %v6079_v16 = vld [vmem:[#allocation2 + $0x18] sm:$0xff] }
 0x48a   : > { %v8342_v20 = vpop.eup %8341  ;;  %8367 = vrcp.f32 %v4382_v43  ;;  %v4464_v27 = vmul.f32 %v8340_v22, %v10504_v48  ;;  %v4528_v50 = vadd.f32 %v4462_v14, %v4460_v13  ;;  %v4390_v43 = vadd.f32 1.0, %v8320_v12  ;;  %v6087_v14 = vld [vmem:[#allocation2 + $0x38] sm:$0xff] }
 0x48b   : > { %v8344_v7 = vpop.eup %8343  ;;  %8369 = vrcp.f32 %v4383_v47  ;;  %v4465_v51 = vmul.f32 %v8342_v20, %v10512_v60  ;;  %v4529_v45 = vadd.f32 %v4463_v15, %v4461_v61  ;;  %v6083_v61 = vadd.f32 %v6081_v31, %v6079_v16  ;;  %v6090_v15 = vld [vmem:[#allocation2 + $0x50] sm:$0xff] }
 0x48c   : > { %v8346_v37 = vpop.eup %8345  ;;  %8371 = vrcp.f32 %v4384_v28  ;;  %v4466_v63 = vmul.f32 %v8344_v7, %v10515_v2  ;;  %4530 = vst [vmem:[#allocation4] sm:$0xff] %v4528_v50  ;;  %v4391_v2 = vadd.f32 1.0, %v10663_v1  ;;  %v6084_v28 = vadd.f32 %v6082_v30, %v6080_v57  ;;  %v6098_v16 = vld [vmem:[#allocation2 + $0x70] sm:$0xff] }
 0x48d   : > { %v8348_v17 = vpop.eup %8347  ;;  %8373 = vrcp.f32 %v4385_v21  ;;  %v4467_v48 = vmul.f32 %v8346_v37, %v10525_v34  ;;  %4531 = vst [vmem:[#allocation4 + $0x8] sm:$0xff] %v4529_v45  ;;  %v4392_v34 = vadd.f32 1.0, %v10665_v4  ;;  %v4393_v22 = vadd.f32 1.0, %v10667_v52  ;;  %v6088_v21 = vld [vmem:[#allocation2 + $0x40] sm:$0xff] }
 0x48e   : > { %v8350_v58 = vpop.eup %8349  ;;  %8375 = vrcp.f32 %v4386_v10  ;;  %v4468_v60 = vmul.f32 %v8348_v17, %v10530_v55  ;;  %v4536_v56 = vadd.f32 %v4466_v63, %v4464_v27  ;;  %v6089_v55 = vld [vmem:[#allocation2 + $0x48] sm:$0xff]  ;;  %v4394_v20 = vadd.f32 1.0, %v10669_v26  ;;  %v6096_v63 = vld [vmem:[#allocation2 + $0x60] sm:$0xff] }
 0x48f   : > { %v8352_v13 = vpop.eup %8351  ;;  %8377 = vrcp.f32 %v4387_v44  ;;  %v4469_v9 = vmul.f32 %v8350_v58, %v10535_v35  ;;  %v4537_v47 = vadd.f32 %v4467_v48, %v4465_v51  ;;  %v4395_v27 = vadd.f32 1.0, %v10671_v53  ;;  %v6097_v17 = vld [vmem:[#allocation2 + $0x68] sm:$0xff] }
 0x490   : > { %v8354_v41 = vpop.eup %8353  ;;  %8379 = vrcp.f32 %v4388_v49  ;;  %v4470_v3 = vmul.f32 %v8352_v13, %v10540_v36  ;;  %4538 = vst [vmem:[#allocation4 + $0x10] sm:$0xff] %v4536_v56  ;;  %v6091_v44 = vadd.f32 %v6089_v55, %v6087_v14  ;;  %v6092_v37 = vadd.f32 %v6090_v15, %v6088_v21  ;;  %v6095_v49 = vld [vmem:[#allocation2 + $0x58] sm:$0xff]  ;;  %v6106_v14 = vld [vmem:[#allocation2 + $0x90] sm:$0xff] }
 0x491   : > { %v8356_v12 = vpop.eup %8355  ;;  %8381 = vrcp.f32 %v4389_v54  ;;  %v4471_v1 = vmul.f32 %v8354_v41, %v10545_v6  ;;  %4539 = vst [vmem:[#allocation4 + $0x18] sm:$0xff] %v4537_v47  ;;  %v11461_v54 = vld [vmem:[#allocation15_spill] sm:$0xff]  ;;  %v6099_v47 = vadd.f32 %v6097_v17, %v6095_v49  ;;  %v6103_v41 = vld [vmem:[#allocation2 + $0x78] sm:$0xff]  ;;  %v10720_v49 = vld [vmem:[#allocation2 + $0x8] sm:$0xff] }
 0x492   : > { %v8358_v35 = vpop.eup %8357  ;;  %8383 = vrcp.f32 %v4390_v43  ;;  %v4472_v4 = vmul.f32 %v8356_v12, %v10550_v18  ;;  %v4544_v36 = vadd.f32 %v4470_v3, %v4468_v60  ;;  %v4651_v48 = vand.u32 7, %v11461_v54  ;;  %v5361_v54 = vld [vmem:[#allocation9 + $0x210] sm:$0xff] }
 0x493   : > { %v8360_v10 = vpop.eup %8359  ;;  %8385 = vrcp.f32 %v4391_v2  ;;  %v4473_v50 = vmul.f32 %v8358_v35, %v10555_v33  ;;  %v4545_v52 = vadd.f32 %v4471_v1, %v4469_v9  ;;  %v4821_v2 = vld [vmem:[#allocation9 + $0x70] sm:$0xff]  ;;  %v4820_v1 = vld [vmem:[#allocation9 + $0x68] sm:$0xff] }
 0x494   : > { %v8362_v7 = vpop.eup %8361  ;;  %8387 = vrcp.f32 %v4392_v34  ;;  %v4474_v6 = vmul.f32 %v8360_v10, %v10560_v8  ;;  %4546 = vst [vmem:[#allocation4 + $0x20] sm:$0xff] %v4544_v36  ;;  %v4588_v51 = vld [vmem:[#allocation4] ss:$2 sm:$0xff]  ;;  %v4604_v45 = vld [vmem:[#allocation4 + $0x1] ss:$2 sm:$0xff]  ;;  %vm10711_vm2 = vcmp.le.s32.totalorder %v4651_v48, 6 }
 0x495   : > { %v8364_v26 = vpop.eup %8363  ;;  %8389 = vrcp.f32 %v4393_v22  ;;  %v4475_v18 = vmul.f32 %v8362_v7, %v10565_v19  ;;  %4547 = vst [vmem:[#allocation4 + $0x28] sm:$0xff] %v4545_v52  ;;  %v4619_v53 = vadd.f32 %v4604_v45, %v4588_v51  ;;  %6085 = vst [vmem:[#allocation4] sm:$0xff] %v6083_v61  ;;  %v6105_v61 = vld [vmem:[#allocation2 + $0x88] sm:$0xff]  ;;  %v6111_v35 = vld [vmem:[#allocation2 + $0x98] sm:$0xff]  ;;  %vm10867_vm10 = vcmp.ge.s32.totalorder %v4651_v48, 1 }
 0x496   : > { %6086 = vst [vmem:[#allocation4 + $0x8] sm:$0xff] %v6084_v28  ;;  %v8366_v33 = vpop.eup %8365  ;;  %8391 = vrcp.f32 %v4394_v20  ;;  %v4476_v8 = vmul.f32 %v8364_v26, %v10571_v39  ;;  %v4552_v31 = vadd.f32 %v4474_v6, %v4472_v4  ;;  %v6100_v39 = vadd.f32 %v6098_v16, %v6096_v63  ;;  %v6104_v28 = vld [vmem:[#allocation2 + $0x80] sm:$0xff]  ;;  %v6114_v6 = vld [vmem:[#allocation2 + $0xb0] sm:$0xff]  ;;  %v6119_v63 = vld [vmem:[#allocation2 + $0xb8] sm:$0xff] }
 0x497   : > { %v8368_v58 = vpop.eup %8367  ;;  %8393 = vrcp.f32 %v4395_v27  ;;  %v4477_v57 = vmul.f32 %v8366_v33, %v10577_v25  ;;  %v4553_v30 = vadd.f32 %v4475_v18, %v4473_v50  ;;  %v10697_v19 = vmul.f32 0.25, %v4619_v53  ;;  %v4819_v50 = vld [vmem:[#allocation9 + $0x60] sm:$0xff]  ;;  %v6112_v7 = vld [vmem:[#allocation2 + $0xa0] sm:$0xff]  ;;  %v4818_v53 = vld [vmem:[#allocation9 + $0x58] sm:$0xff] }
 0x498   : > { %v8370_v43 = vpop.eup %8369  ;;  %v4478_v60 = vmul.f32 %v8368_v58, %v10583_v32  ;;  %4554 = vst [vmem:[#allocation4 + $0x30] sm:$0xff] %v4552_v31  ;;  %v4590_v56 = vld [vmem:[#allocation4 + $0x10] ss:$2 sm:$0xff]  ;;  %v4606_v13 = vld [vmem:[#allocation4 + $0x11] ss:$2 sm:$0xff]  ;;  %v6108_v52 = vadd.f32 %v6106_v14, %v6104_v28  ;;  %v10725_v18 = vsel %vm10711_vm2, 1.0, %v10720_v49 }
 0x499   : > { %v8372_v9 = vpop.eup %8371  ;;  %v4479_v34 = vmul.f32 %v8370_v43, %v10589_v38  ;;  %4555 = vst [vmem:[#allocation4 + $0x38] sm:$0xff] %v4553_v30  ;;  %v4620_v3 = vadd.f32 %v4606_v13, %v4590_v56  ;;  %4639 = vst [vmem:[#allocation5 + $0x10] sm:$0xff] %v10697_v19  ;;  %7801 = vmatmul.mubr.f32.vlgmr.msra.gmra.mxu1 %v10697_v19  ;;  %v11462_v32 = vld [vmem:[#allocation22_spill] sm:$0xff]  ;;  %v4817_v58 = vld [vmem:[#allocation9 + $0x50] sm:$0xff]  ;;  %v6116_v43 = vadd.f32 %v6114_v6, %v6112_v7 }
 0x49a   : > { %6093 = vst [vmem:[#allocation4 + $0x10] sm:$0xff] %v6091_v44  ;;  %6094 = vst [vmem:[#allocation4 + $0x18] sm:$0xff] %v6092_v37  ;;  %v8374_v25 = vpop.eup %8373  ;;  %v4658_v12 = vand.u32 7, %v11462_v32  ;;  %v4480_v55 = vmul.f32 %v8372_v9, %v10595_v59  ;;  %v4560_v22 = vadd.f32 %v4478_v60, %v4476_v8  ;;  %7813 = vmatpush3.msra.mxu1 %v10416_v0  ;;  %v6113_v44 = vld [vmem:[#allocation2 + $0xa8] sm:$0xff]  ;;  %v11467_v8 = vld [vmem:[#allocation16_spill] sm:$0xff] }
 0x49b   : > { %v8376_v38 = vpop.eup %8375  ;;  %v4481_v21 = vmul.f32 %v8374_v25, %v10603_v62  ;;  %v4561_v15 = vadd.f32 %v4479_v34, %v4477_v57  ;;  %v10707_v20 = vmul.f32 0.25, %v4620_v3  ;;  %7814 = vmatprep.subr.mxu1 %v4821_v2  ;;  %v6107_v59 = vadd.f32 %v6105_v61, %v6103_v41  ;;  %v11468_v3 = vld [vmem:[#allocation32_spill] sm:$0xff]  ;;  %v6130_v7 = vld [vmem:[#allocation2 + $0xf0] sm:$0xff] }
 0x49c   : > { %v8378_v36 = vpop.eup %8377  ;;  %v4482_v10 = vmul.f32 %v8376_v38, %v10609_v42  ;;  %4562 = vst [vmem:[#allocation4 + $0x40] sm:$0xff] %v4560_v22  ;;  %v4592_v0 = vld [vmem:[#allocation4 + $0x20] ss:$2 sm:$0xff]  ;;  %v4608_v27 = vld [vmem:[#allocation4 + $0x21] ss:$2 sm:$0xff]  ;;  %7815 = vmatpush3.msra.mxu1 %v4821_v2  ;;  %vm10729_vm3 = vcmp.le.s32.totalorder %v4658_v12, 6  ;;  %v6115_v30 = vadd.f32 %v6113_v44, %v6111_v35 }
 0x49d   : > { %v8380_v62 = vpop.eup %8379  ;;  %v4483_v51 = vmul.f32 %v8378_v36, %v10615_v29  ;;  %4563 = vst [vmem:[#allocation4 + $0x48] sm:$0xff] %v4561_v15  ;;  %v4621_v45 = vadd.f32 %v4608_v27, %v4592_v0  ;;  %4640 = vst [vmem:[#allocation5 + $0x18] sm:$0xff] %v10707_v20  ;;  %7803 = vmatprep.mubr.f32.mxu1 %v10707_v20  ;;  %7816 = vmatprep.subr.mxu1 %v4820_v1  ;;  %v4665_v31 = vand.u32 7, %v11467_v8  ;;  %v4815_v15 = vld [vmem:[#allocation9 + $0x40] sm:$0xff]  ;;  %v11472_v44 = vld [vmem:[#allocation38_spill] sm:$0xff] }
 0x49e   : > { %6101 = vst [vmem:[#allocation4 + $0x20] sm:$0xff] %v6099_v47  ;;  %6102 = vst [vmem:[#allocation4 + $0x28] sm:$0xff] %v6100_v39  ;;  %v8382_v42 = vpop.eup %8381  ;;  %v4484_v26 = vmul.f32 %v8380_v62, %v10621_v5  ;;  %v4568_v37 = vadd.f32 %v4482_v10, %v4480_v55  ;;  %7817 = vmatpush3.msra.mxu1 %v4820_v1  ;;  %v6120_v47 = vld [vmem:[#allocation2 + $0xc0] sm:$0xff]  ;;  %v6122_v39 = vld [vmem:[#allocation2 + $0xd0] sm:$0xff]  ;;  %v4672_v25 = vand.u32 7, %v11468_v3  ;;  %vm4744_vm11 = vcmp.ge.s32.totalorder %v4658_v12, 1 }
 0x49f   : > { %v8384_v33 = vpop.eup %8383  ;;  %v4485_v5 = vmul.f32 %v8382_v42, %v10627_v23  ;;  %v4569_v17 = vadd.f32 %v4483_v51, %v4481_v21  ;;  %v10734_v16 = vmul.f32 0.25, %v4621_v45  ;;  %7818 = vmatprep.subr.mxu1 %v4819_v50  ;;  %v6121_v23 = vld [vmem:[#allocation2 + $0xc8] sm:$0xff]  ;;  %v4816_v55 = vld [vmem:[#allocation9 + $0x48] sm:$0xff]  ;;  %vm10754_vm4 = vcmp.le.s32.totalorder %v4665_v31, 6  ;;  %v11471_v10 = vld [vmem:[#allocation35_spill] sm:$0xff] }
 0x4a0   : > { %v8386_v57 = vpop.eup %8385  ;;  %v4486_v60 = vmul.f32 %v8384_v33, %v10633_v11  ;;  %4570 = vst [vmem:[#allocation4 + $0x50] sm:$0xff] %v4568_v37  ;;  %v4594_v56 = vld [vmem:[#allocation4 + $0x30] ss:$2 sm:$0xff]  ;;  %v4610_v13 = vld [vmem:[#allocation4 + $0x31] ss:$2 sm:$0xff]  ;;  %7819 = vmatpush3.msra.mxu1 %v4819_v50  ;;  %v6127_v1 = vld [vmem:[#allocation2 + $0xd8] sm:$0xff]  ;;  %v6123_v36 = vadd.f32 %v6121_v23, %v6119_v63 }
 0x4a1   : > { %v5058_v2 = vld [vmem:[#allocation5 + $0x9] sm:$0xff]  ;;  %v8388_v9 = vpop.eup %8387  ;;  %v4487_v41 = vmul.f32 %v8386_v57, %v10639_v40  ;;  %4571 = vst [vmem:[#allocation4 + $0x58] sm:$0xff] %v4569_v17  ;;  %v4622_v61 = vadd.f32 %v4610_v13, %v4594_v56  ;;  %4641 = vst [vmem:[#allocation5 + $0x20] sm:$0xff] %v10734_v16  ;;  %7804 = vmatmul.mubr.f32.gmra.mxu1 %v10734_v16  ;;  %7820 = vmatprep.subr.mxu1 %v4818_v53  ;;  %v10747_v40 = vsel %vm10729_vm3, 1.0, %v10720_v49  ;;  %v4807_v48 = vld [vmem:[#allocation9] sm:$0xff] }
 0x4a2   : > { %6109 = vst [vmem:[#allocation4 + $0x30] sm:$0xff] %v6107_v59  ;;  %6110 = vst [vmem:[#allocation4 + $0x38] sm:$0xff] %v6108_v52  ;;  %v5066_v34 = vmul.f32 %v10725_v18, %v5058_v2  ;;  %v8390_v11 = vpop.eup %8389  ;;  %v4488_v28 = vmul.f32 %v8388_v9, %v10643_v46  ;;  %v4576_v14 = vadd.f32 %v4486_v60, %v4484_v26  ;;  %7821 = vmatpush3.msra.mxu1 %v4818_v53  ;;  %v6128_v62 = vld [vmem:[#allocation2 + $0xe0] sm:$0xff]  ;;  %v6129_v52 = vld [vmem:[#allocation2 + $0xe8] sm:$0xff] }
 0x4a3   : > { %v8392_v22 = vpop.eup %8391  ;;  %v4489_v38 = vmul.f32 %v8390_v11, %v10647_v24  ;;  %v4577_v35 = vadd.f32 %v4487_v41, %v4485_v5  ;;  %v10750_v21 = vmul.f32 0.25, %v4622_v61  ;;  %7822 = vmatprep.subr.mxu1 %v4817_v58  ;;  %v6124_v59 = vadd.f32 %v6122_v39, %v6120_v47  ;;  %v5373_v37 = vld [vmem:[#allocation9 + $0x270] sm:$0xff]  ;;  %v5372_v63 = vld [vmem:[#allocation9 + $0x268] sm:$0xff]  ;;  %v6138_v47 = vld [vmem:[#allocation2 + $0x110] sm:$0xff] }
 0x4a4   : > { %7888 = vmatprep.mubr.f32.mxu0 %v5066_v34  ;;  %v8394_v4 = vpop.eup %8393  ;;  %v4490_v0 = vmul.f32 %v8392_v22, %v11471_v10  ;;  %4578 = vst [vmem:[#allocation4 + $0x60] sm:$0xff] %v4576_v14  ;;  %v4596_v27 = vld [vmem:[#allocation4 + $0x40] ss:$2 sm:$0xff]  ;;  %v4612_v24 = vld [vmem:[#allocation4 + $0x41] ss:$2 sm:$0xff]  ;;  %v5059_v50 = vld [vmem:[#allocation5 + $0x11] sm:$0xff]  ;;  %7823 = vmatpush3.msra.mxu1 %v4817_v58 }
 0x4a5   : > { %v4491_v6 = vmul.f32 %v8394_v4, %v11472_v44  ;;  %4579 = vst [vmem:[#allocation4 + $0x68] sm:$0xff] %v4577_v35  ;;  %v4623_v51 = vadd.f32 %v4612_v24, %v4596_v27  ;;  %4642 = vst [vmem:[#allocation5 + $0x28] sm:$0xff] %v10750_v21  ;;  %v5067_v45 = vmul.f32 %v10747_v40, %v5059_v50  ;;  %7806 = vmatprep.mubr.f32.mxu1 %v10750_v21  ;;  %v11475_v5 = vld [vmem:[#allocation17_spill] sm:$0xff]  ;;  %v4814_v58 = vld [vmem:[#allocation9 + $0x38] sm:$0xff] }
 0x4a6   : > { %6117 = vst [vmem:[#allocation4 + $0x40] sm:$0xff] %v6115_v30  ;;  %6118 = vst [vmem:[#allocation4 + $0x48] sm:$0xff] %v6116_v43  ;;  %7824 = vmatprep.subr.mxu1 %v4816_v55  ;;  %v4584_v42 = vadd.f32 %v4490_v0, %v4488_v28  ;;  %v10766_v26 = vsel %vm10754_vm4, 1.0, %v10720_v49  ;;  %vm10770_vm5 = vcmp.le.s32.totalorder %v4672_v25, 6  ;;  %v4679_v17 = vand.u32 7, %v11475_v5  ;;  %v11476_v13 = vld [vmem:[#allocation25_spill] sm:$0xff] }
 0x4a7   : > { %7825 = vmatpush3.msra.mxu1 %v4816_v55  ;;  %v4585_v53 = vadd.f32 %v4491_v6, %v4489_v38  ;;  %v10774_v33 = vmul.f32 0.25, %v4623_v51  ;;  %7889 = vmatmul.mubr.f32.vlgmr.msra.gmra.mxu0 %v5067_v45  ;;  %v10778_v57 = vmul.f32 %v10725_v18, %v5059_v50  ;;  %v6131_v30 = vadd.f32 %v6129_v52, %v6127_v1  ;;  %v6136_v9 = vld [vmem:[#allocation2 + $0x100] sm:$0xff]  ;;  %v5371_v34 = vld [vmem:[#allocation9 + $0x260] sm:$0xff]  ;;  %v11482_v50 = vld [vmem:[#allocation18_spill] sm:$0xff] }
 0x4a8   : > { %7826 = vmatprep.subr.mxu1 %v4815_v15  ;;  %v6132_v43 = vadd.f32 %v6130_v7, %v6128_v62  ;;  %4586 = vst [vmem:[#allocation4 + $0x70] sm:$0xff] %v4584_v42  ;;  %v4598_v60 = vld [vmem:[#allocation4 + $0x50] ss:$2 sm:$0xff]  ;;  %v4614_v56 = vld [vmem:[#allocation4 + $0x51] ss:$2 sm:$0xff]  ;;  %7945 = vmatpush3.msra.mxu0 %v11476_v13  ;;  %v10790_v61 = vsel %vm10770_vm5, 1.0, %v10720_v49  ;;  %v6140_v38 = vadd.f32 %v6138_v47, %v6136_v9 }
 0x4a9   : > { %v5060_v2 = vld [vmem:[#allocation5 + $0x19] sm:$0xff]  ;;  %7827 = vmatpush3.msra.mxu1 %v4815_v15  ;;  %4587 = vst [vmem:[#allocation4 + $0x78] sm:$0xff] %v4585_v53  ;;  %v4624_v23 = vadd.f32 %v4614_v56, %v4598_v60  ;;  %4643 = vst [vmem:[#allocation5 + $0x30] sm:$0xff] %v10774_v33  ;;  %7946 = vmatprep.subr.mxu0 %v5373_v37  ;;  %v11477_v11 = vld [vmem:[#allocation33_spill] sm:$0xff]  ;;  %vm10797_vm6 = vcmp.le.s32.totalorder %v4679_v17, 6  ;;  %v4693_v62 = vand.u32 7, %v11482_v50 }
 0x4aa   : > { %6125 = vst [vmem:[#allocation4 + $0x50] sm:$0xff] %v6123_v36  ;;  %6126 = vst [vmem:[#allocation4 + $0x58] sm:$0xff] %v6124_v59  ;;  %v5068_v39 = vmul.f32 %v10766_v26, %v5060_v2  ;;  %7807 = vmatmul.mubr.f32.gmra.mxu1 %v10774_v33  ;;  %v10785_v41 = vmul.f32 %v10725_v18, %v5060_v2  ;;  %7947 = vmatpush3.msra.mxu0 %v5373_v37  ;;  %v4686_v28 = vand.u32 7, %v11477_v11  ;;  %v5370_v18 = vld [vmem:[#allocation9 + $0x258] sm:$0xff]  ;;  %v4813_v22 = vld [vmem:[#allocation9 + $0x30] sm:$0xff] }
 0x4ab   : > { %7828 = vmatprep.subr.mxu1 %v4814_v58  ;;  %v10793_v14 = vmul.f32 0.25, %v4624_v23  ;;  %7948 = vmatprep.subr.mxu0 %v5372_v63  ;;  %v10802_v1 = vmul.f32 %v10747_v40, %v5060_v2  ;;  %v10813_v10 = vsel %vm10797_vm6, 1.0, %v10720_v49  ;;  %v5369_v0 = vld [vmem:[#allocation9 + $0x250] sm:$0xff]  ;;  %v5368_v52 = vld [vmem:[#allocation9 + $0x248] sm:$0xff]  ;;  %v5367_v53 = vld [vmem:[#allocation9 + $0x240] sm:$0xff]  ;;  %vm4773_vm8 = vcmp.le.s32.totalorder %v4693_v62, 6 }
 0x4ac   : > { %7891 = vmatprep.mubr.f32.mxu0 %v5068_v39  ;;  %v4600_v35 = vld [vmem:[#allocation4 + $0x60] ss:$2 sm:$0xff]  ;;  %v4616_v46 = vld [vmem:[#allocation4 + $0x61] ss:$2 sm:$0xff]  ;;  %7949 = vmatpush3.msra.mxu0 %v5372_v63  ;;  %vm10819_vm7 = vcmp.le.s32.totalorder %v4686_v28, 6  ;;  %v5366_v13 = vld [vmem:[#allocation9 + $0x238] sm:$0xff] }
 0x4ad   : > { %v5061_v15 = vld [vmem:[#allocation5 + $0x21] sm:$0xff]  ;;  %7829 = vmatpush3.msra.mxu1 %v4814_v58  ;;  %v4625_v4 = vadd.f32 %v4616_v46, %v4600_v35  ;;  %4644 = vst [vmem:[#allocation5 + $0x38] sm:$0xff] %v10793_v14  ;;  %6133 = vst [vmem:[#allocation4 + $0x60] sm:$0xff] %v6131_v30  ;;  %7950 = vmatprep.subr.mxu0 %v5371_v34  ;;  %v11483_v58 = vld [vmem:[#allocation34_spill] sm:$0xff]  ;;  %v10846_v47 = vsel %vm4773_vm8, 1.0, %v10720_v49  ;;  %vm4745_vm12 = vcmp.ge.s32.totalorder %v4665_v31, 1 }
 0x4ae   : > { %6134 = vst [vmem:[#allocation4 + $0x68] sm:$0xff] %v6132_v43  ;;  %v5069_v36 = vmul.f32 %v10790_v61, %v5061_v15  ;;  %7809 = vmatprep.mubr.f32.mxu1 %v10793_v14  ;;  %v10808_v59 = vmul.f32 %v10766_v26, %v5061_v15  ;;  %7951 = vmatpush3.msra.mxu0 %v5371_v34  ;;  %v4812_v7 = vld [vmem:[#allocation9 + $0x28] sm:$0xff]  ;;  %v4811_v63 = vld [vmem:[#allocation9 + $0x20] sm:$0xff]  ;;  %v4700_v30 = vand.u32 7, %v11483_v58  ;;  %v4810_v9 = vld [vmem:[#allocation9 + $0x18] sm:$0xff]  ;;  %vm4746_vm13 = vcmp.ge.s32.totalorder %v4672_v25, 1 }
 0x4af   : > { %7830 = vmatprep.subr.mxu1 %v4813_v22  ;;  %v10815_v27 = vmul.f32 0.25, %v4625_v4  ;;  %7952 = vmatprep.subr.mxu0 %v5370_v18  ;;  %v10825_v44 = vmul.f32 %v10747_v40, %v5061_v15  ;;  %v6389_v40 = vsel %vm10819_vm7, 1.0, %v10720_v49  ;;  %v5365_v23 = vld [vmem:[#allocation9 + $0x230] sm:$0xff]  ;;  %v4808_v35 = vld [vmem:[#allocation9 + $0x8] sm:$0xff]  ;;  %vm4747_vm14 = vcmp.ge.s32.totalorder %v4679_v17, 1  ;;  %v10909_v25 = vld [vmem:[#allocation5 + $0x1f] sm:$0xff] }
 0x4b0   : > { %7892 = vmatmul.mubr.f32.gmra.mxu0 %v5069_v36  ;;  %v4602_v6 = vld [vmem:[#allocation4 + $0x70] ss:$2 sm:$0xff]  ;;  %v4618_v51 = vld [vmem:[#allocation4 + $0x71] ss:$2 sm:$0xff]  ;;  %7831 = vmatpush3.msra.mxu1 %v4813_v22  ;;  %vm4774_vm9 = vcmp.le.s32.totalorder %v4700_v30, 6  ;;  %v4791_v24 = vld [vmem:[#allocation5 + $0x7] sm:$0xff] }
 0x4b1   : > { %v5062_v45 = vld [vmem:[#allocation5 + $0x29] sm:$0xff]  ;;  %7953 = vmatpush3.msra.mxu0 %v5370_v18  ;;  %v4626_v42 = vadd.f32 %v4618_v51, %v4602_v6  ;;  %4645 = vst [vmem:[#allocation5 + $0x40] sm:$0xff] %v10815_v27  ;;  %6142 = vst [vmem:[#allocation4 + $0x78] sm:$0xff] %v6140_v38  ;;  %7810 = vmatmul.mubr.f32.gmra.mxu1 %v10815_v27  ;;  %v10858_v38 = vsel %vm4774_vm9, 1.0, %v10720_v49  ;;  %v10888_v6 = vsel %vm4744_vm11, 1.0, %v10720_v49  ;;  %v10894_v51 = vsel %vm4745_vm12, 1.0, %v10720_v49 }
 0x4b2   : > { %v5070_v37 = vmul.f32 %v10813_v10, %v5062_v45  ;;  %7954 = vmatprep.subr.mxu0 %v5369_v0  ;;  %v10831_v29 = vmul.f32 %v10790_v61, %v5062_v45  ;;  %7832 = vmatprep.subr.mxu1 %v4812_v7  ;;  %v10842_v60 = vmul.f32 %v10766_v26, %v5062_v45  ;;  %v4809_v34 = vld [vmem:[#allocation9 + $0x10] sm:$0xff]  ;;  %v5364_v18 = vld [vmem:[#allocation9 + $0x228] sm:$0xff]  ;;  %v10907_v3 = vsel %vm4746_vm13, 1.0, %v10720_v49  ;;  %v5232_v50 = vld [vmem:[#allocation9 + $0x1d8] sm:$0xff] }
 0x4b3   : > { %7955 = vmatpush3.msra.mxu0 %v5369_v0  ;;  %v10837_v43 = vmul.f32 0.25, %v4626_v42  ;;  %7833 = vmatpush3.msra.mxu1 %v4812_v7  ;;  %v5362_v0 = vld [vmem:[#allocation9 + $0x218] sm:$0xff]  ;;  %v10881_v7 = vsel %vm10867_vm10, 1.0, %v10720_v49  ;;  %v10890_v8 = vld [vmem:[#allocation5 + $0xf] sm:$0xff]  ;;  %v4802_v5 = vmul.f32 %v10907_v3, %v10909_v25  ;;  %vm4748_vm15 = vcmp.ge.s32.totalorder %v4686_v28, 1  ;;  %v5229_v4 = vld [vmem:[#allocation9 + $0x1c0] sm:$0xff] }
 0x4b4   : > { %7894 = vmatprep.mubr.f32.mxu0 %v5070_v37  ;;  %7956 = vmatprep.subr.mxu0 %v5368_v52  ;;  %v5063_v56 = vld [vmem:[#allocation5 + $0x31] sm:$0xff]  ;;  %v4799_v12 = vmul.f32 %v10881_v7, %v4791_v24  ;;  %v5360_v31 = vld [vmem:[#allocation9 + $0x208] sm:$0xff]  ;;  %v4800_v37 = vmul.f32 %v10888_v6, %v10890_v8  ;;  %vm4749_vm0 = vcmp.ge.s32.totalorder %v4693_v62, 1  ;;  %vm4750_vm1 = vcmp.ge.s32.totalorder %v4700_v30, 1  ;;  %v5659_v24 = vld [vmem:[#allocation9 + $0x340] sm:$0xff] }
 0x4b5   : > { %7957 = vmatpush3.msra.mxu0 %v5368_v52  ;;  %4646 = vst [vmem:[#allocation5 + $0x48] sm:$0xff] %v10837_v43  ;;  %v5071_v2 = vmul.f32 %v6389_v40, %v5063_v56  ;;  %7834 = vmatprep.subr.mxu1 %v4811_v63  ;;  %v10849_v39 = vmul.f32 %v10813_v10, %v5063_v56  ;;  %v10896_v45 = vld [vmem:[#allocation5 + $0x17] sm:$0xff]  ;;  %v5234_v17 = vld [vmem:[#allocation9 + $0x1e8] sm:$0xff]  ;;  %v10932_v28 = vsel %vm4749_vm0, 1.0, %v10720_v49 }
 0x4b6   : > { %7958 = vmatprep.subr.mxu0 %v5367_v53  ;;  %7835 = vmatpush3.msra.mxu1 %v4811_v63  ;;  %v10852_v26 = vmul.f32 %v10790_v61, %v5063_v56  ;;  %v5363_v61 = vld [vmem:[#allocation9 + $0x220] sm:$0xff]  ;;  %v5236_v42 = vld [vmem:[#allocation9 + $0x1f8] sm:$0xff]  ;;  %v10912_v56 = vsel %vm4747_vm14, 1.0, %v10720_v49  ;;  %v10929_v11 = vld [vmem:[#allocation5 + $0x2f] sm:$0xff] }
 0x4b7   : > { %7959 = vmatpush3.msra.mxu0 %v5367_v53  ;;  %7836 = vmatprep.subr.mxu1 %v4810_v9  ;;  %v5235_v53 = vld [vmem:[#allocation9 + $0x1f0] sm:$0xff]  ;;  %v5666_v63 = vld [vmem:[#allocation9 + $0x378] sm:$0xff]  ;;  %v5230_v30 = vld [vmem:[#allocation9 + $0x1c8] sm:$0xff] }
 0x4b8   : > { %7895 = vmatmul.mubr.f32.gmra.mxu0 %v5071_v2  ;;  %7960 = vmatprep.subr.mxu0 %v5366_v13  ;;  %v5064_v55 = vld [vmem:[#allocation5 + $0x39] sm:$0xff] }
 0x4b9   : > { %7961 = vmatpush3.msra.mxu0 %v5366_v13  ;;  %v5072_v22 = vmul.f32 %v10846_v47, %v5064_v55  ;;  %7837 = vmatpush3.msra.mxu1 %v4810_v9  ;;  %v10860_v46 = vmul.f32 %v6389_v40, %v5064_v55  ;;  %v10863_v15 = vmul.f32 %v10813_v10, %v5064_v55  ;;  %v10914_v13 = vld [vmem:[#allocation5 + $0x27] sm:$0xff]  ;;  %v5665_v9 = vld [vmem:[#allocation9 + $0x370] sm:$0xff] }
 0x4ba   : > { %7962 = vmatprep.subr.mxu0 %v5365_v23  ;;  %7838 = vmatprep.subr.mxu1 %v4809_v34  ;;  %v4803_v2 = vmul.f32 %v10912_v56, %v10914_v13  ;;  %v10934_v55 = vld [vmem:[#allocation5 + $0x37] sm:$0xff] }
 0x4bb   : > { %7963 = vmatpush3.msra.mxu0 %v5365_v23  ;;  %7897 = vmatprep.mubr.f32.mxu0 %v5072_v22  ;;  %v5233_v23 = vld [vmem:[#allocation9 + $0x1e0] sm:$0xff]  ;;  %v4805_v62 = vmul.f32 %v10932_v28, %v10934_v55  ;;  %v5231_v22 = vld [vmem:[#allocation9 + $0x1d0] sm:$0xff] }
 0x4bc   : > { %7964 = vmatprep.subr.mxu0 %v5364_v18  ;;  %v5923_v36 = vld [vmem:[#allocation5 + $0x41] sm:$0xff]  ;;  %7839 = vmatpush3.msra.mxu1 %v4809_v34  ;;  %v10927_v34 = vsel %vm4748_vm15, 1.0, %v10720_v49 }
 0x4bd   : > { %7965 = vmatpush3.msra.mxu0 %v5364_v18  ;;  %v10873_v52 = vmul.f32 %v6389_v40, %v5923_v36  ;;  %v5073_v10 = vmul.f32 %v10858_v38, %v5923_v36  ;;  %7840 = vmatprep.subr.mxu1 %v4808_v35  ;;  %v10884_v32 = vmul.f32 %v10846_v47, %v5923_v36  ;;  %v5359_v40 = vld [vmem:[#allocation9 + $0x200] sm:$0xff]  ;;  %v5660_v36 = vld [vmem:[#allocation9 + $0x348] sm:$0xff] }
 0x4be   : > { %7966 = vmatprep.subr.mxu0 %v5363_v61  ;;  %7841 = vmatpush3.msra.mxu1 %v4808_v35  ;;  %v5663_v18 = vld [vmem:[#allocation9 + $0x360] sm:$0xff] }
 0x4bf   : > { %7967 = vmatpush3.msra.mxu0 %v5363_v61  ;;  %7842 = vmatprep.subr.mxu1 %v4807_v48  ;;  %v10945_v61 = vsel %vm4750_vm1, 1.0, %v10720_v49  ;;  %v10947_v35 = vld [vmem:[#allocation5 + $0x3f] sm:$0xff]  ;;  %v5661_v49 = vld [vmem:[#allocation9 + $0x350] sm:$0xff] }
 0x4c0   : > { %7898 = vmatmul.mubr.f32.gmra.mxu0 %v5073_v10  ;;  %7968 = vmatprep.subr.mxu0 %v5362_v0  ;;  %v4806_v58 = vmul.f32 %v10945_v61, %v10947_v35  ;;  %v5658_v10 = vld [vmem:[#allocation9 + $0x338] sm:$0xff] }
 0x4c1   : > { %7976 = vmatprep.mubr.f32.mxu0 %v10697_v19  ;;  %7969 = vmatpush3.msra.mxu0 %v5362_v0  ;;  %v4801_v19 = vmul.f32 %v10894_v51, %v10896_v45  ;;  %v5228_v0 = vld [vmem:[#allocation9 + $0x1b8] sm:$0xff] }
 0x4c2   : > { %7970 = vmatprep.subr.mxu0 %v5361_v54  ;;  %7843 = vmatpush3.msra.mxu1 %v4807_v48  ;;  %v5657_v48 = vld [vmem:[#allocation9 + $0x330] sm:$0xff] }
 0x4c3   : > { %7971 = vmatpush3.msra.mxu0 %v5361_v54  ;;  %7844 = vmatprep.mubr.f32.mxu1 %v4799_v12  ;;  %v5226_v54 = vld [vmem:[#allocation9 + $0x1a8] sm:$0xff]  ;;  %v5225_v12 = vld [vmem:[#allocation9 + $0x1a0] sm:$0xff] }
 0x4c4   : > { %7972 = vmatprep.subr.mxu0 %v5360_v31  ;;  %7845 = vmatmul.mubr.f32.vlgmr.msra.gmra.mxu1 %v4800_v37  ;;  %v5222_v37 = vld [vmem:[#allocation9 + $0x188] sm:$0xff] }
 0x4c5   : > { %7900 = vmatprep.subr.mxu1 %v5236_v42  ;;  %7973 = vmatpush3.msra.mxu0 %v5360_v31  ;;  %v5223_v31 = vld [vmem:[#allocation9 + $0x190] sm:$0xff] }
 0x4c6   : > { %7847 = vmatprep.mubr.f32.mxu1 %v4801_v19  ;;  %7901 = vmatpush3.msra.mxu1 %v5236_v42  ;;  %v5654_v42 = vld [vmem:[#allocation9 + $0x318] sm:$0xff]  ;;  %v5653_v19 = vld [vmem:[#allocation9 + $0x310] sm:$0xff] }
 0x4c7   : > { %7974 = vmatprep.subr.mxu0 %v5359_v40  ;;  %7902 = vmatprep.subr.mxu1 %v5235_v53 }
 0x4c8   : > { %7975 = vmatpush3.msra.mxu0 %v5359_v40  ;;  %7903 = vmatpush3.msra.mxu1 %v5235_v53  ;;  %v5221_v40 = vld [vmem:[#allocation9 + $0x180] sm:$0xff]  ;;  %v5652_v53 = vld [vmem:[#allocation9 + $0x308] sm:$0xff] }
 0x4c9   : > { %7977 = vmatmul.mubr.f32.vlgmr.msra.gmra.mxu0 %v10707_v20  ;;  %8032 = vmatprep.subr.mxu0 %v5666_v63  ;;  %v5664_v20 = vld [vmem:[#allocation9 + $0x368] sm:$0xff] }
 0x4ca   : > { %7848 = vmatmul.mubr.f32.gmra.mxu1 %v4802_v5  ;;  %7904 = vmatprep.subr.mxu1 %v5234_v17  ;;  %v5213_v5 = vmul.f32 %v10888_v6, %v10896_v45 }
 0x4cb   : > { %7979 = vmatprep.mubr.f32.mxu0 %v10734_v16  ;;  %8033 = vmatpush3.msra.mxu0 %v5666_v63  ;;  %v4804_v16 = vmul.f32 %v10927_v34, %v10929_v11  ;;  %v5520_v63 = vld [vmem:[#allocation9 + $0x2f8] sm:$0xff] }
 0x4cc   : > { %7850 = vmatprep.mubr.f32.mxu1 %v4803_v2  ;;  %7905 = vmatpush3.msra.mxu1 %v5234_v17  ;;  %v5214_v17 = vmul.f32 %v10894_v51, %v10909_v25  ;;  %v5651_v2 = vld [vmem:[#allocation9 + $0x300] sm:$0xff] }
 0x4cd   : > { %8034 = vmatprep.subr.mxu0 %v5665_v9  ;;  %7906 = vmatprep.subr.mxu1 %v5233_v23 }
 0x4ce   : > { %8035 = vmatpush3.msra.mxu0 %v5665_v9  ;;  %7907 = vmatpush3.msra.mxu1 %v5233_v23  ;;  %v5519_v9 = vld [vmem:[#allocation9 + $0x2f0] sm:$0xff]  ;;  %v5643_v23 = vmul.f32 %v10888_v6, %v10909_v25  ;;  %v5517_v25 = vld [vmem:[#allocation9 + $0x2e0] sm:$0xff] }
 0x4cf   : > { %7980 = vmatmul.mubr.f32.gmra.mxu0 %v10750_v21  ;;  %8036 = vmatprep.subr.mxu0 %v5664_v20  ;;  %v5662_v21 = vld [vmem:[#allocation9 + $0x358] sm:$0xff]  ;;  %v10973_v6 = vld [vmem:[#allocation9 + $0x470] sm:$0xff] }
 0x4d0   : > { %7851 = vmatmul.mubr.f32.gmra.mxu1 %v4804_v16  ;;  %7908 = vmatprep.subr.mxu1 %v5232_v50  ;;  %v5518_v16 = vld [vmem:[#allocation9 + $0x2e8] sm:$0xff] }
 0x4d1   : > { %7982 = vmatprep.mubr.f32.mxu0 %v10774_v33  ;;  %8037 = vmatpush3.msra.mxu0 %v5664_v20  ;;  %v5212_v33 = vmul.f32 %v10881_v7, %v10890_v8  ;;  %v5655_v8 = vld [vmem:[#allocation9 + $0x320] sm:$0xff]  ;;  %v10964_v20 = vld [vmem:[#allocation9 + $0x478] sm:$0xff] }
 0x4d2   : > { %7853 = vmatprep.mubr.f32.mxu1 %v4805_v62  ;;  %7909 = vmatpush3.msra.mxu1 %v5232_v50  ;;  %v5644_v50 = vmul.f32 %v10894_v51, %v10914_v13  ;;  %v5216_v62 = vmul.f32 %v10912_v56, %v10929_v11  ;;  %v5645_v51 = vmul.f32 %v10907_v3, %v10929_v11  ;;  %v10989_v11 = vld [vmem:[#allocation9 + $0x460] sm:$0xff] }
 0x4d3   : > { %8038 = vmatprep.subr.mxu0 %v5663_v18  ;;  %7910 = vmatprep.subr.mxu1 %v5231_v22 }
 0x4d4   : > { %8039 = vmatpush3.msra.mxu0 %v5663_v18  ;;  %7911 = vmatpush3.msra.mxu1 %v5231_v22  ;;  %v5217_v18 = vmul.f32 %v10927_v34, %v10934_v55  ;;  %v5516_v22 = vld [vmem:[#allocation9 + $0x2d8] sm:$0xff] }
 0x4d5   : > { %7983 = vmatmul.mubr.f32.gmra.mxu0 %v10793_v14  ;;  %8040 = vmatprep.subr.mxu0 %v5662_v21  ;;  %v5642_v14 = vmul.f32 %v10881_v7, %v10896_v45  ;;  %v5224_v7 = vld [vmem:[#allocation9 + $0x198] sm:$0xff]  ;;  %v5215_v45 = vmul.f32 %v10907_v3, %v10914_v13  ;;  %v10979_v13 = vld [vmem:[#allocation9 + $0x468] sm:$0xff]  ;;  %v5218_v3 = vmul.f32 %v10932_v28, %v10947_v35 }
 0x4d6   : > { %7854 = vmatmul.mubr.f32.gmra.mxu1 %v4806_v58  ;;  %7912 = vmatprep.subr.mxu1 %v5230_v30  ;;  %v5515_v58 = vld [vmem:[#allocation9 + $0x2d0] sm:$0xff] }
 0x4d7   : > { %7985 = vmatprep.mubr.f32.mxu0 %v10815_v27  ;;  %8041 = vmatpush3.msra.mxu0 %v5662_v21  ;;  %v5227_v27 = vld [vmem:[#allocation9 + $0x1b0] sm:$0xff]  ;;  %v5646_v21 = vmul.f32 %v10912_v56, %v10934_v55  ;;  %v5647_v56 = vmul.f32 %v10927_v34, %v10947_v35  ;;  %v10995_v55 = vld [vmem:[#allocation9 + $0x458] sm:$0xff]  ;;  %v5513_v34 = vld [vmem:[#allocation9 + $0x2c0] sm:$0xff] }
 0x4d8   : > { %7913 = vmatpush3.msra.mxu1 %v5230_v30  ;;  %7932 = vmatprep.mubr.f32.mxu1 %v5212_v33  ;;  %v5211_v30 = vld [vmem:[#allocation5 + $0x47] sm:$0xff] }
 0x4d9   : > { %8042 = vmatprep.subr.mxu0 %v5661_v49  ;;  %7914 = vmatprep.subr.mxu1 %v5229_v4  ;;  %v5514_v33 = vld [vmem:[#allocation9 + $0x2c8] sm:$0xff] }
 0x4da   : > { %8043 = vmatpush3.msra.mxu0 %v5661_v49  ;;  %7915 = vmatpush3.msra.mxu1 %v5229_v4  ;;  %v5219_v49 = vmul.f32 %v10945_v61, %v5211_v30  ;;  %v5648_v4 = vmul.f32 %v10932_v28, %v5211_v30  ;;  %v5512_v28 = vld [vmem:[#allocation9 + $0x2b8] sm:$0xff] }
 0x4db   : > { %7986 = vmatmul.mubr.f32.gmra.mxu0 %v10837_v43  ;;  %8044 = vmatprep.subr.mxu0 %v5660_v36  ;;  %v5656_v43 = vld [vmem:[#allocation9 + $0x328] sm:$0xff] }
 0x4dc   : > { %7916 = vmatprep.subr.mxu1 %v5228_v0  ;;  %8045 = vmatpush3.msra.mxu0 %v5660_v36  ;;  %v11001_v36 = vld [vmem:[#allocation9 + $0x450] sm:$0xff] }
 0x4dd   : > { %8064 = vmatprep.mubr.f32.mxu0 %v5642_v14  ;;  %7917 = vmatpush3.msra.mxu1 %v5228_v0  ;;  %v5641_v0 = vld [vmem:[#allocation5 + $0x4f] sm:$0xff] }
 0x4de   : > { %8046 = vmatprep.subr.mxu0 %v5659_v24  ;;  %7918 = vmatprep.subr.mxu1 %v5227_v27  ;;  %v5649_v35 = vmul.f32 %v10945_v61, %v5641_v0  ;;  %v11007_v14 = vld [vmem:[#allocation9 + $0x448] sm:$0xff] }
 0x4df   : > { %8047 = vmatpush3.msra.mxu0 %v5659_v24  ;;  %7919 = vmatpush3.msra.mxu1 %v5227_v27  ;;  %v11010_v24 = vld [vmem:[#allocation9 + $0x440] sm:$0xff]  ;;  %v5511_v27 = vld [vmem:[#allocation9 + $0x2b0] sm:$0xff]  ;;  %v5510_v61 = vld [vmem:[#allocation9 + $0x2a8] sm:$0xff] }
 0x4e0   : > { %8048 = vmatprep.subr.mxu0 %v5658_v10  ;;  %7920 = vmatprep.subr.mxu1 %v5226_v54 }
 0x4e1   : > { %8049 = vmatpush3.msra.mxu0 %v5658_v10  ;;  %7921 = vmatpush3.msra.mxu1 %v5226_v54  ;;  %v11019_v10 = vld [vmem:[#allocation9 + $0x430] sm:$0xff]  ;;  %v5509_v54 = vld [vmem:[#allocation9 + $0x2a0] sm:$0xff] }
 0x4e2   : > { %8050 = vmatprep.subr.mxu0 %v5657_v48  ;;  %7922 = vmatprep.subr.mxu1 %v5225_v12 }
 0x4e3   : > { %8051 = vmatpush3.msra.mxu0 %v5657_v48  ;;  %7923 = vmatpush3.msra.mxu1 %v5225_v12  ;;  %v11023_v48 = vld [vmem:[#allocation9 + $0x428] sm:$0xff]  ;;  %v11027_v12 = vld [vmem:[#allocation9 + $0x420] sm:$0xff] }
 0x4e4   : > { %8052 = vmatprep.subr.mxu0 %v5656_v43  ;;  %7924 = vmatprep.subr.mxu1 %v5224_v7 }
 0x4e5   : > { %8053 = vmatpush3.msra.mxu0 %v5656_v43  ;;  %7925 = vmatpush3.msra.mxu1 %v5224_v7  ;;  %v5507_v43 = vld [vmem:[#allocation9 + $0x290] sm:$0xff]  ;;  %v11031_v7 = vld [vmem:[#allocation9 + $0x418] sm:$0xff] }
 0x4e6   : > { %8054 = vmatprep.subr.mxu0 %v5655_v8  ;;  %7926 = vmatprep.subr.mxu1 %v5223_v31 }
 0x4e7   : > { %8055 = vmatpush3.msra.mxu0 %v5655_v8  ;;  %7927 = vmatpush3.msra.mxu1 %v5223_v31  ;;  %v5506_v8 = vld [vmem:[#allocation9 + $0x288] sm:$0xff]  ;;  %v11035_v31 = vld [vmem:[#allocation9 + $0x410] sm:$0xff] }
 0x4e8   : > { %8056 = vmatprep.subr.mxu0 %v5654_v42  ;;  %7928 = vmatprep.subr.mxu1 %v5222_v37 }
 0x4e9   : > { %8057 = vmatpush3.msra.mxu0 %v5654_v42  ;;  %7929 = vmatpush3.msra.mxu1 %v5222_v37  ;;  %v5505_v42 = vld [vmem:[#allocation9 + $0x280] sm:$0xff]  ;;  %v11039_v37 = vld [vmem:[#allocation9 + $0x408] sm:$0xff] }
 0x4ea   : > { %8058 = vmatprep.subr.mxu0 %v5653_v19  ;;  %7930 = vmatprep.subr.mxu1 %v5221_v40 }
 0x4eb   : > { %8059 = vmatpush3.msra.mxu0 %v5653_v19  ;;  %7931 = vmatpush3.msra.mxu1 %v5221_v40  ;;  %v5804_v19 = vld [vmem:[#allocation9 + $0x3f8] sm:$0xff]  ;;  %v11044_v40 = vld [vmem:[#allocation9 + $0x400] sm:$0xff] }
 0x4ec   : > { %8060 = vmatprep.subr.mxu0 %v5652_v53  ;;  %7933 = vmatmul.mubr.f32.vlgmr.msra.gmra.mxu1 %v5213_v5  ;;  %v5799_v5 = vld [vmem:[#allocation9 + $0x3d0] sm:$0xff] }
 0x4ed   : > { %7988 = vmatprep.subr.mxu1 %v5520_v63  ;;  %8061 = vmatpush3.msra.mxu0 %v5652_v53  ;;  %v5803_v53 = vld [vmem:[#allocation9 + $0x3f0] sm:$0xff] }
 0x4ee   : > { %7935 = vmatprep.mubr.f32.mxu1 %v5214_v17  ;;  %7989 = vmatpush3.msra.mxu1 %v5520_v63  ;;  %v5802_v63 = vld [vmem:[#allocation9 + $0x3e8] sm:$0xff] }
 0x4ef   : > { %8062 = vmatprep.subr.mxu0 %v5651_v2  ;;  %7990 = vmatprep.subr.mxu1 %v5519_v9  ;;  %v11056_v17 = vld [vmem:[#allocation5 + $0x49] sm:$0xff] }
 0x4f0   : > { %8063 = vmatpush3.msra.mxu0 %v5651_v2  ;;  %7991 = vmatpush3.msra.mxu1 %v5519_v9  ;;  %v5793_v2 = vld [vmem:[#allocation9 + $0x3a0] sm:$0xff]  ;;  %v5792_v9 = vld [vmem:[#allocation9 + $0x398] sm:$0xff] }
 0x4f1   : > { %8065 = vmatmul.mubr.f32.vlgmr.msra.gmra.mxu0 %v5643_v23  ;;  %8120 = vmatprep.subr.mxu0 %v10964_v20  ;;  %v5791_v23 = vld [vmem:[#allocation9 + $0x390] sm:$0xff] }
 0x4f2   : > { %7936 = vmatmul.mubr.f32.gmra.mxu1 %v5215_v45  ;;  %7992 = vmatprep.subr.mxu1 %v5518_v16  ;;  %v5790_v45 = vld [vmem:[#allocation9 + $0x388] sm:$0xff] }
 0x4f3   : > { %8067 = vmatprep.mubr.f32.mxu0 %v5644_v50  ;;  %8121 = vmatpush3.msra.mxu0 %v10964_v20  ;;  %v5781_v50 = vld [vmem:[#allocation5 + $0x20] sm:$0xff] }
 0x4f4   : > { %7938 = vmatprep.mubr.f32.mxu1 %v5216_v62  ;;  %7993 = vmatpush3.msra.mxu1 %v5518_v16  ;;  %v5789_v16 = vld [vmem:[#allocation9 + $0x380] sm:$0xff]  ;;  %v5782_v62 = vld [vmem:[#allocation5 + $0x28] sm:$0xff] }
 0x4f5   : > { %8122 = vmatprep.subr.mxu0 %v10973_v6  ;;  %7994 = vmatprep.subr.mxu1 %v5517_v25 }
 0x4f6   : > { %8123 = vmatpush3.msra.mxu0 %v10973_v6  ;;  %7995 = vmatpush3.msra.mxu1 %v5517_v25  ;;  %v5783_v25 = vld [vmem:[#allocation5 + $0x30] sm:$0xff] }
 0x4f7   : > { %8068 = vmatmul.mubr.f32.gmra.mxu0 %v5645_v51  ;;  %8124 = vmatprep.subr.mxu0 %v10979_v13  ;;  %v5784_v51 = vld [vmem:[#allocation5 + $0x38] sm:$0xff] }
 0x4f8   : > { %7939 = vmatmul.mubr.f32.gmra.mxu1 %v5217_v18  ;;  %7996 = vmatprep.subr.mxu1 %v5516_v22  ;;  %v5785_v18 = vld [vmem:[#allocation5 + $0x40] sm:$0xff] }
 0x4f9   : > { %8070 = vmatprep.mubr.f32.mxu0 %v5646_v21  ;;  %8125 = vmatpush3.msra.mxu0 %v10979_v13 }
 0x4fa   : > { %7941 = vmatprep.mubr.f32.mxu1 %v5218_v3  ;;  %7997 = vmatpush3.msra.mxu1 %v5516_v22 }
 0x4fb   : > { %8126 = vmatprep.subr.mxu0 %v10989_v11  ;;  %7998 = vmatprep.subr.mxu1 %v5515_v58 }
 0x4fc   : > { %8127 = vmatpush3.msra.mxu0 %v10989_v11  ;;  %7999 = vmatpush3.msra.mxu1 %v5515_v58 }
 0x4fd   : > { %8071 = vmatmul.mubr.f32.gmra.mxu0 %v5647_v56  ;;  %8128 = vmatprep.subr.mxu0 %v10995_v55  ;;  %v6135_v56 = vld [vmem:[#allocation2 + $0xf8] sm:$0xff] }
 0x4fe   : > { %7942 = vmatmul.mubr.f32.gmra.mxu1 %v5219_v49  ;;  %8000 = vmatprep.subr.mxu1 %v5514_v33 }
 0x4ff   : > { %8073 = vmatprep.mubr.f32.mxu0 %v5648_v4  ;;  %8129 = vmatpush3.msra.mxu0 %v10995_v55 }
 0x500   : > { %8001 = vmatpush3.msra.mxu1 %v5514_v33  ;;  %8020 = vmatprep.mubr.f32.mxu1 %v10778_v57  ;;  %v11015_v57 = vld [vmem:[#allocation9 + $0x438] sm:$0xff] }
 0x501   : > { %8130 = vmatprep.subr.mxu0 %v11001_v36  ;;  %8002 = vmatprep.subr.mxu1 %v5513_v34 }
 0x502   : > { %8131 = vmatpush3.msra.mxu0 %v11001_v36  ;;  %8003 = vmatpush3.msra.mxu1 %v5513_v34 }
 0x503   : > { %8074 = vmatmul.mubr.f32.gmra.mxu0 %v5649_v35  ;;  %8132 = vmatprep.subr.mxu0 %v11007_v14 }
 0x504   : > { %8004 = vmatprep.subr.mxu1 %v5512_v28  ;;  %8133 = vmatpush3.msra.mxu0 %v11007_v14 }
 0x505   : > { %8152 = vmatprep.mubr.f32.mxu0 %v10785_v41  ;;  %8005 = vmatpush3.msra.mxu1 %v5512_v28  ;;  %v5508_v41 = vld [vmem:[#allocation9 + $0x298] sm:$0xff] }
 0x506   : > { %8134 = vmatprep.subr.mxu0 %v11010_v24  ;;  %8006 = vmatprep.subr.mxu1 %v5511_v27 }
 0x507   : > { %8135 = vmatpush3.msra.mxu0 %v11010_v24  ;;  %8007 = vmatpush3.msra.mxu1 %v5511_v27 }
 0x508   : > { %8136 = vmatprep.subr.mxu0 %v11015_v57  ;;  %8008 = vmatprep.subr.mxu1 %v5510_v61 }
 0x509   : > { %8137 = vmatpush3.msra.mxu0 %v11015_v57  ;;  %8009 = vmatpush3.msra.mxu1 %v5510_v61 }
 0x50a   : > { %8138 = vmatprep.subr.mxu0 %v11019_v10  ;;  %8010 = vmatprep.subr.mxu1 %v5509_v54 }
 0x50b   : > { %8139 = vmatpush3.msra.mxu0 %v11019_v10  ;;  %8011 = vmatpush3.msra.mxu1 %v5509_v54 }
 0x50c   : > { %8140 = vmatprep.subr.mxu0 %v11023_v48  ;;  %8012 = vmatprep.subr.mxu1 %v5508_v41 }
 0x50d   : > { %8141 = vmatpush3.msra.mxu0 %v11023_v48  ;;  %8013 = vmatpush3.msra.mxu1 %v5508_v41 }
 0x50e   : > { %8142 = vmatprep.subr.mxu0 %v11027_v12  ;;  %8014 = vmatprep.subr.mxu1 %v5507_v43 }
 0x50f   : > { %8143 = vmatpush3.msra.mxu0 %v11027_v12  ;;  %8015 = vmatpush3.msra.mxu1 %v5507_v43 }
 0x510   : > { %8144 = vmatprep.subr.mxu0 %v11031_v7  ;;  %8016 = vmatprep.subr.mxu1 %v5506_v8 }
 0x511   : > { %8145 = vmatpush3.msra.mxu0 %v11031_v7  ;;  %8017 = vmatpush3.msra.mxu1 %v5506_v8 }
 0x512   : > { %8146 = vmatprep.subr.mxu0 %v11035_v31  ;;  %8018 = vmatprep.subr.mxu1 %v5505_v42 }
 0x513   : > { %8147 = vmatpush3.msra.mxu0 %v11035_v31  ;;  %8019 = vmatpush3.msra.mxu1 %v5505_v42 }
 0x514   : > { %8148 = vmatprep.subr.mxu0 %v11039_v37  ;;  %8021 = vmatmul.mubr.f32.vlgmr.msra.gmra.mxu1 %v10802_v1  ;;  %v5801_v1 = vld [vmem:[#allocation9 + $0x3e0] sm:$0xff] }
 0x515   : > { %8076 = vmatprep.subr.mxu1 %v5804_v19  ;;  %8149 = vmatpush3.msra.mxu0 %v11039_v37 }
 0x516   : > { %8023 = vmatprep.mubr.f32.mxu1 %v10808_v59  ;;  %8077 = vmatpush3.msra.mxu1 %v5804_v19  ;;  %v5800_v59 = vld [vmem:[#allocation9 + $0x3d8] sm:$0xff] }
 0x517   : > { %8150 = vmatprep.subr.mxu0 %v11044_v40  ;;  %8078 = vmatprep.subr.mxu1 %v5803_v53 }
 0x518   : > { %8151 = vmatpush3.msra.mxu0 %v11044_v40  ;;  %8079 = vmatpush3.msra.mxu1 %v5803_v53 }
 0x519   : > { %8153 = vmatmul.mubr.f32.vlgmr.msra.gmra.mxu0 %v10825_v44  ;;  %8024 = vmatmul.mubr.f32.gmra.mxu1 %v10831_v29  ;;  %v5798_v44 = vld [vmem:[#allocation9 + $0x3c8] sm:$0xff]  ;;  %v5503_v29 = vmul.f32 %v10858_v38, %v11056_v17 }
 0x51a   : > { %8080 = vmatprep.subr.mxu1 %v5802_v63  ;;  %8155 = vmatprep.mubr.f32.mxu0 %v10842_v60  ;;  %v5797_v60 = vld [vmem:[#allocation9 + $0x3c0] sm:$0xff] }
 0x51b   : > { %8026 = vmatprep.mubr.f32.mxu1 %v10849_v39  ;;  %8081 = vmatpush3.msra.mxu1 %v5802_v63  ;;  %v5780_v39 = vld [vmem:[#allocation5 + $0x18] sm:$0xff] }
 0x51c   : > { %8082 = vmatprep.subr.mxu1 %v5801_v1 }
 0x51d   : > { %8156 = vmatmul.mubr.f32.gmra.mxu0 %v10852_v26  ;;  %8083 = vmatpush3.msra.mxu1 %v5801_v1  ;;  %v5796_v26 = vld [vmem:[#allocation9 + $0x3b8] sm:$0xff] }
 0x51e   : > { %8027 = vmatmul.mubr.f32.gmra.mxu1 %v10860_v46  ;;  %8084 = vmatprep.subr.mxu1 %v5800_v59  ;;  %v5795_v46 = vld [vmem:[#allocation9 + $0x3b0] sm:$0xff] }
 0x51f   : > { %8029 = vmatprep.mubr.f32.mxu1 %v10884_v32  ;;  %8085 = vmatpush3.msra.mxu1 %v5800_v59  ;;  %v5794_v32 = vld [vmem:[#allocation9 + $0x3a8] sm:$0xff] }
 0x520   : > { %8086 = vmatprep.subr.mxu1 %v5799_v5 }
 0x521   : > { %8087 = vmatpush3.msra.mxu1 %v5799_v5 }
 0x522   : > { %8030 = vmatmul.mubr.f32.gmra.mxu1 %v5503_v29  ;;  %8088 = vmatprep.subr.mxu1 %v5798_v44 }
 0x523   : > { %8089 = vmatpush3.msra.mxu1 %v5798_v44  ;;  %8108 = vmatprep.mubr.f32.mxu1 %v5780_v39 }
 0x524   : > { %8090 = vmatprep.subr.mxu1 %v5797_v60 }
 0x525   : > { %8091 = vmatpush3.msra.mxu1 %v5797_v60 }
 0x526   : > { %8092 = vmatprep.subr.mxu1 %v5796_v26 }
 0x527   : > { %8093 = vmatpush3.msra.mxu1 %v5796_v26 }
 0x528   : > { %8094 = vmatprep.subr.mxu1 %v5795_v46 }
 0x529   : > { %8095 = vmatpush3.msra.mxu1 %v5795_v46 }
 0x52a   : > { %8096 = vmatprep.subr.mxu1 %v5794_v32 }
 0x52b   : > { %8097 = vmatpush3.msra.mxu1 %v5794_v32 }
 0x52c   : > { %8098 = vmatprep.subr.mxu1 %v5793_v2 }
 0x52d   : > { %8099 = vmatpush3.msra.mxu1 %v5793_v2 }
 0x52e   : > { %8100 = vmatprep.subr.mxu1 %v5792_v9 }
 0x52f   : > { %8101 = vmatpush3.msra.mxu1 %v5792_v9 }
 0x530   : > { %8102 = vmatprep.subr.mxu1 %v5791_v23 }
 0x531   : > { %8103 = vmatpush3.msra.mxu1 %v5791_v23 }
 0x532   : > { %8104 = vmatprep.subr.mxu1 %v5790_v45 }
 0x533   : > { %8105 = vmatpush3.msra.mxu1 %v5790_v45 }
 0x534   : > { %8106 = vmatprep.subr.mxu1 %v5789_v16 }
 0x535   : > { %8107 = vmatpush3.msra.mxu1 %v5789_v16 }
 0x536   : > { %8109 = vmatmul.mubr.f32.vlgmr.msra.gmra.mxu1 %v5781_v50  ;;  %8164 = vmatprep.subr.mxu1 %v10964_v20 }
 0x537   : > { %8111 = vmatprep.mubr.f32.mxu1 %v5782_v62  ;;  %8180 = vmatpush3.msra.mxu1 %v10964_v20  ;;  %v5786_v20 = vld [vmem:[#allocation5 + $0x48] sm:$0xff] }
 0x538   : > { %8165 = vmatprep.subr.mxu1 %v10973_v6 }
 0x539   : > { %8181 = vmatpush3.msra.mxu1 %v10973_v6  ;;  %v8398_v6 = vld [vmem:[#allocation2 + $0x8] sm:$0xff] }
 0x53a   : > { %8112 = vmatmul.mubr.f32.gmra.mxu1 %v5783_v25  ;;  %8166 = vmatprep.subr.mxu1 %v10979_v13 }
 0x53b   : > { %8114 = vmatprep.mubr.f32.mxu1 %v5784_v51  ;;  %8182 = vmatpush3.msra.mxu1 %v10979_v13  ;;  %v5932_v13 = vmul.f32 %v10846_v47, %v11056_v17 }
 0x53c   : > { %8167 = vmatprep.subr.mxu1 %v10989_v11 }
 0x53d   : > { %8183 = vmatpush3.msra.mxu1 %v10989_v11 }
 0x53e   : > { %8115 = vmatmul.mubr.f32.gmra.mxu1 %v5785_v18  ;;  %8168 = vmatprep.subr.mxu1 %v10995_v55 }
 0x53f   : > { %8117 = vmatprep.mubr.f32.mxu1 %v5786_v20  ;;  %8184 = vmatpush3.msra.mxu1 %v10995_v55  ;;  %v6137_v55 = vld [vmem:[#allocation2 + $0x108] sm:$0xff] }
 0x540   : > { %8169 = vmatprep.subr.mxu1 %v11001_v36  ;;  %v6139_v33 = vadd.f32 %v6137_v55, %v6135_v56 }
 0x541   : > { %8185 = vmatpush3.msra.mxu1 %v11001_v36 }
 0x542   : > { %8118 = vmatmul.mubr.f32.gmra.mxu1 %v8398_v6  ;;  %8170 = vmatprep.subr.mxu1 %v11007_v14  ;;  %6141 = vst [vmem:[#allocation4 + $0x70] sm:$0xff] %v6139_v33 }
 0x543   : > { %8186 = vmatpush3.msra.mxu1 %v11007_v14  ;;  %8158 = vmatprep.mubr.f32.mxu1 %v10863_v15  ;;  %v5925_v15 = vld [vmem:[#allocation5 + $0x51] sm:$0xff] }
 0x544   : > { %8171 = vmatprep.subr.mxu1 %v11010_v24  ;;  %v5933_v22 = vmul.f32 %v10858_v38, %v5925_v15 }
 0x545   : > { %8187 = vmatpush3.msra.mxu1 %v11010_v24 }
 0x546   : > { %8172 = vmatprep.subr.mxu1 %v11015_v57 }
 0x547   : > { %8188 = vmatpush3.msra.mxu1 %v11015_v57 }
 0x548   : > { %8173 = vmatprep.subr.mxu1 %v11019_v10 }
 0x549   : > { %8189 = vmatpush3.msra.mxu1 %v11019_v10 }
 0x54a   : > { %8174 = vmatprep.subr.mxu1 %v11023_v48 }
 0x54b   : > { %8190 = vmatpush3.msra.mxu1 %v11023_v48 }
 0x54c   : > { %8175 = vmatprep.subr.mxu1 %v11027_v12 }
 0x54d   : > { %8191 = vmatpush3.msra.mxu1 %v11027_v12 }
 0x54e   : > { %8176 = vmatprep.subr.mxu1 %v11031_v7 }
 0x54f   : > { %8192 = vmatpush3.msra.mxu1 %v11031_v7 }
 0x550   : > { %8177 = vmatprep.subr.mxu1 %v11035_v31 }
 0x551   : > { %8193 = vmatpush3.msra.mxu1 %v11035_v31 }
 0x552   : > { %8178 = vmatprep.subr.mxu1 %v11039_v37 }
 0x553   : > { %8194 = vmatpush3.msra.mxu1 %v11039_v37 }
 0x554   : > { %8179 = vmatprep.subr.mxu1 %v11044_v40 }
 0x555   : > { %8195 = vmatpush3.msra.mxu1 %v11044_v40 }
 0x556   : > { %8159 = vmatmul.mubr.f32.vlgmr.msra.gmra.mxu1 %v10873_v52 }
 0x557   : > { %8161 = vmatprep.mubr.f32.mxu1 %v5932_v13 }
 0x559   : > { %v7802_v21 = vpop.f32.mrf.mxu1 }
 0x55a   : > { %8162 = vmatmul.mubr.f32.gmra.mxu1 %v5933_v22 }
 0x55b   : > { %v4914_v3 = vpop.f32.mrf.mxu1 }
 0x561   : > { %v7805_v11 = vpop.f32.mrf.mxu1 }
 0x563   : > { %v4924_v58 = vpop.f32.mrf.mxu1 }
 0x567   : > { %v7890_v47 = vpop.f32.mrf.mxu0 }
 0x569   : > { %v5157_v38 = vpop.f32.mrf.mxu0 }
 0x56a   : > { %v11099_v30 = vpop.f32.mrf.mxu1 }
 0x56c   : > { %v11101_v49 = vpop.f32.mrf.mxu1 }
 0x570   : > { %v7893_v0 = vpop.f32.mrf.mxu0 }
 0x571   : > { %v11103_v4 = vpop.f32.mrf.mxu1 }
 0x572   : > { %v5167_v35 = vpop.f32.mrf.mxu0 }
 0x573   : > { %v11105_v52 = vpop.f32.mrf.mxu1 }
 0x578   : > { %v11107_v28 = vpop.f32.mrf.mxu0 }
 0x57a   : > { %v11109_v27 = vpop.f32.mrf.mxu0 }
 0x580   : > { %v11113_v61 = vpop.f32.mrf.mxu0 }
 0x582   : > { %v11117_v54 = vpop.f32.mrf.mxu0 }
 0x584   : > { %v7846_v36 = vpop.f32.mrf.mxu1 }
 0x585   : > { %v5025_v45 = vadd.f32 %v7846_v36, %v7802_v21 }
 0x586   : > { %v5019_v34 = vpop.f32.mrf.mxu1 }
 0x587   : > { %v5020_v16 = vadd.f32 %v5019_v34, %v4914_v3  ;;  %v5197_v51 = vadd.f32 %v7890_v47, %v5025_v45  ;;  %v6151_v45 = vld [vmem:[#allocation4 + $0x1] ss:$2 sm:$0xff] }
 0x589   : > { %v7978_v41 = vpop.f32.mrf.mxu0  ;;  %v5196_v6 = vadd.f32 %v5157_v38, %v5020_v16  ;;  %v6146_v16 = vld [vmem:[#allocation4 + $0x30] ss:$2 sm:$0xff] }
 0x58a   : > { %v7849_v14 = vpop.f32.mrf.mxu1 }
 0x58b   : > { %v5441_v43 = vpop.f32.mrf.mxu0  ;;  %v5035_v25 = vadd.f32 %v7849_v14, %v7805_v11  ;;  %v6152_v14 = vld [vmem:[#allocation4 + $0x11] ss:$2 sm:$0xff] }
 0x58c   : > { %v5029_v24 = vpop.f32.mrf.mxu1 }
 0x58d   : > { %v5030_v18 = vadd.f32 %v5029_v24, %v4924_v58  ;;  %v5199_v56 = vadd.f32 %v7893_v0, %v5035_v25  ;;  %v6144_v58 = vld [vmem:[#allocation4 + $0x10] ss:$2 sm:$0xff]  ;;  %v6154_v25 = vld [vmem:[#allocation4 + $0x31] ss:$2 sm:$0xff] }
 0x58f   : > { %v7981_v8 = vpop.f32.mrf.mxu0  ;;  %v5198_v33 = vadd.f32 %v5167_v35, %v5030_v18 }
 0x590   : > { %v11111_v57 = vpop.f32.mrf.mxu1 }
 0x591   : > { %v5451_v42 = vpop.f32.mrf.mxu0 }
 0x592   : > { %v11115_v10 = vpop.f32.mrf.mxu1 }
 0x595   : > { %v11123_v19 = vpop.f32.mrf.mxu0 }
 0x596   : > { %v11119_v48 = vpop.f32.mrf.mxu1 }
 0x597   : > { %v11125_v53 = vpop.f32.mrf.mxu0 }
 0x598   : > { %v11121_v12 = vpop.f32.mrf.mxu1 }
 0x59b   : > { %v11129_v1 = vpop.f32.mrf.mxu0 }
 0x59d   : > { %v11133_v5 = vpop.f32.mrf.mxu0 }
 0x5ac   : > { %v7934_v7 = vpop.f32.mrf.mxu1 }
 0x5ad   : > { %v5343_v20 = vadd.f32 %v7934_v7, %v5197_v51  ;;  %v6143_v7 = vld [vmem:[#allocation4] ss:$2 sm:$0xff] }
 0x5ae   : > { %v5303_v31 = vpop.f32.mrf.mxu1 }
 0x5af   : > { %v5342_v22 = vadd.f32 %v5303_v31, %v5196_v6 }
 0x5b1   : > { %v8066_v44 = vpop.f32.mrf.mxu0  ;;  %v5480_v11 = vadd.f32 %v5441_v43, %v5342_v22 }
 0x5b2   : > { %v7937_v37 = vpop.f32.mrf.mxu1 }
 0x5b3   : > { %v5733_v60 = vpop.f32.mrf.mxu0  ;;  %v5345_v55 = vadd.f32 %v7937_v37, %v5199_v56  ;;  %v6160_v37 = vadd.f32 %v6152_v14, %v6144_v58 }
 0x5b4   : > { %v5313_v40 = vpop.f32.mrf.mxu1 }
 0x5b5   : > { %v5344_v36 = vadd.f32 %v5313_v40, %v5198_v33  ;;  %v5483_v24 = vadd.f32 %v7981_v8, %v5345_v55  ;;  %v6153_v8 = vld [vmem:[#allocation4 + $0x21] ss:$2 sm:$0xff]  ;;  %v6168_v6 = vmul.f32 0.25, %v6160_v37 }
 0x5b7   : > { %v8069_v26 = vpop.f32.mrf.mxu0  ;;  %v5482_v35 = vadd.f32 %v5451_v42, %v5344_v36 }
 0x5b8   : > { %v11127_v63 = vpop.f32.mrf.mxu1 }
 0x5b9   : > { %v11139_v32 = vpop.f32.mrf.mxu0 }
 0x5ba   : > { %v11131_v59 = vpop.f32.mrf.mxu1 }
 0x5bd   : > { %v11141_v9 = vpop.f32.mrf.mxu0 }
 0x5be   : > { %v11135_v17 = vpop.f32.mrf.mxu1  ;;  %11486 = vst [vmem:[#allocation27_spill] sm:$0xff] %v11141_v9  ;;  %v5481_v9 = vadd.f32 %v7978_v41, %v5343_v20  ;;  %v11161_v20 = vld [vmem:[%s11269_s6] ss:$0 sm:$0xff] }
 0x5bf   : > { %v11143_v50 = vpop.f32.mrf.mxu0 }
 0x5c0   : > { %v11137_v29 = vpop.f32.mrf.mxu1 }
 0x5c3   : > { %v11147_v15 = vpop.f32.mrf.mxu0 }
 0x5c5   : > { %v11151_v21 = vpop.f32.mrf.mxu0 }
 0x5d4   : > { %v8022_v39 = vpop.f32.mrf.mxu1 }
 0x5d5   : > { %v5627_v34 = vadd.f32 %v8022_v39, %v5481_v9  ;;  %v6159_v39 = vadd.f32 %v6151_v45, %v6143_v7 }
 0x5d6   : > { %v5587_v46 = vpop.f32.mrf.mxu1 }
 0x5d7   : > { %v5626_v38 = vadd.f32 %v5587_v46, %v5480_v11  ;;  %v5773_v41 = vadd.f32 %v8066_v44, %v5627_v34  ;;  %v6145_v46 = vld [vmem:[#allocation4 + $0x20] ss:$2 sm:$0xff]  ;;  %v6162_v44 = vadd.f32 %v6154_v25, %v6146_v16  ;;  %v6167_v33 = vmul.f32 0.25, %v6159_v39 }
 0x5d8   : > { %v6161_v36 = vadd.f32 %v6153_v8, %v6145_v46  ;;  %v5055_v46 = vadd.f32 %v11119_v48, %v11103_v4 }
 0x5d9   : > { %v8025_v2 = vpop.f32.mrf.mxu1  ;;  %v8154_v47 = vpop.f32.mrf.mxu0  ;;  %v5772_v18 = vadd.f32 %v5733_v60, %v5626_v38  ;;  %v6170_v14 = vmul.f32 0.25, %v6162_v44  ;;  %v5050_v44 = vadd.f32 %v11121_v12, %v11105_v52 }
 0x5da   : > { %v5629_v0 = vadd.f32 %v8025_v2, %v5483_v24 }
 0x5db   : > { %v5597_v23 = vpop.f32.mrf.mxu1  ;;  %v6017_v51 = vpop.f32.mrf.mxu0  ;;  %v5202_v4 = vadd.f32 %v11117_v54, %v5050_v44 }
 0x5dc   : > { %v5628_v43 = vadd.f32 %v5597_v23, %v5482_v35  ;;  %v5775_v56 = vadd.f32 %v8069_v26, %v5629_v0  ;;  %v6169_v0 = vmul.f32 0.25, %v6161_v36 }
 0x5dd   : > { %v8157_v55 = vpop.f32.mrf.mxu0  ;;  %v5348_v48 = vadd.f32 %v11137_v29, %v5202_v4 }
 0x5de   : > { %v11145_v62 = vpop.f32.mrf.mxu1  ;;  %v5774_v58 = vadd.f32 %v11139_v32, %v5628_v43 }
 0x5df   : > { %v6027_v26 = vpop.f32.mrf.mxu0  ;;  %v5486_v54 = vadd.f32 %v11133_v5, %v5348_v48 }
 0x5e0   : > { %v11149_v13 = vpop.f32.mrf.mxu1 }
 0x5e2   : > { %v11153_v3 = vpop.f32.mrf.mxu1 }
 0x5e4   : > { %v11155_v31 = vpop.f32.mrf.mxu1 }
 0x5f6   : > { %v8110_v40 = vpop.f32.mrf.mxu1 }
 0x5f7   : > { %v5911_v9 = vadd.f32 %v8110_v40, %v5773_v41  ;;  %v5045_v40 = vadd.f32 %v11111_v57, %v11099_v30 }
 0x5f8   : > { %v5871_v42 = vpop.f32.mrf.mxu1 }
 0x5f9   : > { %v6057_v2 = vadd.f32 %v8154_v47, %v5911_v9  ;;  %v5910_v22 = vadd.f32 %v5871_v42, %v5772_v18  ;;  %v5040_v9 = vadd.f32 %v11115_v10, %v11101_v49  ;;  %v5201_v8 = vadd.f32 %v11107_v28, %v5045_v40 }
 0x5fa   : > { %v8113_v23 = vpop.f32.mrf.mxu1  ;;  %v5203_v49 = vadd.f32 %v11113_v61, %v5055_v46 }
 0x5fb   : > { %v6072_v60 = vadd.f32 %v11161_v20, %v6057_v2  ;;  %v6056_v34 = vadd.f32 %v6017_v51, %v5910_v22  ;;  %v5913_v11 = vadd.f32 %v8113_v23, %v5775_v56  ;;  %v5347_v30 = vadd.f32 %v11127_v63, %v5201_v8  ;;  %v6148_v63 = vld [vmem:[#allocation4 + $0x50] ss:$2 sm:$0xff]  ;;  %v6147_v56 = vld [vmem:[#allocation4 + $0x40] ss:$2 sm:$0xff] }
 0x5fc   : > { %v5881_v38 = vpop.f32.mrf.mxu1  ;;  %v5200_v57 = vadd.f32 %v11109_v27, %v5040_v9  ;;  %v6156_v27 = vld [vmem:[#allocation4 + $0x51] ss:$2 sm:$0xff]  ;;  %v6150_v23 = vld [vmem:[#allocation4 + $0x70] ss:$2 sm:$0xff] }
 0x5fd   : > { %v6176_v24 = vadd.f32 %v6168_v6, %v6072_v60  ;;  %v6071_v47 = vadd.f32 %v11161_v20, %v6056_v34  ;;  %v6059_v7 = vadd.f32 %v8157_v55, %v5913_v11  ;;  %v5912_v45 = vadd.f32 %v5881_v38, %v5774_v58  ;;  %v6155_v55 = vld [vmem:[#allocation4 + $0x41] ss:$2 sm:$0xff]  ;;  %v6149_v11 = vld [vmem:[#allocation4 + $0x60] ss:$2 sm:$0xff] }
 0x5fe   : > { %v8116_v42 = vpop.f32.mrf.mxu1  ;;  %v5346_v2 = vadd.f32 %v11131_v59, %v5200_v57  ;;  %v5349_v6 = vadd.f32 %v11135_v17, %v5203_v49  ;;  %v5485_v28 = vadd.f32 %v11123_v19, %v5347_v30  ;;  %v11487_v19 = vld [vmem:[#allocation27_spill] sm:$0xff]  ;;  %v6164_v29 = vadd.f32 %v6156_v27, %v6148_v63 }
 0x5ff   : > { %v6184_v35 = vmul.f32 0.70710677, %v6176_v24  ;;  %v6175_v41 = vadd.f32 %v6167_v33, %v6071_v47  ;;  %v6074_v37 = vadd.f32 %v11161_v20, %v6059_v7  ;;  %v6058_v16 = vadd.f32 %v6027_v26, %v5912_v45 }
 0x600   : > { %v5891_v10 = vpop.f32.mrf.mxu1  ;;  %v5631_v22 = vadd.f32 %v11145_v62, %v5485_v28  ;;  %v5484_v52 = vadd.f32 %v11125_v53, %v5346_v2  ;;  %v5487_v61 = vadd.f32 %v11129_v1, %v5349_v6  ;;  %v6158_v62 = vld [vmem:[#allocation4 + $0x71] ss:$2 sm:$0xff]  ;;  %v6163_v53 = vadd.f32 %v6155_v55, %v6147_v56  ;;  %v6157_v1 = vld [vmem:[#allocation4 + $0x61] ss:$2 sm:$0xff] }
 0x601   : > { %6192 = vst [vmem:[%s11169_s16 + $0x8] sm:$0xff] %v6184_v35  ;;  %v6183_v32 = vmul.f32 0.70710677, %v6175_v41  ;;  %v6178_v25 = vadd.f32 %v6170_v14, %v6074_v37  ;;  %v6073_v51 = vadd.f32 %v11161_v20, %v6058_v16  ;;  %v5632_v60 = vadd.f32 %v11155_v31, %v5486_v54 }
 0x602   : > { %v8119_v12 = vpop.f32.mrf.mxu1  ;;  %v5630_v59 = vadd.f32 %v11149_v13, %v5484_v52  ;;  %v5633_v17 = vadd.f32 %v11153_v3, %v5487_v61  ;;  %v5777_v33 = vadd.f32 %v11487_v19, %v5631_v22  ;;  %v6166_v14 = vadd.f32 %v6158_v62, %v6150_v23 }
 0x603   : > { %6191 = vst [vmem:[%s11169_s16] sm:$0xff] %v6183_v32  ;;  %v6186_v39 = vmul.f32 0.70710677, %v6178_v25  ;;  %v6177_v43 = vadd.f32 %v6169_v0, %v6073_v51  ;;  %v6172_v24 = vmul.f32 0.25, %v6164_v29  ;;  %v6171_v7 = vmul.f32 0.25, %v6163_v53 }
 0x604   : > { %v5901_v36 = vpop.f32.mrf.mxu1  ;;  %v5915_v34 = vadd.f32 %v8116_v42, %v5777_v33  ;;  %v5776_v13 = vadd.f32 %v11143_v50, %v5630_v59  ;;  %v5779_v3 = vadd.f32 %v11147_v15, %v5633_v17  ;;  %v6165_v45 = vadd.f32 %v6157_v1, %v6149_v11 }
 0x605   : > { %6194 = vst [vmem:[%s11169_s16 + $0x18] sm:$0xff] %v6186_v39  ;;  %v6185_v18 = vmul.f32 0.70710677, %v6177_v43  ;;  %v5778_v0 = vadd.f32 %v11151_v21, %v5632_v60  ;;  %v6174_v41 = vmul.f32 0.25, %v6166_v14 }
 0x606   : > { %v5914_v38 = vadd.f32 %v5891_v10, %v5776_v13  ;;  %v5917_v26 = vadd.f32 %v8119_v12, %v5779_v3  ;;  %v6173_v51 = vmul.f32 0.25, %v6165_v45 }
 0x607   : > { %6193 = vst [vmem:[%s11169_s16 + $0x10] sm:$0xff] %v6185_v18  ;;  %v5916_v37 = vadd.f32 %v5901_v36, %v5778_v0 }
 0x616   : > { %v8160_v58 = vpop.f32.mrf.mxu1 }
 0x617   : > { %v6061_v5 = vadd.f32 %v8160_v58, %v5915_v34 }
 0x618   : > { %v6037_v47 = vpop.f32.mrf.mxu1 }
 0x619   : > { %v6076_v31 = vadd.f32 %v11161_v20, %v6061_v5  ;;  %v6060_v35 = vadd.f32 %v6037_v47, %v5914_v38 }
 0x61a   : > { %v8163_v50 = vpop.f32.mrf.mxu1 }
 0x61b   : > { %v6180_v16 = vadd.f32 %v6172_v24, %v6076_v31  ;;  %v6075_v15 = vadd.f32 %v11161_v20, %v6060_v35  ;;  %v6063_v32 = vadd.f32 %v8163_v50, %v5917_v26 }
 0x61c   : > { %v6047_v25 = vpop.f32.mrf.mxu1 }
 0x61d   : > { %v6188_v40 = vmul.f32 0.70710677, %v6180_v16  ;;  %v6179_v39 = vadd.f32 %v6171_v7, %v6075_v15  ;;  %v6078_v21 = vadd.f32 %v11161_v20, %v6063_v32  ;;  %v6062_v43 = vadd.f32 %v6047_v25, %v5916_v37 }
 0x61f   : > { %6196 = vst [vmem:[%s11169_s16 + $0x28] sm:$0xff] %v6188_v40  ;;  %v6187_v9 = vmul.f32 0.70710677, %v6179_v39  ;;  %v6182_v18 = vadd.f32 %v6174_v41, %v6078_v21  ;;  %v6077_v46 = vadd.f32 %v11161_v20, %v6062_v43 }
 0x621   : > { %6195 = vst [vmem:[%s11169_s16 + $0x20] sm:$0xff] %v6187_v9  ;;  %v6190_v8 = vmul.f32 0.70710677, %v6182_v18  ;;  %v6181_v42 = vadd.f32 %v6173_v51, %v6077_v46 }
 0x623   : > { %6198 = vst [vmem:[%s11169_s16 + $0x38] sm:$0xff] %v6190_v8  ;;  %v6189_v44 = vmul.f32 0.70710677, %v6181_v42 }
 0x625   : > { %6197 = vst [vmem:[%s11169_s16 + $0x30] sm:$0xff] %v6189_v44 }
 0x626   : > { %8464 = shalt.err (!%p8461_p3)
}
 0x627   : > { %s8465_s9 = scalar_lea.hbm %s11215_s21, 1024  ;;  %s8469_s15 = scalar_lea.hbm %s11270_s7, 2048 }
 0x628   : > { %p8466_p2 = scmp.ne.s32.totalorder %s11215_s21, %s8465_s9  ;;  %p8470_p7 = scmp.lt.s32.totalorder %s11215_s21, %s11270_s7 }
 0x629   : > { %p8471_p6 = scmp.lt.s32.totalorder %s8469_s15, %s8465_s9 }
 0x62a   : > { %p8467_p4 = pnand %p8466_p2, %p8607_p5 }
 0x62b   : > { %p8472_p9 = por %p8471_p6, %p8470_p7 }
 0x62c   : > { %p8468_p13 = pneg %p8467_p4 }
 0x62e   : > { %p8473_p10 = pnand %p8472_p9, %p8468_p13 }
 0x630   : > { %8476 = shalt.err (!%p8473_p10)
}
 0x631   : > { %s8527_s19 = smov 128   ;;  %s8528_s20 = smov 8  }
 0x632   : > { %8208 = dma.vmem_to_hbm [thread:$0]  (%p8607_p5), %s11217_s18, 1024, %s11215_s21, %s11223_s22, %s8527_s19, %s8527_s19, %s8528_s20  }
 0x633 PF: > { %p8225_p12 = scmp.ge.s32.totalorder %s8519_s27, 2  ;;  %s6228_s28 = sand.u32 1, %s8507_s24  }
 0x634   : > { %p11488_p8 = scmp.ne.s32.totalorder %s11310_s12, 0  ;;  %s6229_s23 = scalar_lea.sflag [#allocation8], %s6228_s28 }
 0x636   : > { %p8218_p11 = pnand %p8225_p12, %p11488_p8 }
 0x638   : > { %p8219_p0 = pneg %p8218_p11 }
 0x63a   : > { %8502 = dma.done.wait (%p8219_p0), %s6229_s23, 1024  }
 0x63b   : > { %8504 = vsyncadd (%p8219_p0), %s6229_s23, 4294966272  ;;  %p19_p1 = scmp.ge.s32.totalorder %s8594_s30, 4   ;;  %s11489_s24 = smov %s8511_s25 }
 0x63c   : > { %s11490_s25 = smov %s8515_s26  ;;  %s11491_s26 = smov %s8605_s10 }
 0x63d   : > { %s11492_s27 = smov %s8594_s30  ;;  %21 = sbr.rel (!%p19_p1) target bundleno = 5 (0x5), region = 123 }
 0x642   :  { %6234 = vsyncpa [#allocation7], 1 }
 0x643   :  { %6236 = vsyncpa [#allocation7 + $0x1], 1 }
 0x644   :  { %6237 = vsyncpa [#allocation10], 1 }
 0x645   :  { %6238 = vsyncpa [#allocation8], 1 }
 0x646   :  { %6240 = vsyncpa [#allocation8 + $0x1], 1 }

</bundles_post_ra>
